<compile_context>
chip_gen: v7x
topology: tpu7x:2x2x1
jax: 0.10.0
libtpu: 0.0.40
codegen_flags: <defaults>
</compile_context>

<pallas_src>
import numpy as np

import jax
import jax.numpy as jnp
from jax.experimental import pallas as pl
from jax.experimental.pallas import tpu as pltpu  # noqa: F401  (not needed at toy size)

LANES = 128


def _ceil8(n):
    return ((n + 7) // 8) * 8


def _conv_out(x, s):
    # kernel 3, padding 1
    return (x + 2 - 3) // s + 1


# ---------------------------------------------------------------------------
# Parameters (mirrors NLayerDiscriminator3D.__init__: kw=3, padw=1)
# ---------------------------------------------------------------------------
def init_params(key, input_nc=4, ndf=8, n_layers=3):
    cfgs = [dict(cin=input_nc, cout=ndf, stride=(2, 2, 2), bias=True, bn=False, act=True)]
    nf_mult = 1
    for n in range(1, n_layers):
        nf_prev, nf_mult = nf_mult, min(2 ** n, 8)
        cfgs.append(dict(cin=ndf * nf_prev, cout=ndf * nf_mult,
                         stride=(2, 2, 2) if n == 1 else (1, 2, 2),
                         bias=False, bn=True, act=True))
    nf_prev, nf_mult = nf_mult, min(2 ** n_layers, 8)
    cfgs.append(dict(cin=ndf * nf_prev, cout=ndf * nf_mult, stride=(1, 1, 1),
                     bias=False, bn=True, act=True))
    cfgs.append(dict(cin=ndf * nf_mult, cout=1, stride=(1, 1, 1),
                     bias=True, bn=False, act=False))

    params = []
    for cfg in cfgs:
        key, k1, k2, k3, k4 = jax.random.split(key, 5)
        # torch Conv3d weight layout: (Cout, Cin, kD, kH, kW)
        w = 0.1 * jax.random.normal(k1, (cfg["cout"], cfg["cin"], 3, 3, 3), jnp.float32)
        b = (0.05 * jax.random.normal(k2, (cfg["cout"],), jnp.float32)
             if cfg["bias"] else jnp.zeros((cfg["cout"],), jnp.float32))
        gamma = ((1.0 + 0.1 * jax.random.normal(k3, (cfg["cout"],), jnp.float32))
                 if cfg["bn"] else None)
        beta = (0.1 * jax.random.normal(k4, (cfg["cout"],), jnp.float32)
                if cfg["bn"] else None)
        params.append(dict(cfg=cfg, w=w, b=b, gamma=gamma, beta=beta))
    return params


# ---------------------------------------------------------------------------
# One-time host precompute: packed constant buffers + static layout metadata
# ---------------------------------------------------------------------------
class _Bf16Packer:
    """Packs 2-D matrices (cols <= 128) into one tall 128-lane bf16 buffer."""

    def __init__(self):
        self._blocks = []
        self._rows = 0

    def add(self, mat):
        mat = np.asarray(mat, np.float32)
        r, c = mat.shape
        assert c <= LANES, f"matrix too wide for packed buffer: {mat.shape}"
        rp = _ceil8(r)
        blk = np.zeros((rp, LANES), np.float32)
        blk[:r, :c] = mat
        off = self._rows
        self._blocks.append(blk)
        self._rows += rp
        return off

    def finalize(self):
        return jnp.asarray(np.concatenate(self._blocks, axis=0), jnp.bfloat16)


def _build_constants(params, in_shape_ncdhw):
    """Activation "line" layout: rows = (n, d, h) row-major, lanes = (w, c), c minor.

    Per 3x3x3 conv layer and per (kd, kh) tap:
      sel  : (Rout, Rin) 0/1 gather of the shifted / D,H-strided input lines
             (all-zero row == spatial padding), stored stacked tall over the 9 taps
             and chunked into <=128-lane column blocks.
      wemb : (W*Cin, Wo*Cout) "embedded" weight holding w[cout,cin,kd,kh,kw] at
             [wi*Cin+cin, wo*Cout+cout] with wi = sw*wo + kw - 1; encodes the kw
             taps, the W stride and W padding.  conv = sum_t (sel_t @ x) @ wemb_t.
    BatchNorm uses a 0/1 same-channel averaging matrix p_avg on the (w, c) lanes.
    """
    N0, C0, D0, H0, W0 = in_shape_ncdhw
    N, D, H, W, C = N0, D0, H0, W0, C0
    pk = _Bf16Packer()
    f32_rows = []
    layout = []

    for layer in params:
        cfg = layer["cfg"]
        sd, sh, sw = cfg["stride"]
        cin, cout = cfg["cin"], cfg["cout"]
        assert cin == C
        Do, Ho, Wo = _conv_out(D, sd), _conv_out(H, sh), _conv_out(W, sw)
        Rin, Rout = N * D * H, N * Do * Ho
        Kin, Nout = W * cin, Wo * cout
        rout_p, kin_p = _ceil8(Rout), _ceil8(Kin)

        # --- row-selection matrices, stacked over the 9 (kd, kh) taps ------------
        sel = np.zeros((9, Rout, Rin), np.float32)
        for kd in range(3):
            for kh in range(3):
                t = kd * 3 + kh
                for n in range(N):
                    for do in range(Do):
                        di = sd * do + kd - 1
                        if not 0 <= di < D:
                            continue
                        for ho in range(Ho):
                            hi = sh * ho + kh - 1
                            if not 0 <= hi < H:
                                continue
                            sel[t, (n * Do + do) * Ho + ho, (n * D + di) * H + hi] = 1.0
        chunks = []
        for c0 in range(0, Rin, LANES):          # split Rin into <=128-lane chunks
            cw = min(LANES, Rin - c0)
            blk = np.zeros((9 * rout_p, cw), np.float32)
            for t in range(9):
                blk[t * rout_p:t * rout_p + Rout, :] = sel[t, :, c0:c0 + cw]
            chunks.append((pk.add(blk), cw, c0))

        # --- embedded weights ----------------------------------------------------
        w_np = np.asarray(layer["w"], np.float32)            # (Cout, Cin, 3, 3, 3)
        wemb = np.zeros((9, Kin, Nout), np.float32)
        for kd in range(3):
            for kh in range(3):
                t = kd * 3 + kh
                for wo in range(Wo):
                    for kw in range(3):
                        wi = sw * wo + kw - 1
                        if not 0 <= wi < W:
                            continue
                        wemb[t, wi * cin:(wi + 1) * cin, wo * cout:(wo + 1) * cout] = \
                            w_np[:, :, kd, kh, kw].T
        # Skinny outputs (final 1-channel conv): store tap-transposed to avoid a
        # huge lane-padding blowup in the 128-wide packed buffer.
        wemb_T = (Nout <= 8) and (Kin <= LANES)
        if wemb_T:
            tap_rows = _ceil8(Nout)
            blk = np.zeros((9 * tap_rows, Kin), np.float32)
            for t in range(9):
                blk[t * tap_rows:t * tap_rows + Nout, :] = wemb[t].T
        else:
            assert Nout <= LANES, "toy-shape packer limit (see TODO on lane tiling)"
            tap_rows = kin_p
            blk = np.zeros((9 * tap_rows, Nout), np.float32)
            for t in range(9):
                blk[t * tap_rows:t * tap_rows + Kin, :] = wemb[t]
        wemb_off = pk.add(blk)

        meta = dict(rout=Rout, rout_p=rout_p, kin=Kin, nout=Nout,
                    chunks=chunks, wemb_off=wemb_off, wemb_T=wemb_T, tap_rows=tap_rows,
                    bias_row=None, pavg_off=None, gamma_row=None, beta_row=None,
                    bn=cfg["bn"], act=cfg["act"],
                    inv_npix=1.0 / float(N * Do * Ho * Wo))
        if cfg["bias"]:
            row = np.zeros((LANES,), np.float32)
            row[:Nout] = np.tile(np.asarray(layer["b"], np.float32), Wo)
            meta["bias_row"] = len(f32_rows)
            f32_rows.append(row)
        if cfg["bn"]:
            assert Nout <= LANES
            # P[wi*C+c, wo*C+c'] = 1 iff c == c'  -> lane vector @ P sums same-channel lanes.
            meta["pavg_off"] = pk.add(np.tile(np.eye(cout, dtype=np.float32), (Wo, Wo)))
            grow = np.zeros((LANES,), np.float32)
            grow[:Nout] = np.tile(np.asarray(layer["gamma"], np.float32), Wo)
            brow = np.zeros((LANES,), np.float32)
            brow[:Nout] = np.tile(np.asarray(layer["beta"], np.float32), Wo)
            meta["gamma_row"] = len(f32_rows)
            f32_rows.append(grow)
            meta["beta_row"] = len(f32_rows)
            f32_rows.append(brow)
        layout.append(meta)
        D, H, W, C = Do, Ho, Wo, cout            # next layer's input shape

    while len(f32_rows) % 8:
        f32_rows.append(np.zeros((LANES,), np.float32))
    const_bf16 = pk.finalize()
    const_f32 = jnp.asarray(np.stack(f32_rows, axis=0), jnp.float32)
    return const_bf16, const_f32, layout, (N, D, H, W, C)


# ---------------------------------------------------------------------------
# The fused Pallas kernel (whole network, single invocation, everything in VMEM)
# ---------------------------------------------------------------------------
def _make_kernel(layout):
    def kernel(x_ref, cbf_ref, cf32_ref, out_ref):
        xb = x_ref[...]                                        # bf16 activation lines
        y = None
        for L in layout:
            rout, rout_p, kin, nout = L["rout"], L["rout_p"], L["kin"], L["nout"]
            # (1) all 9 (kd,kh) taps gathered with ONE tall matmul per 128-row x chunk.
            G = None
            for off, cw, x0 in L["chunks"]:
                g = jnp.dot(cbf_ref[off:off + 9 * rout_p, 0:cw],
                            xb[x0:x0 + cw, :],
                            preferred_element_type=jnp.float32)
                G = g if G is None else G + g
            Gb = G.astype(jnp.bfloat16)                        # exact: pure row gather of bf16 lines
            # (2) per-tap embedded-weight matmul (kw taps, W stride/pad, channel mix).
            acc = None
            for t in range(9):
                gt = Gb[t * rout_p:t * rout_p + rout, :]
                woff = L["wemb_off"] + t * L["tap_rows"]
                if L["wemb_T"]:
                    wt = cbf_ref[woff:woff + nout, 0:kin]      # (Nout, Kin): contract on Kin
                    ct = jax.lax.dot_general(gt, wt, (((1,), (1,)), ((), ())),
                                             preferred_element_type=jnp.float32)
                else:
                    wt = cbf_ref[woff:woff + kin, 0:nout]
                    ct = jnp.dot(gt, wt, preferred_element_type=jnp.float32)
                acc = ct if acc is None else acc + ct
            y = acc                                            # (Rout, Nout) f32
            if L["bias_row"] is not None:
                r = L["bias_row"]
                y = y + cf32_ref[r:r + 1, 0:nout]
            if L["bn"]:
                # BatchNorm3d with training-mode batch stats over (N, D, H, W), eps=1e-5.
                p = cbf_ref[L["pavg_off"]:L["pavg_off"] + nout, 0:nout].astype(jnp.float32)
                gr, br = L["gamma_row"], L["beta_row"]
                gamma = cf32_ref[gr:gr + 1, 0:nout]
                beta = cf32_ref[br:br + 1, 0:nout]
                s = jnp.sum(y, axis=0, keepdims=True)
                mean = jnp.dot(s, p, preferred_element_type=jnp.float32) * L["inv_npix"]
                d = y - mean
                var = jnp.dot(jnp.sum(d * d, axis=0, keepdims=True), p,
                              preferred_element_type=jnp.float32) * L["inv_npix"]
                y = d * jax.lax.rsqrt(var + 1e-5) * gamma + beta
            if L["act"]:
                y = jnp.where(y >= 0.0, y, 0.2 * y)            # LeakyReLU(0.2)
            xb = y.astype(jnp.bfloat16)
        out_ref[...] = y                                       # last layer, f32

    return kernel


# ---------------------------------------------------------------------------
# Builder: one-time precompute + jitted forward (NCDHW in / NCDHW out)
# ---------------------------------------------------------------------------
def build_discriminator(params, in_shape_ncdhw):
    N0, C0, D0, H0, W0 = in_shape_ncdhw
    const_bf16, const_f32, layout, out_ndhwc = _build_constants(params, in_shape_ncdhw)
    No, Do, Ho, Wo, Co = out_ndhwc

    fused = pl.pallas_call(
        _make_kernel(layout),
        out_shape=jax.ShapeDtypeStruct((No * Do * Ho, Wo * Co), jnp.float32),
    )

    @jax.jit
    def _forward(x_ncdhw, cbf, cf32):
        # NCDHW -> NDHWC -> lines: rows = (n, d, h), lanes = (w, c) with c minor.
        x_lines = jnp.transpose(x_ncdhw, (0, 2, 3, 4, 1)).reshape(N0 * D0 * H0, W0 * C0)
        out_lines = fused(x_lines.astype(jnp.bfloat16), cbf, cf32)
        out = out_lines.reshape(No, Do, Ho, Wo, Co)
        return jnp.transpose(out, (0, 4, 1, 2, 3))             # back to NCDHW

    return lambda x: _forward(x, const_bf16, const_f32)


# ---------------------------------------------------------------------------
# Pure-JAX reference (lax.conv) for correctness checking
# ---------------------------------------------------------------------------
def reference_forward(x_ncdhw, params):
    x = jnp.transpose(x_ncdhw, (0, 2, 3, 4, 1))
    for p in params:
        cfg = p["cfg"]
        w = jnp.transpose(p["w"], (2, 3, 4, 1, 0))             # DHWIO
        y = jax.lax.conv_general_dilated(
            x, w, window_strides=cfg["stride"], padding=[(1, 1)] * 3,
            dimension_numbers=("NDHWC", "DHWIO", "NDHWC"))
        y = y + p["b"]
        if cfg["bn"]:
            mean = jnp.mean(y, axis=(0, 1, 2, 3), keepdims=True)
            var = jnp.mean(jnp.square(y - mean), axis=(0, 1, 2, 3), keepdims=True)
            y = (y - mean) * jax.lax.rsqrt(var + 1e-5)
            y = y * p["gamma"] + p["beta"]
        if cfg["act"]:
            y = jnp.where(y >= 0, y, 0.2 * y)
        x = y
    return jnp.transpose(x, (0, 4, 1, 2, 3))


if __name__ == "__main__":
    key = jax.random.PRNGKey(0)
    kx, kp = jax.random.split(key)

    # Small shapes consistent with the module: N=2, C=4, D=8, H=W=16 (NCDHW), ndf=8.
    x = jax.random.normal(kx, (2, 4, 8, 16, 16), jnp.float32)
    params = init_params(kp, input_nc=4, ndf=8, n_layers=3)

    forward = build_discriminator(params, x.shape)   # one-time host precompute + jit
    out = jax.block_until_ready(forward(x))

    ref = reference_forward(x, params)
    assert out.shape == ref.shape == (2, 1, 2, 2, 2), (out.shape, ref.shape)
    err = float(jnp.max(jnp.abs(out - ref)))
    scale = float(jnp.max(jnp.abs(ref)))
    # bf16 operands with f32 accumulation through 5 layers: tolerance scaled to output magnitude.
    assert err <= 2.5e-2 * max(scale, 1.0), f"mismatch vs f32 reference: {err} (ref scale {scale})"

    print("KERNEL_OK")
</pallas_src>

<mosaic_0001>
module attributes {stable_mosaic.version = 11 : i64} {
  func.func @kernel(%arg0: memref<256x64xbf16, #tpu.memory_space<vmem>>, %arg1: memref<4144x128xbf16, #tpu.memory_space<vmem>>, %arg2: memref<8x128xf32, #tpu.memory_space<vmem>>, %arg3: memref<8x2xf32, #tpu.memory_space<vmem>>) attributes {dimension_semantics = [], scalar_prefetch = 0 : i64, scratch_operands = 0 : i64, tpu.core_type = #tpu.core_type<tc>} {
    %c0 = arith.constant 0 : index
    %c0_0 = arith.constant 0 : index
    %0 = vector.load %arg0[%c0, %c0_0] : memref<256x64xbf16, #tpu.memory_space<vmem>>, vector<256x64xbf16>
    %c0_1 = arith.constant 0 : index
    %c0_2 = arith.constant 0 : index
    %1 = vector.load %arg1[%c0_1, %c0_2] : memref<4144x128xbf16, #tpu.memory_space<vmem>>, vector<576x128xbf16>
    %2 = vector.extract_strided_slice %0 {offsets = [0, 0], sizes = [128, 64], strides = [1, 1]} : vector<256x64xbf16> to vector<128x64xbf16>
    %cst = arith.constant dense<0.000000e+00> : vector<576x64xf32>
    %3 = tpu.matmul %1, %2, %cst {dimension_numbers = #tpu.dot_dimension_numbers<[1], [0], [0], [1], [0, 0, 1, 1], [], []>} : vector<576x128xbf16>, vector<128x64xbf16>, vector<576x64xf32> -> vector<576x64xf32>
    %c576 = arith.constant 576 : index
    %c0_3 = arith.constant 0 : index
    %4 = vector.load %arg1[%c576, %c0_3] : memref<4144x128xbf16, #tpu.memory_space<vmem>>, vector<576x128xbf16>
    %5 = vector.extract_strided_slice %0 {offsets = [128, 0], sizes = [128, 64], strides = [1, 1]} : vector<256x64xbf16> to vector<128x64xbf16>
    %cst_4 = arith.constant dense<0.000000e+00> : vector<576x64xf32>
    %6 = tpu.matmul %4, %5, %cst_4 {dimension_numbers = #tpu.dot_dimension_numbers<[1], [0], [0], [1], [0, 0, 1, 1], [], []>} : vector<576x128xbf16>, vector<128x64xbf16>, vector<576x64xf32> -> vector<576x64xf32>
    %7 = arith.addf %3, %6 : vector<576x64xf32>
    %8 = arith.truncf %7 : vector<576x64xf32> to vector<576x64xbf16>
    %9 = vector.extract_strided_slice %8 {offsets = [0, 0], sizes = [64, 64], strides = [1, 1]} : vector<576x64xbf16> to vector<64x64xbf16>
    %c1152 = arith.constant 1152 : index
    %c0_5 = arith.constant 0 : index
    %10 = vector.load %arg1[%c1152, %c0_5] : memref<4144x128xbf16, #tpu.memory_space<vmem>>, vector<64x64xbf16>
    %cst_6 = arith.constant dense<0.000000e+00> : vector<64x64xf32>
    %11 = tpu.matmul %9, %10, %cst_6 {dimension_numbers = #tpu.dot_dimension_numbers<[1], [0], [0], [1], [0, 0, 1, 1], [], []>} : vector<64x64xbf16>, vector<64x64xbf16>, vector<64x64xf32> -> vector<64x64xf32>
    %12 = vector.extract_strided_slice %8 {offsets = [64, 0], sizes = [64, 64], strides = [1, 1]} : vector<576x64xbf16> to vector<64x64xbf16>
    %c1216 = arith.constant 1216 : index
    %c0_7 = arith.constant 0 : index
    %13 = vector.load %arg1[%c1216, %c0_7] : memref<4144x128xbf16, #tpu.memory_space<vmem>>, vector<64x64xbf16>
    %cst_8 = arith.constant dense<0.000000e+00> : vector<64x64xf32>
    %14 = tpu.matmul %12, %13, %cst_8 {dimension_numbers = #tpu.dot_dimension_numbers<[1], [0], [0], [1], [0, 0, 1, 1], [], []>} : vector<64x64xbf16>, vector<64x64xbf16>, vector<64x64xf32> -> vector<64x64xf32>
    %15 = arith.addf %11, %14 : vector<64x64xf32>
    %16 = vector.extract_strided_slice %8 {offsets = [128, 0], sizes = [64, 64], strides = [1, 1]} : vector<576x64xbf16> to vector<64x64xbf16>
    %c1280 = arith.constant 1280 : index
    %c0_9 = arith.constant 0 : index
    %17 = vector.load %arg1[%c1280, %c0_9] : memref<4144x128xbf16, #tpu.memory_space<vmem>>, vector<64x64xbf16>
    %cst_10 = arith.constant dense<0.000000e+00> : vector<64x64xf32>
    %18 = tpu.matmul %16, %17, %cst_10 {dimension_numbers = #tpu.dot_dimension_numbers<[1], [0], [0], [1], [0, 0, 1, 1], [], []>} : vector<64x64xbf16>, vector<64x64xbf16>, vector<64x64xf32> -> vector<64x64xf32>
    %19 = arith.addf %15, %18 : vector<64x64xf32>
    %20 = vector.extract_strided_slice %8 {offsets = [192, 0], sizes = [64, 64], strides = [1, 1]} : vector<576x64xbf16> to vector<64x64xbf16>
    %c1344 = arith.constant 1344 : index
    %c0_11 = arith.constant 0 : index
    %21 = vector.load %arg1[%c1344, %c0_11] : memref<4144x128xbf16, #tpu.memory_space<vmem>>, vector<64x64xbf16>
    %cst_12 = arith.constant dense<0.000000e+00> : vector<64x64xf32>
    %22 = tpu.matmul %20, %21, %cst_12 {dimension_numbers = #tpu.dot_dimension_numbers<[1], [0], [0], [1], [0, 0, 1, 1], [], []>} : vector<64x64xbf16>, vector<64x64xbf16>, vector<64x64xf32> -> vector<64x64xf32>
    %23 = arith.addf %19, %22 : vector<64x64xf32>
    %24 = vector.extract_strided_slice %8 {offsets = [256, 0], sizes = [64, 64], strides = [1, 1]} : vector<576x64xbf16> to vector<64x64xbf16>
    %c1408 = arith.constant 1408 : index
    %c0_13 = arith.constant 0 : index
    %25 = vector.load %arg1[%c1408, %c0_13] : memref<4144x128xbf16, #tpu.memory_space<vmem>>, vector<64x64xbf16>
    %cst_14 = arith.constant dense<0.000000e+00> : vector<64x64xf32>
    %26 = tpu.matmul %24, %25, %cst_14 {dimension_numbers = #tpu.dot_dimension_numbers<[1], [0], [0], [1], [0, 0, 1, 1], [], []>} : vector<64x64xbf16>, vector<64x64xbf16>, vector<64x64xf32> -> vector<64x64xf32>
    %27 = arith.addf %23, %26 : vector<64x64xf32>
    %28 = vector.extract_strided_slice %8 {offsets = [320, 0], sizes = [64, 64], strides = [1, 1]} : vector<576x64xbf16> to vector<64x64xbf16>
    %c1472 = arith.constant 1472 : index
    %c0_15 = arith.constant 0 : index
    %29 = vector.load %arg1[%c1472, %c0_15] : memref<4144x128xbf16, #tpu.memory_space<vmem>>, vector<64x64xbf16>
    %cst_16 = arith.constant dense<0.000000e+00> : vector<64x64xf32>
    %30 = tpu.matmul %28, %29, %cst_16 {dimension_numbers = #tpu.dot_dimension_numbers<[1], [0], [0], [1], [0, 0, 1, 1], [], []>} : vector<64x64xbf16>, vector<64x64xbf16>, vector<64x64xf32> -> vector<64x64xf32>
    %31 = arith.addf %27, %30 : vector<64x64xf32>
    %32 = vector.extract_strided_slice %8 {offsets = [384, 0], sizes = [64, 64], strides = [1, 1]} : vector<576x64xbf16> to vector<64x64xbf16>
    %c1536 = arith.constant 1536 : index
    %c0_17 = arith.constant 0 : index
    %33 = vector.load %arg1[%c1536, %c0_17] : memref<4144x128xbf16, #tpu.memory_space<vmem>>, vector<64x64xbf16>
    %cst_18 = arith.constant dense<0.000000e+00> : vector<64x64xf32>
    %34 = tpu.matmul %32, %33, %cst_18 {dimension_numbers = #tpu.dot_dimension_numbers<[1], [0], [0], [1], [0, 0, 1, 1], [], []>} : vector<64x64xbf16>, vector<64x64xbf16>, vector<64x64xf32> -> vector<64x64xf32>
    %35 = arith.addf %31, %34 : vector<64x64xf32>
    %36 = vector.extract_strided_slice %8 {offsets = [448, 0], sizes = [64, 64], strides = [1, 1]} : vector<576x64xbf16> to vector<64x64xbf16>
    %c1600 = arith.constant 1600 : index
    %c0_19 = arith.constant 0 : index
    %37 = vector.load %arg1[%c1600, %c0_19] : memref<4144x128xbf16, #tpu.memory_space<vmem>>, vector<64x64xbf16>
    %cst_20 = arith.constant dense<0.000000e+00> : vector<64x64xf32>
    %38 = tpu.matmul %36, %37, %cst_20 {dimension_numbers = #tpu.dot_dimension_numbers<[1], [0], [0], [1], [0, 0, 1, 1], [], []>} : vector<64x64xbf16>, vector<64x64xbf16>, vector<64x64xf32> -> vector<64x64xf32>
    %39 = arith.addf %35, %38 : vector<64x64xf32>
    %40 = vector.extract_strided_slice %8 {offsets = [512, 0], sizes = [64, 64], strides = [1, 1]} : vector<576x64xbf16> to vector<64x64xbf16>
    %c1664 = arith.constant 1664 : index
    %c0_21 = arith.constant 0 : index
    %41 = vector.load %arg1[%c1664, %c0_21] : memref<4144x128xbf16, #tpu.memory_space<vmem>>, vector<64x64xbf16>
    %cst_22 = arith.constant dense<0.000000e+00> : vector<64x64xf32>
    %42 = tpu.matmul %40, %41, %cst_22 {dimension_numbers = #tpu.dot_dimension_numbers<[1], [0], [0], [1], [0, 0, 1, 1], [], []>} : vector<64x64xbf16>, vector<64x64xbf16>, vector<64x64xf32> -> vector<64x64xf32>
    %43 = arith.addf %39, %42 : vector<64x64xf32>
    %c0_23 = arith.constant 0 : index
    %c0_24 = arith.constant 0 : index
    %44 = vector.load %arg2[%c0_23, %c0_24] : memref<8x128xf32, #tpu.memory_space<vmem>>, vector<1x64xf32>
    %45 = vector.broadcast %44 : vector<1x64xf32> to vector<64x64xf32>
    %46 = arith.addf %43, %45 : vector<64x64xf32>
    %cst_25 = arith.constant 0.000000e+00 : f32
    %47 = vector.broadcast %cst_25 : f32 to vector<64x64xf32>
    %48 = arith.cmpf oge, %46, %47 : vector<64x64xf32>
    %cst_26 = arith.constant 2.000000e-01 : f32
    %49 = vector.broadcast %cst_26 : f32 to vector<64x64xf32>
    %50 = arith.mulf %49, %46 : vector<64x64xf32>
    %51 = arith.select %48, %46, %50 : vector<64x64xi1>, vector<64x64xf32>
    %52 = arith.truncf %51 : vector<64x64xf32> to vector<64x64xbf16>
    %c1728 = arith.constant 1728 : index
    %c0_27 = arith.constant 0 : index
    %53 = vector.load %arg1[%c1728, %c0_27] : memref<4144x128xbf16, #tpu.memory_space<vmem>>, vector<144x64xbf16>
    %cst_28 = arith.constant dense<0.000000e+00> : vector<144x64xf32>
    %54 = tpu.matmul %53, %52, %cst_28 {dimension_numbers = #tpu.dot_dimension_numbers<[1], [0], [0], [1], [0, 0, 1, 1], [], []>} : vector<144x64xbf16>, vector<64x64xbf16>, vector<144x64xf32> -> vector<144x64xf32>
    %55 = arith.truncf %54 : vector<144x64xf32> to vector<144x64xbf16>
    %56 = vector.extract_strided_slice %55 {offsets = [0, 0], sizes = [16, 64], strides = [1, 1]} : vector<144x64xbf16> to vector<16x64xbf16>
    %c1872 = arith.constant 1872 : index
    %c0_29 = arith.constant 0 : index
    %57 = vector.load %arg1[%c1872, %c0_29] : memref<4144x128xbf16, #tpu.memory_space<vmem>>, vector<64x64xbf16>
    %cst_30 = arith.constant dense<0.000000e+00> : vector<16x64xf32>
    %58 = tpu.matmul %56, %57, %cst_30 {dimension_numbers = #tpu.dot_dimension_numbers<[1], [0], [0], [1], [0, 0, 1, 1], [], []>} : vector<16x64xbf16>, vector<64x64xbf16>, vector<16x64xf32> -> vector<16x64xf32>
    %59 = vector.extract_strided_slice %55 {offsets = [16, 0], sizes = [16, 64], strides = [1, 1]} : vector<144x64xbf16> to vector<16x64xbf16>
    %c1936 = arith.constant 1936 : index
    %c0_31 = arith.constant 0 : index
    %60 = vector.load %arg1[%c1936, %c0_31] : memref<4144x128xbf16, #tpu.memory_space<vmem>>, vector<64x64xbf16>
    %cst_32 = arith.constant dense<0.000000e+00> : vector<16x64xf32>
    %61 = tpu.matmul %59, %60, %cst_32 {dimension_numbers = #tpu.dot_dimension_numbers<[1], [0], [0], [1], [0, 0, 1, 1], [], []>} : vector<16x64xbf16>, vector<64x64xbf16>, vector<16x64xf32> -> vector<16x64xf32>
    %62 = arith.addf %58, %61 : vector<16x64xf32>
    %63 = vector.extract_strided_slice %55 {offsets = [32, 0], sizes = [16, 64], strides = [1, 1]} : vector<144x64xbf16> to vector<16x64xbf16>
    %c2000 = arith.constant 2000 : index
    %c0_33 = arith.constant 0 : index
    %64 = vector.load %arg1[%c2000, %c0_33] : memref<4144x128xbf16, #tpu.memory_space<vmem>>, vector<64x64xbf16>
    %cst_34 = arith.constant dense<0.000000e+00> : vector<16x64xf32>
    %65 = tpu.matmul %63, %64, %cst_34 {dimension_numbers = #tpu.dot_dimension_numbers<[1], [0], [0], [1], [0, 0, 1, 1], [], []>} : vector<16x64xbf16>, vector<64x64xbf16>, vector<16x64xf32> -> vector<16x64xf32>
    %66 = arith.addf %62, %65 : vector<16x64xf32>
    %67 = vector.extract_strided_slice %55 {offsets = [48, 0], sizes = [16, 64], strides = [1, 1]} : vector<144x64xbf16> to vector<16x64xbf16>
    %c2064 = arith.constant 2064 : index
    %c0_35 = arith.constant 0 : index
    %68 = vector.load %arg1[%c2064, %c0_35] : memref<4144x128xbf16, #tpu.memory_space<vmem>>, vector<64x64xbf16>
    %cst_36 = arith.constant dense<0.000000e+00> : vector<16x64xf32>
    %69 = tpu.matmul %67, %68, %cst_36 {dimension_numbers = #tpu.dot_dimension_numbers<[1], [0], [0], [1], [0, 0, 1, 1], [], []>} : vector<16x64xbf16>, vector<64x64xbf16>, vector<16x64xf32> -> vector<16x64xf32>
    %70 = arith.addf %66, %69 : vector<16x64xf32>
    %71 = vector.extract_strided_slice %55 {offsets = [64, 0], sizes = [16, 64], strides = [1, 1]} : vector<144x64xbf16> to vector<16x64xbf16>
    %c2128 = arith.constant 2128 : index
    %c0_37 = arith.constant 0 : index
    %72 = vector.load %arg1[%c2128, %c0_37] : memref<4144x128xbf16, #tpu.memory_space<vmem>>, vector<64x64xbf16>
    %cst_38 = arith.constant dense<0.000000e+00> : vector<16x64xf32>
    %73 = tpu.matmul %71, %72, %cst_38 {dimension_numbers = #tpu.dot_dimension_numbers<[1], [0], [0], [1], [0, 0, 1, 1], [], []>} : vector<16x64xbf16>, vector<64x64xbf16>, vector<16x64xf32> -> vector<16x64xf32>
    %74 = arith.addf %70, %73 : vector<16x64xf32>
    %75 = vector.extract_strided_slice %55 {offsets = [80, 0], sizes = [16, 64], strides = [1, 1]} : vector<144x64xbf16> to vector<16x64xbf16>
    %c2192 = arith.constant 2192 : index
    %c0_39 = arith.constant 0 : index
    %76 = vector.load %arg1[%c2192, %c0_39] : memref<4144x128xbf16, #tpu.memory_space<vmem>>, vector<64x64xbf16>
    %cst_40 = arith.constant dense<0.000000e+00> : vector<16x64xf32>
    %77 = tpu.matmul %75, %76, %cst_40 {dimension_numbers = #tpu.dot_dimension_numbers<[1], [0], [0], [1], [0, 0, 1, 1], [], []>} : vector<16x64xbf16>, vector<64x64xbf16>, vector<16x64xf32> -> vector<16x64xf32>
    %78 = arith.addf %74, %77 : vector<16x64xf32>
    %79 = vector.extract_strided_slice %55 {offsets = [96, 0], sizes = [16, 64], strides = [1, 1]} : vector<144x64xbf16> to vector<16x64xbf16>
    %c2256 = arith.constant 2256 : index
    %c0_41 = arith.constant 0 : index
    %80 = vector.load %arg1[%c2256, %c0_41] : memref<4144x128xbf16, #tpu.memory_space<vmem>>, vector<64x64xbf16>
    %cst_42 = arith.constant dense<0.000000e+00> : vector<16x64xf32>
    %81 = tpu.matmul %79, %80, %cst_42 {dimension_numbers = #tpu.dot_dimension_numbers<[1], [0], [0], [1], [0, 0, 1, 1], [], []>} : vector<16x64xbf16>, vector<64x64xbf16>, vector<16x64xf32> -> vector<16x64xf32>
    %82 = arith.addf %78, %81 : vector<16x64xf32>
    %83 = vector.extract_strided_slice %55 {offsets = [112, 0], sizes = [16, 64], strides = [1, 1]} : vector<144x64xbf16> to vector<16x64xbf16>
    %c2320 = arith.constant 2320 : index
    %c0_43 = arith.constant 0 : index
    %84 = vector.load %arg1[%c2320, %c0_43] : memref<4144x128xbf16, #tpu.memory_space<vmem>>, vector<64x64xbf16>
    %cst_44 = arith.constant dense<0.000000e+00> : vector<16x64xf32>
    %85 = tpu.matmul %83, %84, %cst_44 {dimension_numbers = #tpu.dot_dimension_numbers<[1], [0], [0], [1], [0, 0, 1, 1], [], []>} : vector<16x64xbf16>, vector<64x64xbf16>, vector<16x64xf32> -> vector<16x64xf32>
    %86 = arith.addf %82, %85 : vector<16x64xf32>
    %87 = vector.extract_strided_slice %55 {offsets = [128, 0], sizes = [16, 64], strides = [1, 1]} : vector<144x64xbf16> to vector<16x64xbf16>
    %c2384 = arith.constant 2384 : index
    %c0_45 = arith.constant 0 : index
    %88 = vector.load %arg1[%c2384, %c0_45] : memref<4144x128xbf16, #tpu.memory_space<vmem>>, vector<64x64xbf16>
    %cst_46 = arith.constant dense<0.000000e+00> : vector<16x64xf32>
    %89 = tpu.matmul %87, %88, %cst_46 {dimension_numbers = #tpu.dot_dimension_numbers<[1], [0], [0], [1], [0, 0, 1, 1], [], []>} : vector<16x64xbf16>, vector<64x64xbf16>, vector<16x64xf32> -> vector<16x64xf32>
    %90 = arith.addf %86, %89 : vector<16x64xf32>
    %c2448 = arith.constant 2448 : index
    %c0_47 = arith.constant 0 : index
    %91 = vector.load %arg1[%c2448, %c0_47] : memref<4144x128xbf16, #tpu.memory_space<vmem>>, vector<64x64xbf16>
    %92 = arith.extf %91 : vector<64x64xbf16> to vector<64x64xf32>
    %c1 = arith.constant 1 : index
    %c0_48 = arith.constant 0 : index
    %93 = vector.load %arg2[%c1, %c0_48] : memref<8x128xf32, #tpu.memory_space<vmem>>, vector<1x64xf32>
    %c2 = arith.constant 2 : index
    %c0_49 = arith.constant 0 : index
    %94 = vector.load %arg2[%c2, %c0_49] : memref<8x128xf32, #tpu.memory_space<vmem>>, vector<1x64xf32>
    %cst_50 = arith.constant dense<0.000000e+00> : vector<64xf32>
    %95 = vector.multi_reduction <add>, %90, %cst_50 [0] : vector<16x64xf32> to vector<64xf32>
    %96 = vector.shape_cast %95 : vector<64xf32> to vector<1x64xf32>
    %cst_51 = arith.constant dense<0.000000e+00> : vector<1x64xf32>
    %97 = tpu.matmul %96, %92, %cst_51 {dimension_numbers = #tpu.dot_dimension_numbers<[1], [0], [0], [1], [0, 0, 1, 1], [], []>} : vector<1x64xf32>, vector<64x64xf32>, vector<1x64xf32> -> vector<1x64xf32>
    %cst_52 = arith.constant 1.562500e-02 : f32
    %98 = vector.broadcast %cst_52 : f32 to vector<1x64xf32>
    %99 = arith.mulf %97, %98 : vector<1x64xf32>
    %100 = vector.broadcast %99 : vector<1x64xf32> to vector<16x64xf32>
    %101 = arith.subf %90, %100 : vector<16x64xf32>
    %102 = arith.mulf %101, %101 : vector<16x64xf32>
    %cst_53 = arith.constant dense<0.000000e+00> : vector<64xf32>
    %103 = vector.multi_reduction <add>, %102, %cst_53 [0] : vector<16x64xf32> to vector<64xf32>
    %104 = vector.shape_cast %103 : vector<64xf32> to vector<1x64xf32>
    %cst_54 = arith.constant dense<0.000000e+00> : vector<1x64xf32>
    %105 = tpu.matmul %104, %92, %cst_54 {dimension_numbers = #tpu.dot_dimension_numbers<[1], [0], [0], [1], [0, 0, 1, 1], [], []>} : vector<1x64xf32>, vector<64x64xf32>, vector<1x64xf32> -> vector<1x64xf32>
    %cst_55 = arith.constant 1.562500e-02 : f32
    %106 = vector.broadcast %cst_55 : f32 to vector<1x64xf32>
    %107 = arith.mulf %105, %106 : vector<1x64xf32>
    %cst_56 = arith.constant 9.99999974E-6 : f32
    %108 = vector.broadcast %cst_56 : f32 to vector<1x64xf32>
    %109 = arith.addf %107, %108 : vector<1x64xf32>
    %110 = math.rsqrt %109 : vector<1x64xf32>
    %111 = vector.broadcast %110 : vector<1x64xf32> to vector<16x64xf32>
    %112 = arith.mulf %101, %111 : vector<16x64xf32>
    %113 = vector.broadcast %93 : vector<1x64xf32> to vector<16x64xf32>
    %114 = arith.mulf %112, %113 : vector<16x64xf32>
    %115 = vector.broadcast %94 : vector<1x64xf32> to vector<16x64xf32>
    %116 = arith.addf %114, %115 : vector<16x64xf32>
    %cst_57 = arith.constant 0.000000e+00 : f32
    %117 = vector.broadcast %cst_57 : f32 to vector<16x64xf32>
    %118 = arith.cmpf oge, %116, %117 : vector<16x64xf32>
    %cst_58 = arith.constant 2.000000e-01 : f32
    %119 = vector.broadcast %cst_58 : f32 to vector<16x64xf32>
    %120 = arith.mulf %119, %116 : vector<16x64xf32>
    %121 = arith.select %118, %116, %120 : vector<16x64xi1>, vector<16x64xf32>
    %122 = arith.truncf %121 : vector<16x64xf32> to vector<16x64xbf16>
    %c2512 = arith.constant 2512 : index
    %c0_59 = arith.constant 0 : index
    %123 = vector.load %arg1[%c2512, %c0_59] : memref<4144x128xbf16, #tpu.memory_space<vmem>>, vector<72x16xbf16>
    %cst_60 = arith.constant dense<0.000000e+00> : vector<72x64xf32>
    %124 = tpu.matmul %123, %122, %cst_60 {dimension_numbers = #tpu.dot_dimension_numbers<[1], [0], [0], [1], [0, 0, 1, 1], [], []>} : vector<72x16xbf16>, vector<16x64xbf16>, vector<72x64xf32> -> vector<72x64xf32>
    %125 = arith.truncf %124 : vector<72x64xf32> to vector<72x64xbf16>
    %126 = vector.extract_strided_slice %125 {offsets = [0, 0], sizes = [8, 64], strides = [1, 1]} : vector<72x64xbf16> to vector<8x64xbf16>
    %c2584 = arith.constant 2584 : index
    %c0_61 = arith.constant 0 : index
    %127 = vector.load %arg1[%c2584, %c0_61] : memref<4144x128xbf16, #tpu.memory_space<vmem>>, vector<64x64xbf16>
    %cst_62 = arith.constant dense<0.000000e+00> : vector<8x64xf32>
    %128 = tpu.matmul %126, %127, %cst_62 {dimension_numbers = #tpu.dot_dimension_numbers<[1], [0], [0], [1], [0, 0, 1, 1], [], []>} : vector<8x64xbf16>, vector<64x64xbf16>, vector<8x64xf32> -> vector<8x64xf32>
    %129 = vector.extract_strided_slice %125 {offsets = [8, 0], sizes = [8, 64], strides = [1, 1]} : vector<72x64xbf16> to vector<8x64xbf16>
    %c2648 = arith.constant 2648 : index
    %c0_63 = arith.constant 0 : index
    %130 = vector.load %arg1[%c2648, %c0_63] : memref<4144x128xbf16, #tpu.memory_space<vmem>>, vector<64x64xbf16>
    %cst_64 = arith.constant dense<0.000000e+00> : vector<8x64xf32>
    %131 = tpu.matmul %129, %130, %cst_64 {dimension_numbers = #tpu.dot_dimension_numbers<[1], [0], [0], [1], [0, 0, 1, 1], [], []>} : vector<8x64xbf16>, vector<64x64xbf16>, vector<8x64xf32> -> vector<8x64xf32>
    %132 = arith.addf %128, %131 : vector<8x64xf32>
    %133 = vector.extract_strided_slice %125 {offsets = [16, 0], sizes = [8, 64], strides = [1, 1]} : vector<72x64xbf16> to vector<8x64xbf16>
    %c2712 = arith.constant 2712 : index
    %c0_65 = arith.constant 0 : index
    %134 = vector.load %arg1[%c2712, %c0_65] : memref<4144x128xbf16, #tpu.memory_space<vmem>>, vector<64x64xbf16>
    %cst_66 = arith.constant dense<0.000000e+00> : vector<8x64xf32>
    %135 = tpu.matmul %133, %134, %cst_66 {dimension_numbers = #tpu.dot_dimension_numbers<[1], [0], [0], [1], [0, 0, 1, 1], [], []>} : vector<8x64xbf16>, vector<64x64xbf16>, vector<8x64xf32> -> vector<8x64xf32>
    %136 = arith.addf %132, %135 : vector<8x64xf32>
    %137 = vector.extract_strided_slice %125 {offsets = [24, 0], sizes = [8, 64], strides = [1, 1]} : vector<72x64xbf16> to vector<8x64xbf16>
    %c2776 = arith.constant 2776 : index
    %c0_67 = arith.constant 0 : index
    %138 = vector.load %arg1[%c2776, %c0_67] : memref<4144x128xbf16, #tpu.memory_space<vmem>>, vector<64x64xbf16>
    %cst_68 = arith.constant dense<0.000000e+00> : vector<8x64xf32>
    %139 = tpu.matmul %137, %138, %cst_68 {dimension_numbers = #tpu.dot_dimension_numbers<[1], [0], [0], [1], [0, 0, 1, 1], [], []>} : vector<8x64xbf16>, vector<64x64xbf16>, vector<8x64xf32> -> vector<8x64xf32>
    %140 = arith.addf %136, %139 : vector<8x64xf32>
    %141 = vector.extract_strided_slice %125 {offsets = [32, 0], sizes = [8, 64], strides = [1, 1]} : vector<72x64xbf16> to vector<8x64xbf16>
    %c2840 = arith.constant 2840 : index
    %c0_69 = arith.constant 0 : index
    %142 = vector.load %arg1[%c2840, %c0_69] : memref<4144x128xbf16, #tpu.memory_space<vmem>>, vector<64x64xbf16>
    %cst_70 = arith.constant dense<0.000000e+00> : vector<8x64xf32>
    %143 = tpu.matmul %141, %142, %cst_70 {dimension_numbers = #tpu.dot_dimension_numbers<[1], [0], [0], [1], [0, 0, 1, 1], [], []>} : vector<8x64xbf16>, vector<64x64xbf16>, vector<8x64xf32> -> vector<8x64xf32>
    %144 = arith.addf %140, %143 : vector<8x64xf32>
    %145 = vector.extract_strided_slice %125 {offsets = [40, 0], sizes = [8, 64], strides = [1, 1]} : vector<72x64xbf16> to vector<8x64xbf16>
    %c2904 = arith.constant 2904 : index
    %c0_71 = arith.constant 0 : index
    %146 = vector.load %arg1[%c2904, %c0_71] : memref<4144x128xbf16, #tpu.memory_space<vmem>>, vector<64x64xbf16>
    %cst_72 = arith.constant dense<0.000000e+00> : vector<8x64xf32>
    %147 = tpu.matmul %145, %146, %cst_72 {dimension_numbers = #tpu.dot_dimension_numbers<[1], [0], [0], [1], [0, 0, 1, 1], [], []>} : vector<8x64xbf16>, vector<64x64xbf16>, vector<8x64xf32> -> vector<8x64xf32>
    %148 = arith.addf %144, %147 : vector<8x64xf32>
    %149 = vector.extract_strided_slice %125 {offsets = [48, 0], sizes = [8, 64], strides = [1, 1]} : vector<72x64xbf16> to vector<8x64xbf16>
    %c2968 = arith.constant 2968 : index
    %c0_73 = arith.constant 0 : index
    %150 = vector.load %arg1[%c2968, %c0_73] : memref<4144x128xbf16, #tpu.memory_space<vmem>>, vector<64x64xbf16>
    %cst_74 = arith.constant dense<0.000000e+00> : vector<8x64xf32>
    %151 = tpu.matmul %149, %150, %cst_74 {dimension_numbers = #tpu.dot_dimension_numbers<[1], [0], [0], [1], [0, 0, 1, 1], [], []>} : vector<8x64xbf16>, vector<64x64xbf16>, vector<8x64xf32> -> vector<8x64xf32>
    %152 = arith.addf %148, %151 : vector<8x64xf32>
    %153 = vector.extract_strided_slice %125 {offsets = [56, 0], sizes = [8, 64], strides = [1, 1]} : vector<72x64xbf16> to vector<8x64xbf16>
    %c3032 = arith.constant 3032 : index
    %c0_75 = arith.constant 0 : index
    %154 = vector.load %arg1[%c3032, %c0_75] : memref<4144x128xbf16, #tpu.memory_space<vmem>>, vector<64x64xbf16>
    %cst_76 = arith.constant dense<0.000000e+00> : vector<8x64xf32>
    %155 = tpu.matmul %153, %154, %cst_76 {dimension_numbers = #tpu.dot_dimension_numbers<[1], [0], [0], [1], [0, 0, 1, 1], [], []>} : vector<8x64xbf16>, vector<64x64xbf16>, vector<8x64xf32> -> vector<8x64xf32>
    %156 = arith.addf %152, %155 : vector<8x64xf32>
    %157 = vector.extract_strided_slice %125 {offsets = [64, 0], sizes = [8, 64], strides = [1, 1]} : vector<72x64xbf16> to vector<8x64xbf16>
    %c3096 = arith.constant 3096 : index
    %c0_77 = arith.constant 0 : index
    %158 = vector.load %arg1[%c3096, %c0_77] : memref<4144x128xbf16, #tpu.memory_space<vmem>>, vector<64x64xbf16>
    %cst_78 = arith.constant dense<0.000000e+00> : vector<8x64xf32>
    %159 = tpu.matmul %157, %158, %cst_78 {dimension_numbers = #tpu.dot_dimension_numbers<[1], [0], [0], [1], [0, 0, 1, 1], [], []>} : vector<8x64xbf16>, vector<64x64xbf16>, vector<8x64xf32> -> vector<8x64xf32>
    %160 = arith.addf %156, %159 : vector<8x64xf32>
    %c3160 = arith.constant 3160 : index
    %c0_79 = arith.constant 0 : index
    %161 = vector.load %arg1[%c3160, %c0_79] : memref<4144x128xbf16, #tpu.memory_space<vmem>>, vector<64x64xbf16>
    %162 = arith.extf %161 : vector<64x64xbf16> to vector<64x64xf32>
    %c3 = arith.constant 3 : index
    %c0_80 = arith.constant 0 : index
    %163 = vector.load %arg2[%c3, %c0_80] : memref<8x128xf32, #tpu.memory_space<vmem>>, vector<1x64xf32>
    %c4 = arith.constant 4 : index
    %c0_81 = arith.constant 0 : index
    %164 = vector.load %arg2[%c4, %c0_81] : memref<8x128xf32, #tpu.memory_space<vmem>>, vector<1x64xf32>
    %cst_82 = arith.constant dense<0.000000e+00> : vector<64xf32>
    %165 = vector.multi_reduction <add>, %160, %cst_82 [0] : vector<8x64xf32> to vector<64xf32>
    %166 = vector.shape_cast %165 : vector<64xf32> to vector<1x64xf32>
    %cst_83 = arith.constant dense<0.000000e+00> : vector<1x64xf32>
    %167 = tpu.matmul %166, %162, %cst_83 {dimension_numbers = #tpu.dot_dimension_numbers<[1], [0], [0], [1], [0, 0, 1, 1], [], []>} : vector<1x64xf32>, vector<64x64xf32>, vector<1x64xf32> -> vector<1x64xf32>
    %cst_84 = arith.constant 6.250000e-02 : f32
    %168 = vector.broadcast %cst_84 : f32 to vector<1x64xf32>
    %169 = arith.mulf %167, %168 : vector<1x64xf32>
    %170 = vector.broadcast %169 : vector<1x64xf32> to vector<8x64xf32>
    %171 = arith.subf %160, %170 : vector<8x64xf32>
    %172 = arith.mulf %171, %171 : vector<8x64xf32>
    %cst_85 = arith.constant dense<0.000000e+00> : vector<64xf32>
    %173 = vector.multi_reduction <add>, %172, %cst_85 [0] : vector<8x64xf32> to vector<64xf32>
    %174 = vector.shape_cast %173 : vector<64xf32> to vector<1x64xf32>
    %cst_86 = arith.constant dense<0.000000e+00> : vector<1x64xf32>
    %175 = tpu.matmul %174, %162, %cst_86 {dimension_numbers = #tpu.dot_dimension_numbers<[1], [0], [0], [1], [0, 0, 1, 1], [], []>} : vector<1x64xf32>, vector<64x64xf32>, vector<1x64xf32> -> vector<1x64xf32>
    %cst_87 = arith.constant 6.250000e-02 : f32
    %176 = vector.broadcast %cst_87 : f32 to vector<1x64xf32>
    %177 = arith.mulf %175, %176 : vector<1x64xf32>
    %cst_88 = arith.constant 9.99999974E-6 : f32
    %178 = vector.broadcast %cst_88 : f32 to vector<1x64xf32>
    %179 = arith.addf %177, %178 : vector<1x64xf32>
    %180 = math.rsqrt %179 : vector<1x64xf32>
    %181 = vector.broadcast %180 : vector<1x64xf32> to vector<8x64xf32>
    %182 = arith.mulf %171, %181 : vector<8x64xf32>
    %183 = vector.broadcast %163 : vector<1x64xf32> to vector<8x64xf32>
    %184 = arith.mulf %182, %183 : vector<8x64xf32>
    %185 = vector.broadcast %164 : vector<1x64xf32> to vector<8x64xf32>
    %186 = arith.addf %184, %185 : vector<8x64xf32>
    %cst_89 = arith.constant 0.000000e+00 : f32
    %187 = vector.broadcast %cst_89 : f32 to vector<8x64xf32>
    %188 = arith.cmpf oge, %186, %187 : vector<8x64xf32>
    %cst_90 = arith.constant 2.000000e-01 : f32
    %189 = vector.broadcast %cst_90 : f32 to vector<8x64xf32>
    %190 = arith.mulf %189, %186 : vector<8x64xf32>
    %191 = arith.select %188, %186, %190 : vector<8x64xi1>, vector<8x64xf32>
    %192 = arith.truncf %191 : vector<8x64xf32> to vector<8x64xbf16>
    %c3224 = arith.constant 3224 : index
    %c0_91 = arith.constant 0 : index
    %193 = vector.load %arg1[%c3224, %c0_91] : memref<4144x128xbf16, #tpu.memory_space<vmem>>, vector<72x8xbf16>
    %cst_92 = arith.constant dense<0.000000e+00> : vector<72x64xf32>
    %194 = tpu.matmul %193, %192, %cst_92 {dimension_numbers = #tpu.dot_dimension_numbers<[1], [0], [0], [1], [0, 0, 1, 1], [], []>} : vector<72x8xbf16>, vector<8x64xbf16>, vector<72x64xf32> -> vector<72x64xf32>
    %195 = arith.truncf %194 : vector<72x64xf32> to vector<72x64xbf16>
    %196 = vector.extract_strided_slice %195 {offsets = [0, 0], sizes = [8, 64], strides = [1, 1]} : vector<72x64xbf16> to vector<8x64xbf16>
    %c3296 = arith.constant 3296 : index
    %c0_93 = arith.constant 0 : index
    %197 = vector.load %arg1[%c3296, %c0_93] : memref<4144x128xbf16, #tpu.memory_space<vmem>>, vector<64x128xbf16>
    %cst_94 = arith.constant dense<0.000000e+00> : vector<8x128xf32>
    %198 = tpu.matmul %196, %197, %cst_94 {dimension_numbers = #tpu.dot_dimension_numbers<[1], [0], [0], [1], [0, 0, 1, 1], [], []>} : vector<8x64xbf16>, vector<64x128xbf16>, vector<8x128xf32> -> vector<8x128xf32>
    %199 = vector.extract_strided_slice %195 {offsets = [8, 0], sizes = [8, 64], strides = [1, 1]} : vector<72x64xbf16> to vector<8x64xbf16>
    %c3360 = arith.constant 3360 : index
    %c0_95 = arith.constant 0 : index
    %200 = vector.load %arg1[%c3360, %c0_95] : memref<4144x128xbf16, #tpu.memory_space<vmem>>, vector<64x128xbf16>
    %cst_96 = arith.constant dense<0.000000e+00> : vector<8x128xf32>
    %201 = tpu.matmul %199, %200, %cst_96 {dimension_numbers = #tpu.dot_dimension_numbers<[1], [0], [0], [1], [0, 0, 1, 1], [], []>} : vector<8x64xbf16>, vector<64x128xbf16>, vector<8x128xf32> -> vector<8x128xf32>
    %202 = arith.addf %198, %201 : vector<8x128xf32>
    %203 = vector.extract_strided_slice %195 {offsets = [16, 0], sizes = [8, 64], strides = [1, 1]} : vector<72x64xbf16> to vector<8x64xbf16>
    %c3424 = arith.constant 3424 : index
    %c0_97 = arith.constant 0 : index
    %204 = vector.load %arg1[%c3424, %c0_97] : memref<4144x128xbf16, #tpu.memory_space<vmem>>, vector<64x128xbf16>
    %cst_98 = arith.constant dense<0.000000e+00> : vector<8x128xf32>
    %205 = tpu.matmul %203, %204, %cst_98 {dimension_numbers = #tpu.dot_dimension_numbers<[1], [0], [0], [1], [0, 0, 1, 1], [], []>} : vector<8x64xbf16>, vector<64x128xbf16>, vector<8x128xf32> -> vector<8x128xf32>
    %206 = arith.addf %202, %205 : vector<8x128xf32>
    %207 = vector.extract_strided_slice %195 {offsets = [24, 0], sizes = [8, 64], strides = [1, 1]} : vector<72x64xbf16> to vector<8x64xbf16>
    %c3488 = arith.constant 3488 : index
    %c0_99 = arith.constant 0 : index
    %208 = vector.load %arg1[%c3488, %c0_99] : memref<4144x128xbf16, #tpu.memory_space<vmem>>, vector<64x128xbf16>
    %cst_100 = arith.constant dense<0.000000e+00> : vector<8x128xf32>
    %209 = tpu.matmul %207, %208, %cst_100 {dimension_numbers = #tpu.dot_dimension_numbers<[1], [0], [0], [1], [0, 0, 1, 1], [], []>} : vector<8x64xbf16>, vector<64x128xbf16>, vector<8x128xf32> -> vector<8x128xf32>
    %210 = arith.addf %206, %209 : vector<8x128xf32>
    %211 = vector.extract_strided_slice %195 {offsets = [32, 0], sizes = [8, 64], strides = [1, 1]} : vector<72x64xbf16> to vector<8x64xbf16>
    %c3552 = arith.constant 3552 : index
    %c0_101 = arith.constant 0 : index
    %212 = vector.load %arg1[%c3552, %c0_101] : memref<4144x128xbf16, #tpu.memory_space<vmem>>, vector<64x128xbf16>
    %cst_102 = arith.constant dense<0.000000e+00> : vector<8x128xf32>
    %213 = tpu.matmul %211, %212, %cst_102 {dimension_numbers = #tpu.dot_dimension_numbers<[1], [0], [0], [1], [0, 0, 1, 1], [], []>} : vector<8x64xbf16>, vector<64x128xbf16>, vector<8x128xf32> -> vector<8x128xf32>
    %214 = arith.addf %210, %213 : vector<8x128xf32>
    %215 = vector.extract_strided_slice %195 {offsets = [40, 0], sizes = [8, 64], strides = [1, 1]} : vector<72x64xbf16> to vector<8x64xbf16>
    %c3616 = arith.constant 3616 : index
    %c0_103 = arith.constant 0 : index
    %216 = vector.load %arg1[%c3616, %c0_103] : memref<4144x128xbf16, #tpu.memory_space<vmem>>, vector<64x128xbf16>
    %cst_104 = arith.constant dense<0.000000e+00> : vector<8x128xf32>
    %217 = tpu.matmul %215, %216, %cst_104 {dimension_numbers = #tpu.dot_dimension_numbers<[1], [0], [0], [1], [0, 0, 1, 1], [], []>} : vector<8x64xbf16>, vector<64x128xbf16>, vector<8x128xf32> -> vector<8x128xf32>
    %218 = arith.addf %214, %217 : vector<8x128xf32>
    %219 = vector.extract_strided_slice %195 {offsets = [48, 0], sizes = [8, 64], strides = [1, 1]} : vector<72x64xbf16> to vector<8x64xbf16>
    %c3680 = arith.constant 3680 : index
    %c0_105 = arith.constant 0 : index
    %220 = vector.load %arg1[%c3680, %c0_105] : memref<4144x128xbf16, #tpu.memory_space<vmem>>, vector<64x128xbf16>
    %cst_106 = arith.constant dense<0.000000e+00> : vector<8x128xf32>
    %221 = tpu.matmul %219, %220, %cst_106 {dimension_numbers = #tpu.dot_dimension_numbers<[1], [0], [0], [1], [0, 0, 1, 1], [], []>} : vector<8x64xbf16>, vector<64x128xbf16>, vector<8x128xf32> -> vector<8x128xf32>
    %222 = arith.addf %218, %221 : vector<8x128xf32>
    %223 = vector.extract_strided_slice %195 {offsets = [56, 0], sizes = [8, 64], strides = [1, 1]} : vector<72x64xbf16> to vector<8x64xbf16>
    %c3744 = arith.constant 3744 : index
    %c0_107 = arith.constant 0 : index
    %224 = vector.load %arg1[%c3744, %c0_107] : memref<4144x128xbf16, #tpu.memory_space<vmem>>, vector<64x128xbf16>
    %cst_108 = arith.constant dense<0.000000e+00> : vector<8x128xf32>
    %225 = tpu.matmul %223, %224, %cst_108 {dimension_numbers = #tpu.dot_dimension_numbers<[1], [0], [0], [1], [0, 0, 1, 1], [], []>} : vector<8x64xbf16>, vector<64x128xbf16>, vector<8x128xf32> -> vector<8x128xf32>
    %226 = arith.addf %222, %225 : vector<8x128xf32>
    %227 = vector.extract_strided_slice %195 {offsets = [64, 0], sizes = [8, 64], strides = [1, 1]} : vector<72x64xbf16> to vector<8x64xbf16>
    %c3808 = arith.constant 3808 : index
    %c0_109 = arith.constant 0 : index
    %228 = vector.load %arg1[%c3808, %c0_109] : memref<4144x128xbf16, #tpu.memory_space<vmem>>, vector<64x128xbf16>
    %cst_110 = arith.constant dense<0.000000e+00> : vector<8x128xf32>
    %229 = tpu.matmul %227, %228, %cst_110 {dimension_numbers = #tpu.dot_dimension_numbers<[1], [0], [0], [1], [0, 0, 1, 1], [], []>} : vector<8x64xbf16>, vector<64x128xbf16>, vector<8x128xf32> -> vector<8x128xf32>
    %230 = arith.addf %226, %229 : vector<8x128xf32>
    %c3872 = arith.constant 3872 : index
    %c0_111 = arith.constant 0 : index
    %231 = vector.load %arg1[%c3872, %c0_111] : memref<4144x128xbf16, #tpu.memory_space<vmem>>, vector<128x128xbf16>
    %232 = arith.extf %231 : vector<128x128xbf16> to vector<128x128xf32>
    %c5 = arith.constant 5 : index
    %c0_112 = arith.constant 0 : index
    %233 = vector.load %arg2[%c5, %c0_112] : memref<8x128xf32, #tpu.memory_space<vmem>>, vector<1x128xf32>
    %c6 = arith.constant 6 : index
    %c0_113 = arith.constant 0 : index
    %234 = vector.load %arg2[%c6, %c0_113] : memref<8x128xf32, #tpu.memory_space<vmem>>, vector<1x128xf32>
    %cst_114 = arith.constant dense<0.000000e+00> : vector<128xf32>
    %235 = vector.multi_reduction <add>, %230, %cst_114 [0] : vector<8x128xf32> to vector<128xf32>
    %236 = vector.shape_cast %235 : vector<128xf32> to vector<1x128xf32>
    %cst_115 = arith.constant dense<0.000000e+00> : vector<1x128xf32>
    %237 = tpu.matmul %236, %232, %cst_115 {dimension_numbers = #tpu.dot_dimension_numbers<[1], [0], [0], [1], [0, 0, 1, 1], [], []>} : vector<1x128xf32>, vector<128x128xf32>, vector<1x128xf32> -> vector<1x128xf32>
    %cst_116 = arith.constant 6.250000e-02 : f32
    %238 = vector.broadcast %cst_116 : f32 to vector<1x128xf32>
    %239 = arith.mulf %237, %238 : vector<1x128xf32>
    %240 = vector.broadcast %239 : vector<1x128xf32> to vector<8x128xf32>
    %241 = arith.subf %230, %240 : vector<8x128xf32>
    %242 = arith.mulf %241, %241 : vector<8x128xf32>
    %cst_117 = arith.constant dense<0.000000e+00> : vector<128xf32>
    %243 = vector.multi_reduction <add>, %242, %cst_117 [0] : vector<8x128xf32> to vector<128xf32>
    %244 = vector.shape_cast %243 : vector<128xf32> to vector<1x128xf32>
    %cst_118 = arith.constant dense<0.000000e+00> : vector<1x128xf32>
    %245 = tpu.matmul %244, %232, %cst_118 {dimension_numbers = #tpu.dot_dimension_numbers<[1], [0], [0], [1], [0, 0, 1, 1], [], []>} : vector<1x128xf32>, vector<128x128xf32>, vector<1x128xf32> -> vector<1x128xf32>
    %cst_119 = arith.constant 6.250000e-02 : f32
    %246 = vector.broadcast %cst_119 : f32 to vector<1x128xf32>
    %247 = arith.mulf %245, %246 : vector<1x128xf32>
    %cst_120 = arith.constant 9.99999974E-6 : f32
    %248 = vector.broadcast %cst_120 : f32 to vector<1x128xf32>
    %249 = arith.addf %247, %248 : vector<1x128xf32>
    %250 = math.rsqrt %249 : vector<1x128xf32>
    %251 = vector.broadcast %250 : vector<1x128xf32> to vector<8x128xf32>
    %252 = arith.mulf %241, %251 : vector<8x128xf32>
    %253 = vector.broadcast %233 : vector<1x128xf32> to vector<8x128xf32>
    %254 = arith.mulf %252, %253 : vector<8x128xf32>
    %255 = vector.broadcast %234 : vector<1x128xf32> to vector<8x128xf32>
    %256 = arith.addf %254, %255 : vector<8x128xf32>
    %cst_121 = arith.constant 0.000000e+00 : f32
    %257 = vector.broadcast %cst_121 : f32 to vector<8x128xf32>
    %258 = arith.cmpf oge, %256, %257 : vector<8x128xf32>
    %cst_122 = arith.constant 2.000000e-01 : f32
    %259 = vector.broadcast %cst_122 : f32 to vector<8x128xf32>
    %260 = arith.mulf %259, %256 : vector<8x128xf32>
    %261 = arith.select %258, %256, %260 : vector<8x128xi1>, vector<8x128xf32>
    %262 = arith.truncf %261 : vector<8x128xf32> to vector<8x128xbf16>
    %c4000 = arith.constant 4000 : index
    %c0_123 = arith.constant 0 : index
    %263 = vector.load %arg1[%c4000, %c0_123] : memref<4144x128xbf16, #tpu.memory_space<vmem>>, vector<72x8xbf16>
    %cst_124 = arith.constant dense<0.000000e+00> : vector<72x128xf32>
    %264 = tpu.matmul %263, %262, %cst_124 {dimension_numbers = #tpu.dot_dimension_numbers<[1], [0], [0], [1], [0, 0, 1, 1], [], []>} : vector<72x8xbf16>, vector<8x128xbf16>, vector<72x128xf32> -> vector<72x128xf32>
    %265 = arith.truncf %264 : vector<72x128xf32> to vector<72x128xbf16>
    %266 = vector.extract_strided_slice %265 {offsets = [0, 0], sizes = [8, 128], strides = [1, 1]} : vector<72x128xbf16> to vector<8x128xbf16>
    %c4072 = arith.constant 4072 : index
    %c0_125 = arith.constant 0 : index
    %267 = vector.load %arg1[%c4072, %c0_125] : memref<4144x128xbf16, #tpu.memory_space<vmem>>, vector<2x128xbf16>
    %cst_126 = arith.constant dense<0.000000e+00> : vector<8x2xf32>
    %268 = tpu.matmul %266, %267, %cst_126 {dimension_numbers = #tpu.dot_dimension_numbers<[1], [1], [0], [0], [0, 0, 1, 0], [], []>} : vector<8x128xbf16>, vector<2x128xbf16>, vector<8x2xf32> -> vector<8x2xf32>
    %269 = vector.extract_strided_slice %265 {offsets = [8, 0], sizes = [8, 128], strides = [1, 1]} : vector<72x128xbf16> to vector<8x128xbf16>
    %c4080 = arith.constant 4080 : index
    %c0_127 = arith.constant 0 : index
    %270 = vector.load %arg1[%c4080, %c0_127] : memref<4144x128xbf16, #tpu.memory_space<vmem>>, vector<2x128xbf16>
    %cst_128 = arith.constant dense<0.000000e+00> : vector<8x2xf32>
    %271 = tpu.matmul %269, %270, %cst_128 {dimension_numbers = #tpu.dot_dimension_numbers<[1], [1], [0], [0], [0, 0, 1, 0], [], []>} : vector<8x128xbf16>, vector<2x128xbf16>, vector<8x2xf32> -> vector<8x2xf32>
    %272 = arith.addf %268, %271 : vector<8x2xf32>
    %273 = vector.extract_strided_slice %265 {offsets = [16, 0], sizes = [8, 128], strides = [1, 1]} : vector<72x128xbf16> to vector<8x128xbf16>
    %c4088 = arith.constant 4088 : index
    %c0_129 = arith.constant 0 : index
    %274 = vector.load %arg1[%c4088, %c0_129] : memref<4144x128xbf16, #tpu.memory_space<vmem>>, vector<2x128xbf16>
    %cst_130 = arith.constant dense<0.000000e+00> : vector<8x2xf32>
    %275 = tpu.matmul %273, %274, %cst_130 {dimension_numbers = #tpu.dot_dimension_numbers<[1], [1], [0], [0], [0, 0, 1, 0], [], []>} : vector<8x128xbf16>, vector<2x128xbf16>, vector<8x2xf32> -> vector<8x2xf32>
    %276 = arith.addf %272, %275 : vector<8x2xf32>
    %277 = vector.extract_strided_slice %265 {offsets = [24, 0], sizes = [8, 128], strides = [1, 1]} : vector<72x128xbf16> to vector<8x128xbf16>
    %c4096 = arith.constant 4096 : index
    %c0_131 = arith.constant 0 : index
    %278 = vector.load %arg1[%c4096, %c0_131] : memref<4144x128xbf16, #tpu.memory_space<vmem>>, vector<2x128xbf16>
    %cst_132 = arith.constant dense<0.000000e+00> : vector<8x2xf32>
    %279 = tpu.matmul %277, %278, %cst_132 {dimension_numbers = #tpu.dot_dimension_numbers<[1], [1], [0], [0], [0, 0, 1, 0], [], []>} : vector<8x128xbf16>, vector<2x128xbf16>, vector<8x2xf32> -> vector<8x2xf32>
    %280 = arith.addf %276, %279 : vector<8x2xf32>
    %281 = vector.extract_strided_slice %265 {offsets = [32, 0], sizes = [8, 128], strides = [1, 1]} : vector<72x128xbf16> to vector<8x128xbf16>
    %c4104 = arith.constant 4104 : index
    %c0_133 = arith.constant 0 : index
    %282 = vector.load %arg1[%c4104, %c0_133] : memref<4144x128xbf16, #tpu.memory_space<vmem>>, vector<2x128xbf16>
    %cst_134 = arith.constant dense<0.000000e+00> : vector<8x2xf32>
    %283 = tpu.matmul %281, %282, %cst_134 {dimension_numbers = #tpu.dot_dimension_numbers<[1], [1], [0], [0], [0, 0, 1, 0], [], []>} : vector<8x128xbf16>, vector<2x128xbf16>, vector<8x2xf32> -> vector<8x2xf32>
    %284 = arith.addf %280, %283 : vector<8x2xf32>
    %285 = vector.extract_strided_slice %265 {offsets = [40, 0], sizes = [8, 128], strides = [1, 1]} : vector<72x128xbf16> to vector<8x128xbf16>
    %c4112 = arith.constant 4112 : index
    %c0_135 = arith.constant 0 : index
    %286 = vector.load %arg1[%c4112, %c0_135] : memref<4144x128xbf16, #tpu.memory_space<vmem>>, vector<2x128xbf16>
    %cst_136 = arith.constant dense<0.000000e+00> : vector<8x2xf32>
    %287 = tpu.matmul %285, %286, %cst_136 {dimension_numbers = #tpu.dot_dimension_numbers<[1], [1], [0], [0], [0, 0, 1, 0], [], []>} : vector<8x128xbf16>, vector<2x128xbf16>, vector<8x2xf32> -> vector<8x2xf32>
    %288 = arith.addf %284, %287 : vector<8x2xf32>
    %289 = vector.extract_strided_slice %265 {offsets = [48, 0], sizes = [8, 128], strides = [1, 1]} : vector<72x128xbf16> to vector<8x128xbf16>
    %c4120 = arith.constant 4120 : index
    %c0_137 = arith.constant 0 : index
    %290 = vector.load %arg1[%c4120, %c0_137] : memref<4144x128xbf16, #tpu.memory_space<vmem>>, vector<2x128xbf16>
    %cst_138 = arith.constant dense<0.000000e+00> : vector<8x2xf32>
    %291 = tpu.matmul %289, %290, %cst_138 {dimension_numbers = #tpu.dot_dimension_numbers<[1], [1], [0], [0], [0, 0, 1, 0], [], []>} : vector<8x128xbf16>, vector<2x128xbf16>, vector<8x2xf32> -> vector<8x2xf32>
    %292 = arith.addf %288, %291 : vector<8x2xf32>
    %293 = vector.extract_strided_slice %265 {offsets = [56, 0], sizes = [8, 128], strides = [1, 1]} : vector<72x128xbf16> to vector<8x128xbf16>
    %c4128 = arith.constant 4128 : index
    %c0_139 = arith.constant 0 : index
    %294 = vector.load %arg1[%c4128, %c0_139] : memref<4144x128xbf16, #tpu.memory_space<vmem>>, vector<2x128xbf16>
    %cst_140 = arith.constant dense<0.000000e+00> : vector<8x2xf32>
    %295 = tpu.matmul %293, %294, %cst_140 {dimension_numbers = #tpu.dot_dimension_numbers<[1], [1], [0], [0], [0, 0, 1, 0], [], []>} : vector<8x128xbf16>, vector<2x128xbf16>, vector<8x2xf32> -> vector<8x2xf32>
    %296 = arith.addf %292, %295 : vector<8x2xf32>
    %297 = vector.extract_strided_slice %265 {offsets = [64, 0], sizes = [8, 128], strides = [1, 1]} : vector<72x128xbf16> to vector<8x128xbf16>
    %c4136 = arith.constant 4136 : index
    %c0_141 = arith.constant 0 : index
    %298 = vector.load %arg1[%c4136, %c0_141] : memref<4144x128xbf16, #tpu.memory_space<vmem>>, vector<2x128xbf16>
    %cst_142 = arith.constant dense<0.000000e+00> : vector<8x2xf32>
    %299 = tpu.matmul %297, %298, %cst_142 {dimension_numbers = #tpu.dot_dimension_numbers<[1], [1], [0], [0], [0, 0, 1, 0], [], []>} : vector<8x128xbf16>, vector<2x128xbf16>, vector<8x2xf32> -> vector<8x2xf32>
    %300 = arith.addf %296, %299 : vector<8x2xf32>
    %c7 = arith.constant 7 : index
    %c0_143 = arith.constant 0 : index
    %301 = vector.load %arg2[%c7, %c0_143] : memref<8x128xf32, #tpu.memory_space<vmem>>, vector<1x2xf32>
    %302 = vector.broadcast %301 : vector<1x2xf32> to vector<8x2xf32>
    %303 = arith.addf %300, %302 : vector<8x2xf32>
    %c0_144 = arith.constant 0 : index
    %c0_145 = arith.constant 0 : index
    %304 = vector.load %arg3[%c0_144, %c0_145] : memref<8x2xf32, #tpu.memory_space<vmem>>, vector<8x2xf32>
    tpu.vector_store %arg3[%c0_144, %c0_145], %303 {strides = array<i32>} : memref<8x2xf32, #tpu.memory_space<vmem>>, vector<8x2xf32>,
    return
  }
}

</mosaic_0001>

<bundles_post_ra>
// kernel: _forward.1
= control target key start
LH: loop header
LB: loop body
LE: loop exit
PB: predicated region body
PF: predicated region fallthrough
CT: control target
= control target key end

     0   :  { %s10027_s0 = inlined_call_operand.vmem [shape: bf16[256,64], index: 0, kind: input, shape index: {}]   ;;  %s10028_s1 = inlined_call_operand.vmem [shape: bf16[4144,128], index: 1, kind: input, shape index: {}]   ;;  %s10029_s2 = inlined_call_operand.vmem [shape: f32[8,128], index: 2, kind: input, shape index: {}]   ;;  %s10030_s3 = inlined_call_operand.hbm [shape: f32[8,2], index: 3, kind: output, shape index: {}]  }
   0x1   :  { %v8338_v0 = vld [vmem:[%s10027_s0 + $0x40] sm:$0xff]   ;;  %v8339_v1 = vld [vmem:[%s10027_s0 + $0x48] sm:$0xff]   ;;  %v8340_v2 = vld [vmem:[%s10027_s0 + $0x50] sm:$0xff]  }
   0x2   :  { %7035 = vmatprep.subr.bf16.mxu0 %v8338_v0  ;;  %v8341_v3 = vld [vmem:[%s10027_s0 + $0x58] sm:$0xff]   ;;  %v8346_v4 = vld [vmem:[%s10028_s1 + $0x120] sm:$0xff]   ;;  %v8343_v6 = vld [vmem:[%s10027_s0 + $0x68] sm:$0xff]  }
   0x3   :  { %7036 = vmatpush3.bf16.msra.mxu0 %v8338_v0  ;;  %7051 = vmatprep.mubr.bf16.mxu0 %v8346_v4  ;;  %v8342_v5 = vld [vmem:[%s10027_s0 + $0x60] sm:$0xff]   ;;  %v8344_v7 = vld [vmem:[%s10027_s0 + $0x70] sm:$0xff]   ;;  %v8345_v8 = vld [vmem:[%s10027_s0 + $0x78] sm:$0xff]  }
   0x4   :  { %7037 = vmatprep.subr.bf16.mxu0 %v8339_v1  ;;  %v8348_v9 = vld [vmem:[%s10027_s0] sm:$0xff]   ;;  %v8347_v10 = vld [vmem:[%s10028_s1 + $0x128] sm:$0xff]   ;;  %v8349_v11 = vld [vmem:[%s10028_s1 + $0x130] sm:$0xff]  }
   0x5   :  { %v8353_v12 = vld [vmem:[%s10027_s0 + $0x8] sm:$0xff]   ;;  %v8358_v13 = vld [vmem:[%s10027_s0 + $0x10] sm:$0xff]   ;;  %v8350_v14 = vld [vmem:[%s10028_s1 + $0x138] sm:$0xff]  }
   0x6   :  { %v8351_v15 = vld [vmem:[%s10028_s1 + $0x140] sm:$0xff]   ;;  %v8363_v16 = vld [vmem:[%s10027_s0 + $0x18] sm:$0xff]   ;;  %v8352_v18 = vld [vmem:[%s10028_s1 + $0x148] sm:$0xff]  }
   0x7   :  { %7038 = vmatpush3.bf16.msra.mxu0 %v8339_v1  ;;  %v8370_v17 = vld [vmem:[%s10027_s0 + $0x20] sm:$0xff]   ;;  %v8354_v19 = vld [vmem:[%s10028_s1 + $0x150] sm:$0xff]   ;;  %v8375_v20 = vld [vmem:[%s10027_s0 + $0x28] sm:$0xff]  }
   0x8   :  { %7039 = vmatprep.subr.bf16.mxu0 %v8340_v2  ;;  %v8380_v21 = vld [vmem:[%s10027_s0 + $0x30] sm:$0xff]   ;;  %v8355_v22 = vld [vmem:[%s10028_s1 + $0x158] sm:$0xff]   ;;  %v8356_v23 = vld [vmem:[%s10028_s1 + $0x160] sm:$0xff]  }
   0x9   :  { %v8385_v24 = vld [vmem:[%s10027_s0 + $0x38] sm:$0xff]   ;;  %v8357_v25 = vld [vmem:[%s10028_s1 + $0x168] sm:$0xff]   ;;  %v8359_v26 = vld [vmem:[%s10028_s1 + $0x170] sm:$0xff]  }
   0xa   :  { %v8360_v27 = vld [vmem:[%s10028_s1 + $0x178] sm:$0xff]   ;;  %v8361_v28 = vld [vmem:[%s10028_s1 + $0x180] sm:$0xff]   ;;  %v8362_v29 = vld [vmem:[%s10028_s1 + $0x188] sm:$0xff]  }
   0xb   :  { %7040 = vmatpush3.bf16.msra.mxu0 %v8340_v2  ;;  %v8364_v30 = vld [vmem:[%s10028_s1 + $0x190] sm:$0xff]   ;;  %v8365_v31 = vld [vmem:[%s10028_s1 + $0x198] sm:$0xff]   ;;  %v8366_v32 = vld [vmem:[%s10028_s1 + $0x1a0] sm:$0xff]  }
   0xc   :  { %7041 = vmatprep.subr.bf16.mxu0 %v8341_v3  ;;  %v8367_v33 = vld [vmem:[%s10028_s1 + $0x1a8] sm:$0xff]   ;;  %v8368_v34 = vld [vmem:[%s10028_s1 + $0x1b0] sm:$0xff]   ;;  %v8369_v35 = vld [vmem:[%s10028_s1 + $0x1b8] sm:$0xff]  }
   0xd   :  { %v8371_v36 = vld [vmem:[%s10028_s1 + $0x1c0] sm:$0xff]   ;;  %v8372_v37 = vld [vmem:[%s10028_s1 + $0x1c8] sm:$0xff]   ;;  %v8373_v38 = vld [vmem:[%s10028_s1 + $0x1d0] sm:$0xff]  }
   0xe   :  { %v8374_v39 = vld [vmem:[%s10028_s1 + $0x1d8] sm:$0xff]   ;;  %v8376_v40 = vld [vmem:[%s10028_s1 + $0x1e0] sm:$0xff]   ;;  %v8377_v41 = vld [vmem:[%s10028_s1 + $0x1e8] sm:$0xff]  }
   0xf   :  { %7042 = vmatpush3.bf16.msra.mxu0 %v8341_v3  ;;  %v8378_v42 = vld [vmem:[%s10028_s1 + $0x1f0] sm:$0xff]   ;;  %v8379_v43 = vld [vmem:[%s10028_s1 + $0x1f8] sm:$0xff]   ;;  %v8381_v44 = vld [vmem:[%s10028_s1 + $0x200] sm:$0xff]  }
  0x10   :  { %7043 = vmatprep.subr.bf16.mxu0 %v8342_v5  ;;  %v8382_v45 = vld [vmem:[%s10028_s1 + $0x208] sm:$0xff]   ;;  %v8383_v46 = vld [vmem:[%s10028_s1 + $0x210] sm:$0xff]   ;;  %v8384_v47 = vld [vmem:[%s10028_s1 + $0x218] sm:$0xff]  }
  0x11   :  { %v8386_v48 = vld [vmem:[%s10028_s1 + $0x220] sm:$0xff]   ;;  %v8387_v49 = vld [vmem:[%s10028_s1 + $0x228] sm:$0xff]   ;;  %v8388_v50 = vld [vmem:[%s10028_s1 + $0x230] sm:$0xff]  }
  0x12   :  { %v8389_v51 = vld [vmem:[%s10028_s1 + $0x238] sm:$0xff]   ;;  %v8390_v52 = vld [vmem:[%s10028_s1] sm:$0xff]   ;;  %v8391_v53 = vld [vmem:[%s10028_s1 + $0x8] sm:$0xff]  }
  0x13   :  { %7044 = vmatpush3.bf16.msra.mxu0 %v8342_v5  ;;  %v8392_v54 = vld [vmem:[%s10028_s1 + $0x10] sm:$0xff]   ;;  %v8393_v55 = vld [vmem:[%s10028_s1 + $0x18] sm:$0xff]   ;;  %v8394_v56 = vld [vmem:[%s10028_s1 + $0x20] sm:$0xff]  }
  0x14   :  { %7045 = vmatprep.subr.bf16.mxu0 %v8343_v6  ;;  %v8395_v57 = vld [vmem:[%s10028_s1 + $0x28] sm:$0xff]   ;;  %v8396_v58 = vld [vmem:[%s10028_s1 + $0x30] sm:$0xff]   ;;  %v8397_v59 = vld [vmem:[%s10028_s1 + $0x38] sm:$0xff]  }
  0x15   :  { %v8398_v60 = vld [vmem:[%s10028_s1 + $0x40] sm:$0xff]  }
  0x17   :  { %7046 = vmatpush3.bf16.msra.mxu0 %v8343_v6 }
  0x18   :  { %7047 = vmatprep.subr.bf16.mxu0 %v8344_v7 }
  0x1b   :  { %7048 = vmatpush3.bf16.msra.mxu0 %v8344_v7 }
  0x1c   :  { %7049 = vmatprep.subr.bf16.mxu0 %v8345_v8 }
  0x1f   :  { %7050 = vmatpush3.bf16.msra.mxu0 %v8345_v8 }
  0x20   :  { %7123 = vmatprep.subr.bf16.mxu0 %v8348_v9 }
  0x22   :  { %7052 = vmatmul.mubr.bf16.vlgmr.msra.gmra.mrb[0].mxu0 %v8347_v10 }
  0x23   :  { %7124 = vmatpush3.bf16.msra.mxu0 %v8348_v9  ;;  %7055 = vmatprep.mubr.bf16.mxu0 %v8349_v11 }
  0x24   :  { %7125 = vmatprep.subr.bf16.mxu0 %v8353_v12 }
  0x27   :  { %7126 = vmatpush3.bf16.msra.mxu0 %v8353_v12 }
  0x28   :  { %7127 = vmatprep.subr.bf16.mxu0 %v8358_v13 }
  0x2a   :  { %7056 = vmatmul.mubr.bf16.gmra.mrb[4].mxu0 %v8350_v14 }
  0x2b   :  { %7059 = vmatprep.mubr.bf16.mxu0 %v8351_v15  ;;  %7128 = vmatpush3.bf16.msra.mxu0 %v8358_v13 }
  0x2c   :  { %7129 = vmatprep.subr.bf16.mxu0 %v8363_v16 }
  0x2f   :  { %7130 = vmatpush3.bf16.msra.mxu0 %v8363_v16 }
  0x30   :  { %7131 = vmatprep.subr.bf16.mxu0 %v8370_v17 }
  0x32   :  { %7060 = vmatmul.mubr.bf16.gmra.mrb[8].mxu0 %v8352_v18 }
  0x33   :  { %7063 = vmatprep.mubr.bf16.mxu0 %v8354_v19  ;;  %7132 = vmatpush3.bf16.msra.mxu0 %v8370_v17 }
  0x34   :  { %7133 = vmatprep.subr.bf16.mxu0 %v8375_v20 }
  0x37   :  { %7134 = vmatpush3.bf16.msra.mxu0 %v8375_v20 }
  0x38   :  { %7135 = vmatprep.subr.bf16.mxu0 %v8380_v21 }
  0x3a   :  { %7064 = vmatmul.mubr.bf16.gmra.mrb[12].mxu0 %v8355_v22 }
  0x3b   :  { %7067 = vmatprep.mubr.bf16.mxu0 %v8356_v23  ;;  %7136 = vmatpush3.bf16.msra.mxu0 %v8380_v21 }
  0x3c   :  { %7137 = vmatprep.subr.bf16.mxu0 %v8385_v24 }
  0x3f   :  { %7138 = vmatpush3.bf16.msra.mxu0 %v8385_v24 }
  0x42   :  { %7068 = vmatmul.mubr.bf16.gmra.mrb[16].mxu0 %v8357_v25 }
  0x43   :  { %7071 = vmatprep.mubr.bf16.mxu0 %v8359_v26 }
  0x4a   :  { %7072 = vmatmul.mubr.bf16.gmra.mrb[20].mxu0 %v8360_v27 }
  0x4b   :  { %7075 = vmatprep.mubr.bf16.mxu0 %v8361_v28 }
  0x52   :  { %7076 = vmatmul.mubr.bf16.gmra.mrb[24].mxu0 %v8362_v29 }
  0x53   :  { %7079 = vmatprep.mubr.bf16.mxu0 %v8364_v30 }
  0x5a   :  { %7080 = vmatmul.mubr.bf16.gmra.mrb[28].mxu0 %v8365_v31 }
  0x5b   :  { %7083 = vmatprep.mubr.bf16.mxu0 %v8366_v32 }
  0x62   :  { %7084 = vmatmul.mubr.bf16.gmra.mrb[32].mxu0 %v8367_v33 }
  0x63   :  { %7087 = vmatprep.mubr.bf16.mxu0 %v8368_v34 }
  0x6a   :  { %7088 = vmatmul.mubr.bf16.gmra.mrb[36].mxu0 %v8369_v35 }
  0x6b   :  { %7091 = vmatprep.mubr.bf16.mxu0 %v8371_v36 }
  0x72   :  { %7092 = vmatmul.mubr.bf16.gmra.mrb[40].mxu0 %v8372_v37 }
  0x73   :  { %7095 = vmatprep.mubr.bf16.mxu0 %v8373_v38 }
  0x7a   :  { %7096 = vmatmul.mubr.bf16.gmra.mrb[44].mxu0 %v8374_v39 }
  0x7b   :  { %7099 = vmatprep.mubr.bf16.mxu0 %v8376_v40 }
  0x82   :  { %7100 = vmatmul.mubr.bf16.gmra.mrb[48].mxu0 %v8377_v41 }
  0x83   :  { %7103 = vmatprep.mubr.bf16.mxu0 %v8378_v42 }
  0x8a   :  { %7104 = vmatmul.mubr.bf16.gmra.mrb[52].mxu0 %v8379_v43 }
  0x8b   :  { %7107 = vmatprep.mubr.bf16.mxu0 %v8381_v44 }
  0x92   :  { %7108 = vmatmul.mubr.bf16.gmra.mrb[56].mxu0 %v8382_v45 }
  0x93   :  { %7111 = vmatprep.mubr.bf16.mxu0 %v8383_v46 }
  0x9a   :  { %7112 = vmatmul.mubr.bf16.gmra.mrb[60].mxu0 %v8384_v47 }
  0x9b   :  { %7115 = vmatprep.mubr.bf16.mxu0 %v8386_v48 }
  0xa2   :  { %7116 = vmatmul.mubr.bf16.gmra.mrb[64].mxu0 %v8387_v49 }
  0xa3   :  { %7119 = vmatprep.mubr.bf16.mxu0 %v8388_v50 }
  0xaa   :  { %7120 = vmatmul.mubr.bf16.gmra.mrb[68].mxu0 %v8389_v51 }
  0xab   :  { %7139 = vmatprep.mubr.bf16.mxu0 %v8390_v52 }
  0xb2   :  { %7140 = vmatmul.mubr.bf16.vlgmr.msra.gmra.mrb[0].mxu0 %v8391_v53 }
  0xb3   :  { %7143 = vmatprep.mubr.bf16.mxu0 %v8392_v54 }
  0xba   :  { %7144 = vmatmul.mubr.bf16.gmra.mrb[4].mxu0 %v8393_v55 }
  0xbb   :  { %7147 = vmatprep.mubr.bf16.mxu0 %v8394_v56 }
  0xc2   :  { %7148 = vmatmul.mubr.bf16.gmra.mrb[8].mxu0 %v8395_v57 }
  0xc3   :  { %7151 = vmatprep.mubr.bf16.mxu0 %v8396_v58 }
  0xc4   :  { %8 = vsyncpa [#allocation3], 0  ;;  %v8399_v61 = vld [vmem:[%s10028_s1 + $0x48] sm:$0xff]   ;;  %v8400_v62 = vld [vmem:[%s10028_s1 + $0x50] sm:$0xff]   ;;  %vm1438_vm0 = vcmask 523264   ;;  %vm8629_vm1 = vmmov 0  }
  0xc5   :  { %v8401_v63 = vld [vmem:[%s10028_s1 + $0x58] sm:$0xff]   ;;  %v8402_v0 = vld [vmem:[%s10028_s1 + $0x60] sm:$0xff]   ;;  %v8403_v1 = vld [vmem:[%s10028_s1 + $0x68] sm:$0xff]   ;;  %vm3630_vm12 = vcmask 130048   ;;  %vm4668_vm14 = vcmask 1043456   ;;  %vm4652_vm15 = vcmask 64512  }
  0xc6   :  { %v8404_v2 = vld [vmem:[%s10028_s1 + $0x70] sm:$0xff]   ;;  %v8405_v3 = vld [vmem:[%s10028_s1 + $0x78] sm:$0xff]   ;;  %v8406_v4 = vld [vmem:[%s10028_s1 + $0x80] sm:$0xff]   ;;  %s8631_s30 = smov [#allocation2]  }
  0xc7   :  { %v8407_v5 = vld [vmem:[%s10028_s1 + $0x88] sm:$0xff]   ;;  %v8408_v6 = vld [vmem:[%s10028_s1 + $0x90] sm:$0xff]   ;;  %v8409_v7 = vld [vmem:[%s10028_s1 + $0x98] sm:$0xff]   ;;  %s6183_s4 = sshll.u32 %s8631_s30, 4  ;;  %s6184_s4 = int_to_ptr.vmem [resolvable:$true] %s6183_s4 }
  0xc8   :  { %v8410_v8 = vld [vmem:[%s10028_s1 + $0xa0] sm:$0xff]   ;;  %v8411_v9 = vld [vmem:[%s10028_s1 + $0xa8] sm:$0xff]   ;;  %v8412_v10 = vld [vmem:[%s10028_s1 + $0xb0] sm:$0xff]   ;;  %s8604_s5 = scalar_lea.vmem %s6184_s4, 128  ;;  %p8609_p1 = scmp.lt.s32.totalorder %s6184_s4, %s6184_s4 }
  0xc9   :  { %v8413_v11 = vld [vmem:[%s10028_s1 + $0xb8] sm:$0xff]   ;;  %v8414_v12 = vld [vmem:[%s10028_s1 + $0xc0] sm:$0xff]   ;;  %v8415_v14 = vld [vmem:[%s10028_s1 + $0xc8] sm:$0xff]   ;;  %p8605_p0 = scmp.ne.s32.totalorder %s6184_s4, %s8604_s5  ;;  %p8610_p2 = scmp.lt.s32.totalorder %s8604_s5, %s8604_s5 }
  0xca   :  { %7152 = vmatmul.mubr.bf16.gmra.mrb[12].mxu0 %v8397_v59  ;;  %v8426_v13 = vld [vmem:[%s10028_s1 + $0x260] sm:$0xff]   ;;  %v8427_v15 = vld [vmem:[%s10028_s1 + $0x268] sm:$0xff]   ;;  %v8416_v16 = vld [vmem:[%s10028_s1 + $0xd0] sm:$0xff]  }
  0xcb   :  { %7155 = vmatprep.mubr.bf16.mxu0 %v8398_v60  ;;  %7211 = vmatprep.subr.bf16.mxu1 %v8426_v13  ;;  %v8428_v17 = vld [vmem:[%s10028_s1 + $0x270] sm:$0xff]   ;;  %v8417_v18 = vld [vmem:[%s10028_s1 + $0xd8] sm:$0xff]   ;;  %v8418_v20 = vld [vmem:[%s10028_s1 + $0xe0] sm:$0xff]   ;;  %p8611_p3 = por %p8610_p2, %p8609_p1 }
  0xcc   :  { %7212 = vmatpush3.bf16.msra.mxu1 %v8426_v13  ;;  %v8429_v19 = vld [vmem:[%s10028_s1 + $0x278] sm:$0xff]   ;;  %v8430_v21 = vld [vmem:[%s10028_s1 + $0x240] sm:$0xff]   ;;  %v8419_v22 = vld [vmem:[%s10028_s1 + $0xe8] sm:$0xff]  }
  0xcd   :  { %7213 = vmatprep.subr.bf16.mxu1 %v8427_v15  ;;  %v8420_v23 = vld [vmem:[%s10028_s1 + $0xf0] sm:$0xff]   ;;  %v8421_v24 = vld [vmem:[%s10028_s1 + $0xf8] sm:$0xff]   ;;  %v8422_v25 = vld [vmem:[%s10028_s1 + $0x100] sm:$0xff]   ;;  %p8612_p4 = pnand %p8611_p3, %p8605_p0 }
  0xce   :  { %v8423_v26 = vld [vmem:[%s10028_s1 + $0x108] sm:$0xff]   ;;  %v8424_v27 = vld [vmem:[%s10028_s1 + $0x110] sm:$0xff]   ;;  %v8425_v28 = vld [vmem:[%s10028_s1 + $0x118] sm:$0xff]  }
  0xcf   :  { %v8431_v47 = vld [vmem:[%s10028_s1 + $0x248] sm:$0xff]   ;;  %v8432_v50 = vld [vmem:[%s10028_s1 + $0x250] sm:$0xff]   ;;  %v8433_v55 = vld [vmem:[%s10028_s1 + $0x258] sm:$0xff]  }
  0xd0   :  { %7214 = vmatpush3.bf16.msra.mxu1 %v8427_v15  ;;  %v8434_v58 = vld [vmem:[%s10028_s1 + $0x280] sm:$0xff]   ;;  %v8439_v15 = vld [vmem:[%s10028_s1 + $0x2a8] sm:$0xff]  }
  0xd1   :  { %7215 = vmatprep.subr.bf16.mxu1 %v8428_v17 }
  0xd2   :  { %7156 = vmatmul.mubr.bf16.gmra.mrb[16].mxu0 %v8399_v61 }
  0xd3   :  { %7159 = vmatprep.mubr.bf16.mxu0 %v8400_v62 }
  0xd4   :  { %7216 = vmatpush3.bf16.msra.mxu1 %v8428_v17 }
  0xd5   :  { %7217 = vmatprep.subr.bf16.mxu1 %v8429_v19 }
  0xd8   :  { %7218 = vmatpush3.bf16.msra.mxu1 %v8429_v19 }
  0xd9   :  { %7227 = vmatprep.subr.bf16.mxu1 %v8430_v21 }
  0xda   :  { %7160 = vmatmul.mubr.bf16.gmra.mrb[20].mxu0 %v8401_v63  ;;  %v8435_v63 = vld [vmem:[%s10028_s1 + $0x288] sm:$0xff]  }
  0xdb   :  { %7163 = vmatprep.mubr.bf16.mxu0 %v8402_v0 }
  0xe2   :  { %7164 = vmatmul.mubr.bf16.gmra.mrb[24].mxu0 %v8403_v1 }
  0xe3   :  { %7167 = vmatprep.mubr.bf16.mxu0 %v8404_v2  ;;  %v8436_v2 = vld [vmem:[%s10028_s1 + $0x290] sm:$0xff]  }
  0xea   :  { %7168 = vmatmul.mubr.bf16.gmra.mrb[28].mxu0 %v8405_v3 }
  0xeb   :  { %7171 = vmatprep.mubr.bf16.mxu0 %v8406_v4 }
  0xf2   :  { %7172 = vmatmul.mubr.bf16.gmra.mrb[32].mxu0 %v8407_v5 }
  0xf3   :  { %7175 = vmatprep.mubr.bf16.mxu0 %v8408_v6 }
  0xfa   :  { %7176 = vmatmul.mubr.bf16.gmra.mrb[36].mxu0 %v8409_v7  ;;  %v8437_v7 = vld [vmem:[%s10028_s1 + $0x298] sm:$0xff]  }
  0xfb   :  { %7179 = vmatprep.mubr.bf16.mxu0 %v8410_v8 }
 0x102   :  { %7180 = vmatmul.mubr.bf16.gmra.mrb[40].mxu0 %v8411_v9 }
 0x103   :  { %7183 = vmatprep.mubr.bf16.mxu0 %v8412_v10  ;;  %v8438_v10 = vld [vmem:[%s10028_s1 + $0x2a0] sm:$0xff]  }
 0x10a   :  { %7184 = vmatmul.mubr.bf16.gmra.mrb[44].mxu0 %v8413_v11 }
 0x10b   :  { %7187 = vmatprep.mubr.bf16.mxu0 %v8414_v12 }
 0x112   :  { %7188 = vmatmul.mubr.bf16.gmra.mrb[48].mxu0 %v8415_v14 }
 0x113   :  { %7191 = vmatprep.mubr.bf16.mxu0 %v8416_v16 }
 0x11a   :  { %7192 = vmatmul.mubr.bf16.gmra.mrb[52].mxu0 %v8417_v18  ;;  %v8440_v18 = vld [vmem:[%s10028_s1 + $0x2b0] sm:$0xff]  }
 0x11b   :  { %7195 = vmatprep.mubr.bf16.mxu0 %v8418_v20 }
 0x122   :  { %7196 = vmatmul.mubr.bf16.gmra.mrb[56].mxu0 %v8419_v22 }
 0x123   :  { %7199 = vmatprep.mubr.bf16.mxu0 %v8420_v23  ;;  %v8441_v23 = vld [vmem:[%s10028_s1 + $0x2b8] sm:$0xff]  }
 0x12a   :  { %7200 = vmatmul.mubr.bf16.gmra.mrb[60].mxu0 %v8421_v24 }
 0x12b   :  { %7203 = vmatprep.mubr.bf16.mxu0 %v8422_v25 }
 0x132   :  { %7204 = vmatmul.mubr.bf16.gmra.mrb[64].mxu0 %v8423_v26  ;;  %v8442_v26 = vld [vmem:[%s10028_s1 + $0x2c0] sm:$0xff]  }
 0x133   :  { %7207 = vmatprep.mubr.bf16.mxu0 %v8424_v27 }
 0x13a   :  { %7208 = vmatmul.mubr.bf16.gmra.mrb[68].mxu0 %v8425_v28 }
 0x185   :  { %v7141_v29 = vpop.f32.mrb[0].mxu0 }
 0x186   :  { %v1075_v30 = vpop.f32.mrb[1].mxu0 }
 0x187   :  { %v7142_v31 = vpop.f32.mrb[2].mxu0 }
 0x188   :  { %v1363_v32 = vpack.c.bf16 %v7142_v31, %v7141_v29  ;;  %v1078_v33 = vpop.f32.mrb[3].mxu0  ;;  %v8443_v31 = vld [vmem:[%s10028_s1 + $0x2c8] sm:$0xff]  }
 0x189   :  { %v1362_v34 = vpack.c.bf16 %v1078_v33, %v1075_v30 }
 0x18d   :  { %v7145_v35 = vpop.f32.mrb[4].mxu0 }
 0x18e   :  { %v1091_v36 = vpop.f32.mrb[5].mxu0 }
 0x18f   :  { %v7146_v37 = vpop.f32.mrb[6].mxu0 }
 0x190   :  { %v1365_v38 = vpack.c.bf16 %v7146_v37, %v7145_v35  ;;  %v1094_v39 = vpop.f32.mrb[7].mxu0 }
 0x191   :  { %v1364_v40 = vpack.c.bf16 %v1094_v39, %v1091_v36  ;;  %v8445_v39 = vld [vmem:[%s10028_s1 + $0x2d8] sm:$0xff]  }
 0x195   :  { %v7149_v41 = vpop.f32.mrb[8].mxu0 }
 0x196   :  { %v1107_v42 = vpop.f32.mrb[9].mxu0 }
 0x197   :  { %v7150_v43 = vpop.f32.mrb[10].mxu0 }
 0x198   :  { %v1367_v44 = vpack.c.bf16 %v7150_v43, %v7149_v41  ;;  %v1110_v45 = vpop.f32.mrb[11].mxu0 }
 0x199   :  { %v1366_v46 = vpack.c.bf16 %v1110_v45, %v1107_v42  ;;  %v8446_v42 = vld [vmem:[%s10028_s1 + $0x2e0] sm:$0xff]  }
 0x19b   :  { %7219 = vmatprep.mubr.msk.bf16.mxu1 %vm1438_vm0, %v1366_v46 }
 0x19c   :  { %7220 = vmatmul.mubr.msk.bf16.vlgmr.msra.gmra.mrb[0].mxu1 %vm1438_vm0, %v1367_v44 }
 0x19d   :  { %v7153_v48 = vpop.f32.mrb[12].mxu0  ;;  %7228 = vmatpush3.bf16.msra.mxu1 %v8430_v21 }
 0x19e   :  { %v1123_v49 = vpop.f32.mrb[13].mxu0  ;;  %7229 = vmatprep.subr.bf16.mxu1 %v8431_v47 }
 0x19f   :  { %v7154_v51 = vpop.f32.mrb[14].mxu0 }
 0x1a0   :  { %v1369_v52 = vpack.c.bf16 %v7154_v51, %v7153_v48  ;;  %v1126_v53 = vpop.f32.mrb[15].mxu0 }
 0x1a1   :  { %v1368_v54 = vpack.c.bf16 %v1126_v53, %v1123_v49  ;;  %7230 = vmatpush3.bf16.msra.mxu1 %v8431_v47  ;;  %v8447_v47 = vld [vmem:[%s10028_s1 + $0x2e8] sm:$0xff]  }
 0x1a2   :  { %7231 = vmatprep.subr.bf16.mxu1 %v8432_v50 }
 0x1a3   :  { %7223 = vmatprep.mubr.msk.bf16.mxu1 %vm1438_vm0, %v1368_v54 }
 0x1a4   :  { %7224 = vmatmul.mubr.msk.bf16.gmra.mrb[4].mxu1 %vm1438_vm0, %v1369_v52 }
 0x1a5   :  { %v7157_v56 = vpop.f32.mrb[16].mxu0  ;;  %7232 = vmatpush3.bf16.msra.mxu1 %v8432_v50  ;;  %7235 = vmatprep.mubr.msk.bf16.mxu1 %vm1438_vm0, %v1362_v34  ;;  %v8444_v34 = vld [vmem:[%s10028_s1 + $0x2d0] sm:$0xff]  }
 0x1a6   :  { %v1139_v57 = vpop.f32.mrb[17].mxu0  ;;  %7233 = vmatprep.subr.bf16.mxu1 %v8433_v55  ;;  %v8448_v50 = vld [vmem:[%s10028_s1 + $0x2f0] sm:$0xff]  }
 0x1a7   :  { %v7158_v59 = vpop.f32.mrb[18].mxu0 }
 0x1a8   :  { %v1371_v60 = vpack.c.bf16 %v7158_v59, %v7157_v56  ;;  %v1142_v61 = vpop.f32.mrb[19].mxu0 }
 0x1a9   :  { %v1370_v62 = vpack.c.bf16 %v1142_v61, %v1139_v57  ;;  %7234 = vmatpush3.bf16.msra.mxu1 %v8433_v55  ;;  %v8449_v55 = vld [vmem:[%s10028_s1 + $0x2f8] sm:$0xff]  }
 0x1aa   :  { %7243 = vmatprep.subr.bf16.mxu1 %v8434_v58 }
 0x1ac   :  { %7236 = vmatmul.mubr.msk.bf16.vlgmr.msra.gmra.mrb[0].mxu1 %vm1438_vm0, %v1363_v32 }
 0x1ad   :  { %v7161_v0 = vpop.f32.mrb[20].mxu0  ;;  %7239 = vmatprep.mubr.msk.bf16.mxu1 %vm1438_vm0, %v1364_v40  ;;  %7244 = vmatpush3.bf16.msra.mxu1 %v8434_v58  ;;  %v8450_v58 = vld [vmem:[%s10028_s1 + $0x300] sm:$0xff]  }
 0x1ae   :  { %v1155_v1 = vpop.f32.mrb[21].mxu0  ;;  %7245 = vmatprep.subr.bf16.mxu1 %v8435_v63 }
 0x1af   :  { %v7162_v3 = vpop.f32.mrb[22].mxu0 }
 0x1b0   :  { %v1373_v4 = vpack.c.bf16 %v7162_v3, %v7161_v0  ;;  %v1158_v5 = vpop.f32.mrb[23].mxu0 }
 0x1b1   :  { %v1372_v6 = vpack.c.bf16 %v1158_v5, %v1155_v1  ;;  %7246 = vmatpush3.bf16.msra.mxu1 %v8435_v63  ;;  %v8451_v63 = vld [vmem:[%s10028_s1 + $0x308] sm:$0xff]  }
 0x1b2   :  { %7247 = vmatprep.subr.bf16.mxu1 %v8436_v2 }
 0x1b4   :  { %7240 = vmatmul.mubr.msk.bf16.gmra.mrb[4].mxu1 %vm1438_vm0, %v1365_v38 }
 0x1b5   :  { %v7165_v8 = vpop.f32.mrb[24].mxu0  ;;  %7248 = vmatpush3.bf16.msra.mxu1 %v8436_v2  ;;  %7251 = vmatprep.mubr.msk.bf16.mxu1 %vm1438_vm0, %v1370_v62  ;;  %v8452_v2 = vld [vmem:[%s10028_s1 + $0x310] sm:$0xff]  }
 0x1b6   :  { %v1171_v9 = vpop.f32.mrb[25].mxu0  ;;  %7249 = vmatprep.subr.bf16.mxu1 %v8437_v7 }
 0x1b7   :  { %v7166_v11 = vpop.f32.mrb[26].mxu0 }
 0x1b8   :  { %v1375_v12 = vpack.c.bf16 %v7166_v11, %v7165_v8  ;;  %v1174_v13 = vpop.f32.mrb[27].mxu0 }
 0x1b9   :  { %v1374_v14 = vpack.c.bf16 %v1174_v13, %v1171_v9  ;;  %7250 = vmatpush3.bf16.msra.mxu1 %v8437_v7  ;;  %v8453_v7 = vld [vmem:[%s10028_s1 + $0x318] sm:$0xff]  }
 0x1ba   :  { %7259 = vmatprep.subr.bf16.mxu1 %v8438_v10 }
 0x1bc   :  { %7252 = vmatmul.mubr.msk.bf16.vlgmr.msra.gmra.mrb[0].mxu1 %vm1438_vm0, %v1371_v60 }
 0x1bd   :  { %v7169_v16 = vpop.f32.mrb[28].mxu0  ;;  %7255 = vmatprep.mubr.msk.bf16.mxu1 %vm1438_vm0, %v1372_v6  ;;  %7260 = vmatpush3.bf16.msra.mxu1 %v8438_v10  ;;  %v8454_v10 = vld [vmem:[%s10028_s1 + $0x320] sm:$0xff]  }
 0x1be   :  { %v1187_v17 = vpop.f32.mrb[29].mxu0  ;;  %7261 = vmatprep.subr.bf16.mxu1 %v8439_v15 }
 0x1bf   :  { %v7170_v19 = vpop.f32.mrb[30].mxu0 }
 0x1c0   :  { %v1377_v20 = vpack.c.bf16 %v7170_v19, %v7169_v16  ;;  %v1190_v21 = vpop.f32.mrb[31].mxu0 }
 0x1c1   :  { %v1376_v22 = vpack.c.bf16 %v1190_v21, %v1187_v17  ;;  %7262 = vmatpush3.bf16.msra.mxu1 %v8439_v15  ;;  %v8455_v15 = vld [vmem:[%s10028_s1 + $0x328] sm:$0xff]  }
 0x1c2   :  { %7263 = vmatprep.subr.bf16.mxu1 %v8440_v18 }
 0x1c4   :  { %7256 = vmatmul.mubr.msk.bf16.gmra.mrb[4].mxu1 %vm1438_vm0, %v1373_v4 }
 0x1c5   :  { %v7173_v24 = vpop.f32.mrb[32].mxu0  ;;  %7264 = vmatpush3.bf16.msra.mxu1 %v8440_v18  ;;  %7267 = vmatprep.mubr.msk.bf16.mxu1 %vm1438_vm0, %v1374_v14  ;;  %v8456_v18 = vld [vmem:[%s10028_s1 + $0x330] sm:$0xff]  }
 0x1c6   :  { %v1203_v25 = vpop.f32.mrb[33].mxu0  ;;  %7265 = vmatprep.subr.bf16.mxu1 %v8441_v23 }
 0x1c7   :  { %v7174_v27 = vpop.f32.mrb[34].mxu0 }
 0x1c8   :  { %v1379_v28 = vpack.c.bf16 %v7174_v27, %v7173_v24  ;;  %v1206_v29 = vpop.f32.mrb[35].mxu0 }
 0x1c9   :  { %v1378_v30 = vpack.c.bf16 %v1206_v29, %v1203_v25  ;;  %7266 = vmatpush3.bf16.msra.mxu1 %v8441_v23  ;;  %v8457_v23 = vld [vmem:[%s10028_s1 + $0x338] sm:$0xff]  }
 0x1ca   :  { %7275 = vmatprep.subr.bf16.mxu1 %v8442_v26 }
 0x1cc   :  { %7268 = vmatmul.mubr.msk.bf16.vlgmr.msra.gmra.mrb[0].mxu1 %vm1438_vm0, %v1375_v12 }
 0x1cd   :  { %v7177_v32 = vpop.f32.mrb[36].mxu0  ;;  %7271 = vmatprep.mubr.msk.bf16.mxu1 %vm1438_vm0, %v1376_v22  ;;  %7276 = vmatpush3.bf16.msra.mxu1 %v8442_v26  ;;  %v8458_v26 = vld [vmem:[%s10028_s1 + $0x340] sm:$0xff]  }
 0x1ce   :  { %v1219_v33 = vpop.f32.mrb[37].mxu0  ;;  %7277 = vmatprep.subr.bf16.mxu1 %v8443_v31 }
 0x1cf   :  { %v7178_v35 = vpop.f32.mrb[38].mxu0 }
 0x1d0   :  { %v1381_v36 = vpack.c.bf16 %v7178_v35, %v7177_v32  ;;  %v1222_v37 = vpop.f32.mrb[39].mxu0 }
 0x1d1   :  { %v1380_v38 = vpack.c.bf16 %v1222_v37, %v1219_v33  ;;  %7278 = vmatpush3.bf16.msra.mxu1 %v8443_v31  ;;  %v8459_v31 = vld [vmem:[%s10028_s1 + $0x348] sm:$0xff]  }
 0x1d2   :  { %7279 = vmatprep.subr.bf16.mxu1 %v8444_v34 }
 0x1d4   :  { %7272 = vmatmul.mubr.msk.bf16.gmra.mrb[4].mxu1 %vm1438_vm0, %v1377_v20 }
 0x1d5   :  { %v7181_v40 = vpop.f32.mrb[40].mxu0  ;;  %7280 = vmatpush3.bf16.msra.mxu1 %v8444_v34  ;;  %7283 = vmatprep.mubr.msk.bf16.mxu1 %vm1438_vm0, %v1378_v30  ;;  %v8460_v34 = vld [vmem:[%s10028_s1 + $0x350] sm:$0xff]  }
 0x1d6   :  { %v1235_v41 = vpop.f32.mrb[41].mxu0  ;;  %7281 = vmatprep.subr.bf16.mxu1 %v8445_v39 }
 0x1d7   :  { %v7182_v43 = vpop.f32.mrb[42].mxu0 }
 0x1d8   :  { %v1383_v44 = vpack.c.bf16 %v7182_v43, %v7181_v40  ;;  %v1238_v45 = vpop.f32.mrb[43].mxu0  ;;  %v8628_v40 = vmov 0.0  }
 0x1d9   :  { %v1382_v46 = vpack.c.bf16 %v1238_v45, %v1235_v41  ;;  %7282 = vmatpush3.bf16.msra.mxu1 %v8445_v39  ;;  %v8461_v39 = vld [vmem:[%s10028_s1 + $0x358] sm:$0xff]   ;;  %7523 = vmatprep.mubr.msk.f32.mxu0 %vm8629_vm1, %v8628_v40  ;;  %v6351_v41 = vld [vmem:[%s10029_s2] ss:$0 sm:$0xff] }
 0x1da   :  { %7291 = vmatprep.subr.bf16.mxu1 %v8446_v42 }
 0x1dc   :  { %7284 = vmatmul.mubr.msk.bf16.vlgmr.msra.gmra.mrb[0].mxu1 %vm1438_vm0, %v1379_v28 }
 0x1dd   :  { %v7185_v48 = vpop.f32.mrb[44].mxu0  ;;  %7287 = vmatprep.mubr.msk.bf16.mxu1 %vm1438_vm0, %v1380_v38  ;;  %7292 = vmatpush3.bf16.msra.mxu1 %v8446_v42 }
 0x1de   :  { %v1251_v49 = vpop.f32.mrb[45].mxu0  ;;  %7293 = vmatprep.subr.bf16.mxu1 %v8447_v47 }
 0x1df   :  { %v7186_v51 = vpop.f32.mrb[46].mxu0 }
 0x1e0   :  { %v1385_v52 = vpack.c.bf16 %v7186_v51, %v7185_v48  ;;  %v1254_v53 = vpop.f32.mrb[47].mxu0 }
 0x1e1   :  { %v1384_v54 = vpack.c.bf16 %v1254_v53, %v1251_v49  ;;  %7294 = vmatpush3.bf16.msra.mxu1 %v8447_v47 }
 0x1e2   :  { %7295 = vmatprep.subr.bf16.mxu1 %v8448_v50 }
 0x1e4   :  { %7288 = vmatmul.mubr.msk.bf16.gmra.mrb[4].mxu1 %vm1438_vm0, %v1381_v36 }
 0x1e5   :  { %v7189_v56 = vpop.f32.mrb[48].mxu0  ;;  %7296 = vmatpush3.bf16.msra.mxu1 %v8448_v50  ;;  %7299 = vmatprep.mubr.msk.bf16.mxu1 %vm1438_vm0, %v1382_v46 }
 0x1e6   :  { %v1267_v57 = vpop.f32.mrb[49].mxu0  ;;  %7297 = vmatprep.subr.bf16.mxu1 %v8449_v55 }
 0x1e7   :  { %v7190_v59 = vpop.f32.mrb[50].mxu0 }
 0x1e8   :  { %v1387_v60 = vpack.c.bf16 %v7190_v59, %v7189_v56  ;;  %v1270_v61 = vpop.f32.mrb[51].mxu0 }
 0x1e9   :  { %v1386_v62 = vpack.c.bf16 %v1270_v61, %v1267_v57  ;;  %7298 = vmatpush3.bf16.msra.mxu1 %v8449_v55 }
 0x1ea   :  { %7307 = vmatprep.subr.bf16.mxu1 %v8450_v58 }
 0x1ec   :  { %7300 = vmatmul.mubr.msk.bf16.vlgmr.msra.gmra.mrb[0].mxu1 %vm1438_vm0, %v1383_v44 }
 0x1ed   :  { %v7193_v0 = vpop.f32.mrb[52].mxu0  ;;  %7303 = vmatprep.mubr.msk.bf16.mxu1 %vm1438_vm0, %v1384_v54  ;;  %7308 = vmatpush3.bf16.msra.mxu1 %v8450_v58 }
 0x1ee   :  { %v1283_v1 = vpop.f32.mrb[53].mxu0  ;;  %7309 = vmatprep.subr.bf16.mxu1 %v8451_v63 }
 0x1ef   :  { %v7194_v3 = vpop.f32.mrb[54].mxu0 }
 0x1f0   :  { %v1389_v4 = vpack.c.bf16 %v7194_v3, %v7193_v0  ;;  %v1286_v5 = vpop.f32.mrb[55].mxu0 }
 0x1f1   :  { %v1388_v6 = vpack.c.bf16 %v1286_v5, %v1283_v1  ;;  %7310 = vmatpush3.bf16.msra.mxu1 %v8451_v63 }
 0x1f2   :  { %7311 = vmatprep.subr.bf16.mxu1 %v8452_v2 }
 0x1f4   :  { %7304 = vmatmul.mubr.msk.bf16.gmra.mrb[4].mxu1 %vm1438_vm0, %v1385_v52 }
 0x1f5   :  { %v7197_v8 = vpop.f32.mrb[56].mxu0  ;;  %7312 = vmatpush3.bf16.msra.mxu1 %v8452_v2  ;;  %7315 = vmatprep.mubr.msk.bf16.mxu1 %vm1438_vm0, %v1386_v62 }
 0x1f6   :  { %v1299_v9 = vpop.f32.mrb[57].mxu0  ;;  %7313 = vmatprep.subr.bf16.mxu1 %v8453_v7 }
 0x1f7   :  { %v7198_v11 = vpop.f32.mrb[58].mxu0 }
 0x1f8   :  { %v1391_v12 = vpack.c.bf16 %v7198_v11, %v7197_v8  ;;  %v1302_v13 = vpop.f32.mrb[59].mxu0 }
 0x1f9   :  { %v1390_v14 = vpack.c.bf16 %v1302_v13, %v1299_v9  ;;  %7314 = vmatpush3.bf16.msra.mxu1 %v8453_v7 }
 0x1fa   :  { %7323 = vmatprep.subr.bf16.mxu1 %v8454_v10 }
 0x1fc   :  { %7316 = vmatmul.mubr.msk.bf16.vlgmr.msra.gmra.mrb[0].mxu1 %vm1438_vm0, %v1387_v60 }
 0x1fd   :  { %v7201_v16 = vpop.f32.mrb[60].mxu0  ;;  %7319 = vmatprep.mubr.msk.bf16.mxu1 %vm1438_vm0, %v1388_v6  ;;  %7324 = vmatpush3.bf16.msra.mxu1 %v8454_v10 }
 0x1fe   :  { %v1315_v17 = vpop.f32.mrb[61].mxu0  ;;  %7325 = vmatprep.subr.bf16.mxu1 %v8455_v15 }
 0x1ff   :  { %v7202_v19 = vpop.f32.mrb[62].mxu0 }
 0x200   :  { %v1393_v20 = vpack.c.bf16 %v7202_v19, %v7201_v16  ;;  %v1318_v21 = vpop.f32.mrb[63].mxu0  ;;  %v8472_v16 = vld [vmem:[%s10028_s1 + $0x3d0] sm:$0xff]   ;;  %v8474_v19 = vld [vmem:[%s10028_s1 + $0x3e0] sm:$0xff]  }
 0x201   :  { %v1392_v22 = vpack.c.bf16 %v1318_v21, %v1315_v17  ;;  %7326 = vmatpush3.bf16.msra.mxu1 %v8455_v15  ;;  %v8471_v15 = vld [vmem:[%s10028_s1 + $0x3c8] sm:$0xff]   ;;  %v8465_v21 = vld [vmem:[%s10028_s1 + $0x378] sm:$0xff]  }
 0x202   :  { %7327 = vmatprep.subr.bf16.mxu1 %v8456_v18  ;;  %v8463_v17 = vld [vmem:[%s10028_s1 + $0x368] sm:$0xff]  }
 0x204   :  { %7320 = vmatmul.mubr.msk.bf16.gmra.mrb[4].mxu1 %vm1438_vm0, %v1389_v4 }
 0x205   :  { %v7205_v24 = vpop.f32.mrb[64].mxu0  ;;  %7328 = vmatpush3.bf16.msra.mxu1 %v8456_v18  ;;  %7331 = vmatprep.mubr.msk.bf16.mxu1 %vm1438_vm0, %v1390_v14  ;;  %v8462_v14 = vld [vmem:[%s10028_s1 + $0x360] sm:$0xff]   ;;  %v8473_v18 = vld [vmem:[%s10028_s1 + $0x3d8] sm:$0xff]  }
 0x206   :  { %v1331_v25 = vpop.f32.mrb[65].mxu0  ;;  %7329 = vmatprep.subr.bf16.mxu1 %v8457_v23 }
 0x207   :  { %v7206_v27 = vpop.f32.mrb[66].mxu0 }
 0x208   :  { %v1395_v28 = vpack.c.bf16 %v7206_v27, %v7205_v24  ;;  %v1334_v29 = vpop.f32.mrb[67].mxu0  ;;  %v8468_v24 = vld [vmem:[%s10028_s1 + $0x390] sm:$0xff]  }
 0x209   :  { %v1394_v30 = vpack.c.bf16 %v1334_v29, %v1331_v25  ;;  %7330 = vmatpush3.bf16.msra.mxu1 %v8457_v23  ;;  %v8467_v23 = vld [vmem:[%s10028_s1 + $0x388] sm:$0xff]   ;;  %v8469_v25 = vld [vmem:[%s10028_s1 + $0x398] sm:$0xff]  }
 0x20a   :  { %7339 = vmatprep.subr.bf16.mxu1 %v8458_v26 }
 0x20c   :  { %7332 = vmatmul.mubr.msk.bf16.vlgmr.msra.gmra.mrb[0].mxu1 %vm1438_vm0, %v1391_v12 }
 0x20d   :  { %v7209_v32 = vpop.f32.mrb[68].mxu0  ;;  %7335 = vmatprep.mubr.msk.bf16.mxu1 %vm1438_vm0, %v1392_v22  ;;  %7340 = vmatpush3.bf16.msra.mxu1 %v8458_v26  ;;  %v8466_v22 = vld [vmem:[%s10028_s1 + $0x380] sm:$0xff]  }
 0x20e   :  { %v1347_v33 = vpop.f32.mrb[69].mxu0  ;;  %7341 = vmatprep.subr.bf16.mxu1 %v8459_v31  ;;  %v8470_v26 = vld [vmem:[%s10028_s1 + $0x3a0] sm:$0xff]  }
 0x20f   :  { %v7210_v35 = vpop.f32.mrb[70].mxu0 }
 0x210   :  { %v1397_v36 = vpack.c.bf16 %v7210_v35, %v7209_v32  ;;  %v1350_v37 = vpop.f32.mrb[71].mxu0  ;;  %v8475_v35 = vld [vmem:[%s10028_s1 + $0x3a8] sm:$0xff]  }
 0x211   :  { %v1396_v38 = vpack.c.bf16 %v1350_v37, %v1347_v33  ;;  %7342 = vmatpush3.bf16.msra.mxu1 %v8459_v31 }
 0x212   :  { %7343 = vmatprep.subr.bf16.mxu1 %v8460_v34 }
 0x214   :  { %7336 = vmatmul.mubr.msk.bf16.gmra.mrb[4].mxu1 %vm1438_vm0, %v1393_v20  ;;  %v8464_v20 = vld [vmem:[%s10028_s1 + $0x370] sm:$0xff]  }
 0x215   :  { %7344 = vmatpush3.bf16.msra.mxu1 %v8460_v34  ;;  %7347 = vmatprep.mubr.msk.bf16.mxu1 %vm1438_vm0, %v1394_v30 }
 0x216   :  { %7345 = vmatprep.subr.bf16.mxu1 %v8461_v39 }
 0x219   :  { %7346 = vmatpush3.bf16.msra.mxu1 %v8461_v39  ;;  %v8476_v39 = vld [vmem:[%s10028_s1 + $0x3b0] sm:$0xff]  }
 0x21a   :  { %7355 = vmatprep.subr.bf16.mxu1 %v8628_v40 }
 0x21c   :  { %7348 = vmatmul.mubr.msk.bf16.vlgmr.msra.gmra.mrb[0].mxu1 %vm1438_vm0, %v1395_v28 }
 0x21d   :  { %7351 = vmatprep.mubr.msk.bf16.mxu1 %vm1438_vm0, %v1396_v38  ;;  %v9149_v38 = vld [vmem:[%s10028_s1 + $0x4c8] sm:$0xff]  }
 0x224   :  { %7352 = vmatmul.mubr.msk.bf16.gmra.mrb[4].mxu1 %vm1438_vm0, %v1397_v36 }
 0x225   :  { %7363 = vmatprep.mubr.msk.bf16.mxu1 %vm8629_vm1, %v8628_v40 }
 0x2ef   :  { %v7349_v42 = vpop.f32.mrb[0].mxu1 }
 0x2f0   :  { %v2443_v43 = vadd.f32 %v7349_v42, %v6351_v41  ;;  %v2397_v44 = vpop.f32.mrb[1].mxu1 }
 0x2f1   :  { %v2441_v45 = vadd.f32 %v6351_v41, %v2397_v44  ;;  %v7350_v46 = vpop.f32.mrb[2].mxu1  ;;  %v9163_v44 = vld [vmem:[%s10028_s1 + $0x4d0] sm:$0xff]  }
 0x2f2   :  { %v2459_v47 = vmul.f32 0.2, %v2443_v43  ;;  %v2444_v48 = vadd.f32 %v7350_v46, %v6351_v41  ;;  %v2400_v49 = vpop.f32.mrb[3].mxu1  ;;  %vm2451_vm2 = vcmp.ge.f32.partialorder %v2443_v43, 0.0 }
 0x2f3   :  { %v2457_v50 = vmul.f32 0.2, %v2441_v45  ;;  %v2442_v51 = vadd.f32 %v6351_v41, %v2400_v49  ;;  %vm2449_vm3 = vcmp.ge.f32.partialorder %v2441_v45, 0.0  ;;  %v9174_v49 = vld [vmem:[%s10028_s1 + $0x4d8] sm:$0xff]  }
 0x2f4   :  { %vm2452_vm4 = vcmp.ge.f32.partialorder %v2444_v48, 0.0  ;;  %v2460_v52 = vmul.f32 0.2, %v2444_v48  ;;  %v2467_v54 = vsel %vm2451_vm2, %v2443_v43, %v2459_v47 }
 0x2f5   :  { %vm2450_vm5 = vcmp.ge.f32.partialorder %v2442_v51, 0.0  ;;  %v2458_v53 = vmul.f32 0.2, %v2442_v51  ;;  %v2465_v56 = vsel %vm2449_vm3, %v2441_v45, %v2457_v50  ;;  %v8477_v45 = vld [vmem:[%s10028_s1 + $0x3b8] sm:$0xff]   ;;  %v8478_v50 = vld [vmem:[%s10028_s1 + $0x3c0] sm:$0xff]  }
 0x2f6   :  { %v2468_v55 = vsel %vm2452_vm4, %v2444_v48, %v2460_v52 }
 0x2f7   :  { %v2474_v57 = vpack.c.bf16 %v2468_v55, %v2467_v54  ;;  %v2466_v58 = vsel %vm2450_vm5, %v2442_v51, %v2458_v53  ;;  %v7353_v59 = vpop.f32.mrb[4].mxu1  ;;  %v9185_v53 = vld [vmem:[%s10028_s1 + $0x4e0] sm:$0xff]   ;;  %v8479_v54 = vld [vmem:[%s10028_s1 + $0x3e8] sm:$0xff]  }
 0x2f8   :  { %v2473_v60 = vpack.c.bf16 %v2466_v58, %v2465_v56  ;;  %v2447_v61 = vadd.f32 %v7353_v59, %v6351_v41  ;;  %v2413_v62 = vpop.f32.mrb[5].mxu1  ;;  %v8480_v58 = vld [vmem:[%s10028_s1 + $0x3f0] sm:$0xff]  }
 0x2f9   :  { %v2445_v63 = vadd.f32 %v6351_v41, %v2413_v62  ;;  %v7354_v0 = vpop.f32.mrb[6].mxu1 }
 0x2fa   :  { %v2463_v1 = vmul.f32 0.2, %v2447_v61  ;;  %v2448_v2 = vadd.f32 %v7354_v0, %v6351_v41  ;;  %v2416_v3 = vpop.f32.mrb[7].mxu1  ;;  %7356 = vmatpush3.bf16.msra.mxu1 %v2473_v60  ;;  %vm2455_vm6 = vcmp.ge.f32.partialorder %v2447_v61, 0.0 }
 0x2fb   :  { %v2461_v4 = vmul.f32 0.2, %v2445_v63  ;;  %v2446_v5 = vadd.f32 %v6351_v41, %v2416_v3  ;;  %7357 = vmatprep.subr.bf16.mxu1 %v8628_v40  ;;  %vm2453_vm7 = vcmp.ge.f32.partialorder %v2445_v63, 0.0  ;;  %v8630_v41 = vmov 0.0|0.0  }
 0x2fc   :  { %vm2456_vm8 = vcmp.ge.f32.partialorder %v2448_v2, 0.0  ;;  %v2464_v6 = vmul.f32 0.2, %v2448_v2  ;;  %v2471_v8 = vsel %vm2455_vm6, %v2447_v61, %v2463_v1  ;;  %7989 = vmatprep.subr.bf16.mxu0 %v8630_v41  ;;  %v8481_v61 = vld [vmem:[%s10028_s1 + $0x3f8] sm:$0xff]   ;;  %v8482_v1 = vld [vmem:[%s10028_s1 + $0x400] sm:$0xff]  }
 0x2fd   :  { %vm2454_vm9 = vcmp.ge.f32.partialorder %v2446_v5, 0.0  ;;  %v2462_v7 = vmul.f32 0.2, %v2446_v5  ;;  %v2469_v10 = vsel %vm2453_vm7, %v2445_v63, %v2461_v4  ;;  %7991 = vmatpush3.bf16.msra.mxu0 %v9149_v38  ;;  %v8483_v4 = vld [vmem:[%s10028_s1 + $0x408] sm:$0xff]  }
 0x2fe   :  { %v2472_v9 = vsel %vm2456_vm8, %v2448_v2, %v2464_v6  ;;  %7358 = vmatpush3.bf16.msra.mxu1 %v2474_v57  ;;  %7992 = vmatprep.subr.bf16.mxu0 %v8630_v41 }
 0x2ff   :  { %v2476_v11 = vpack.c.bf16 %v2472_v9, %v2471_v8  ;;  %v2470_v12 = vsel %vm2454_vm9, %v2446_v5, %v2462_v7  ;;  %7359 = vmatprep.subr.bf16.mxu1 %v8628_v40  ;;  %v8484_v8 = vld [vmem:[%s10028_s1 + $0x410] sm:$0xff]  }
 0x300   :  { %v2475_v13 = vpack.c.bf16 %v2470_v12, %v2469_v10 }
 0x301   :  { %7994 = vmatpush3.bf16.msra.mxu0 %v9163_v44 }
 0x302   :  { %7360 = vmatpush3.bf16.msra.mxu1 %v2475_v13  ;;  %7995 = vmatprep.subr.bf16.mxu0 %v8630_v41 }
 0x303   :  { %7361 = vmatprep.subr.bf16.mxu1 %v8628_v40 }
 0x305   :  { %7997 = vmatpush3.bf16.msra.mxu0 %v9174_v49 }
 0x306   :  { %7362 = vmatpush3.bf16.msra.mxu1 %v2476_v11  ;;  %7998 = vmatprep.subr.bf16.mxu0 %v8630_v41  ;;  %v8485_v11 = vld [vmem:[%s10028_s1 + $0x418] sm:$0xff]  }
 0x307   :  { %7399 = vmatprep.subr.bf16.mxu1 %v8628_v40 }
 0x309   :  { %7364 = vmatmul.mubr.msk.bf16.vlgmr.msra.gmra.mrb[8].mxu1 %vm1438_vm0, %v8462_v14  ;;  %8000 = vmatpush3.bf16.msra.mxu0 %v9185_v53 }
 0x30a   :  { %7367 = vmatprep.mubr.msk.bf16.mxu1 %vm8629_vm1, %v8628_v40  ;;  %7400 = vmatpush3.bf16.msra.mxu1 %v8471_v15  ;;  %v8486_v15 = vld [vmem:[%s10028_s1 + $0x420] sm:$0xff]  }
 0x30b   :  { %7401 = vmatprep.subr.bf16.mxu1 %v8628_v40  ;;  %8001 = vmatprep.subr.bf16.mxu0 %v8630_v41 }
 0x30e   :  { %7402 = vmatpush3.bf16.msra.mxu1 %v8472_v16 }
 0x30f   :  { %7403 = vmatprep.subr.bf16.mxu1 %v8628_v40 }
 0x311   :  { %7368 = vmatmul.mubr.msk.bf16.gmra.mrb[12].mxu1 %vm1438_vm0, %v8463_v17 }
 0x312   :  { %7371 = vmatprep.mubr.msk.bf16.mxu1 %vm8629_vm1, %v8628_v40  ;;  %7404 = vmatpush3.bf16.msra.mxu1 %v8473_v18  ;;  %v8487_v18 = vld [vmem:[%s10028_s1 + $0x428] sm:$0xff]  }
 0x313   :  { %7405 = vmatprep.subr.bf16.mxu1 %v8628_v40 }
 0x316   :  { %7406 = vmatpush3.bf16.msra.mxu1 %v8474_v19 }
 0x317   :  { %7411 = vmatprep.subr.bf16.mxu1 %v8628_v40 }
 0x319   :  { %7372 = vmatmul.mubr.msk.bf16.gmra.mrb[16].mxu1 %vm1438_vm0, %v8464_v20 }
 0x31a   :  { %7375 = vmatprep.mubr.msk.bf16.mxu1 %vm8629_vm1, %v8628_v40 }
 0x321   :  { %7376 = vmatmul.mubr.msk.bf16.gmra.mrb[20].mxu1 %vm1438_vm0, %v8465_v21 }
 0x322   :  { %7379 = vmatprep.mubr.msk.bf16.mxu1 %vm8629_vm1, %v8628_v40 }
 0x329   :  { %7380 = vmatmul.mubr.msk.bf16.gmra.mrb[24].mxu1 %vm1438_vm0, %v8466_v22  ;;  %v8488_v22 = vld [vmem:[%s10028_s1 + $0x430] sm:$0xff]  }
 0x32a   :  { %7383 = vmatprep.mubr.msk.bf16.mxu1 %vm8629_vm1, %v8628_v40 }
 0x331   :  { %7384 = vmatmul.mubr.msk.bf16.gmra.mrb[28].mxu1 %vm1438_vm0, %v8467_v23 }
 0x332   :  { %7387 = vmatprep.mubr.msk.bf16.mxu1 %vm8629_vm1, %v8628_v40 }
 0x339   :  { %7388 = vmatmul.mubr.msk.bf16.gmra.mrb[32].mxu1 %vm1438_vm0, %v8468_v24 }
 0x33a   :  { %7391 = vmatprep.mubr.msk.bf16.mxu1 %vm8629_vm1, %v8628_v40 }
 0x341   :  { %7392 = vmatmul.mubr.msk.bf16.gmra.mrb[36].mxu1 %vm1438_vm0, %v8469_v25  ;;  %v8489_v25 = vld [vmem:[%s10028_s1 + $0x438] sm:$0xff]  }
 0x342   :  { %7395 = vmatprep.mubr.msk.bf16.mxu1 %vm8629_vm1, %v8628_v40 }
 0x349   :  { %7396 = vmatmul.mubr.msk.bf16.gmra.mrb[40].mxu1 %vm1438_vm0, %v8470_v26 }
 0x34a   :  { %7407 = vmatprep.mubr.msk.bf16.mxu1 %vm8629_vm1, %v8628_v40 }
 0x3dc   :  { %v2601_v27 = vpop.f32.mrb[8].mxu1 }
 0x3dd   :  { %v7365_v28 = vpop.f32.mrb[9].mxu1 }
 0x3de   :  { %v2604_v29 = vpop.f32.mrb[10].mxu1 }
 0x3df   :  { %v2672_v30 = vpack.c.bf16 %v2604_v29, %v2601_v27  ;;  %v7366_v31 = vpop.f32.mrb[11].mxu1  ;;  %v8490_v29 = vld [vmem:[%s10028_s1 + $0x440] sm:$0xff]  }
 0x3e0   :  { %v8492_v31 = vld [vmem:[%s10028_s1 + $0x450] sm:$0xff]  }
 0x3e4   :  { %v2609_v32 = vpop.f32.mrb[12].mxu1 }
 0x3e5   :  { %v7369_v33 = vpop.f32.mrb[13].mxu1 }
 0x3e6   :  { %v2612_v34 = vpop.f32.mrb[14].mxu1  ;;  %v8494_v33 = vld [vmem:[%s10028_s1 + $0x460] sm:$0xff]  }
 0x3e7   :  { %v2673_v36 = vpack.c.bf16 %v2612_v34, %v2609_v32  ;;  %v7370_v37 = vpop.f32.mrb[15].mxu1  ;;  %v8493_v32 = vld [vmem:[%s10028_s1 + $0x458] sm:$0xff]   ;;  %v8495_v34 = vld [vmem:[%s10028_s1 + $0x468] sm:$0xff]  }
 0x3e8   :  { %v8498_v37 = vld [vmem:[%s10028_s1 + $0x480] sm:$0xff]  }
 0x3e9   :  { %7408 = vmatmul.mubr.msk.bf16.vlgmr.msra.gmra.mrb[44].mxu1 %vm1438_vm0, %v2673_v36  ;;  %v8497_v36 = vld [vmem:[%s10028_s1 + $0x478] sm:$0xff]  }
 0x3ea   :  { %7412 = vmatpush3.bf16.msra.mxu1 %v8475_v35  ;;  %7419 = vmatprep.mubr.msk.bf16.mxu1 %vm8629_vm1, %v8628_v40  ;;  %v8496_v35 = vld [vmem:[%s10028_s1 + $0x470] sm:$0xff]  }
 0x3eb   :  { %7413 = vmatprep.subr.bf16.mxu1 %v8628_v40 }
 0x3ec   :  { %v2617_v42 = vpop.f32.mrb[16].mxu1 }
 0x3ed   :  { %v7373_v43 = vpop.f32.mrb[17].mxu1 }
 0x3ee   :  { %7414 = vmatpush3.bf16.msra.mxu1 %v8476_v39  ;;  %v2620_v46 = vpop.f32.mrb[18].mxu1  ;;  %v8499_v39 = vld [vmem:[%s10028_s1 + $0x488] sm:$0xff]   ;;  %v8501_v43 = vld [vmem:[%s10028_s1 + $0x498] sm:$0xff]  }
 0x3ef   :  { %7415 = vmatprep.subr.bf16.mxu1 %v8628_v40  ;;  %v2674_v47 = vpack.c.bf16 %v2620_v46, %v2617_v42  ;;  %v7374_v48 = vpop.f32.mrb[19].mxu1  ;;  %v8500_v42 = vld [vmem:[%s10028_s1 + $0x490] sm:$0xff]   ;;  %v8503_v46 = vld [vmem:[%s10028_s1 + $0x4a8] sm:$0xff]  }
 0x3f0   :  { %v8505_v48 = vld [vmem:[%s10028_s1 + $0x4b8] sm:$0xff]  }
 0x3f2   :  { %7416 = vmatpush3.bf16.msra.mxu1 %v8477_v45  ;;  %v8502_v45 = vld [vmem:[%s10028_s1 + $0x4a0] sm:$0xff]  }
 0x3f3   :  { %7417 = vmatprep.subr.bf16.mxu1 %v8628_v40 }
 0x3f4   :  { %v2625_v51 = vpop.f32.mrb[20].mxu1 }
 0x3f5   :  { %v7377_v52 = vpop.f32.mrb[21].mxu1 }
 0x3f6   :  { %7418 = vmatpush3.bf16.msra.mxu1 %v8478_v50  ;;  %v2628_v55 = vpop.f32.mrb[22].mxu1  ;;  %v8506_v50 = vld [vmem:[%s10028_s1 + $0x4c0] sm:$0xff]  }
 0x3f7   :  { %7423 = vmatprep.subr.bf16.mxu1 %v8628_v40  ;;  %v2675_v56 = vpack.c.bf16 %v2628_v55, %v2625_v51  ;;  %v7378_v57 = vpop.f32.mrb[23].mxu1 }
 0x3f9   :  { %7420 = vmatmul.mubr.msk.bf16.vlgmr.msra.gmra.mrb[44].mxu1 %vm1438_vm0, %v2672_v30  ;;  %v8491_v30 = vld [vmem:[%s10028_s1 + $0x448] sm:$0xff]  }
 0x3fa   :  { %7424 = vmatpush3.bf16.msra.mxu1 %v8479_v54  ;;  %7431 = vmatprep.mubr.msk.bf16.mxu1 %vm8629_vm1, %v8628_v40 }
 0x3fb   :  { %7425 = vmatprep.subr.bf16.mxu1 %v8628_v40 }
 0x3fc   :  { %v9200_v59 = vpop.f32.mrb[24].mxu1 }
 0x3fd   :  { %v7381_v60 = vpop.f32.mrb[25].mxu1 }
 0x3fe   :  { %7426 = vmatpush3.bf16.msra.mxu1 %v8480_v58  ;;  %v2636_v62 = vpop.f32.mrb[26].mxu1 }
 0x3ff   :  { %7427 = vmatprep.subr.bf16.mxu1 %v8628_v40  ;;  %v2676_v63 = vpack.c.bf16 %v2636_v62, %v9200_v59  ;;  %v7382_v0 = vpop.f32.mrb[27].mxu1 }
 0x402   :  { %7428 = vmatpush3.bf16.msra.mxu1 %v8481_v61 }
 0x403   :  { %7429 = vmatprep.subr.bf16.mxu1 %v8628_v40 }
 0x404   :  { %v9211_v2 = vpop.f32.mrb[28].mxu1 }
 0x405   :  { %v7385_v3 = vpop.f32.mrb[29].mxu1 }
 0x406   :  { %7430 = vmatpush3.bf16.msra.mxu1 %v8482_v1  ;;  %v2644_v5 = vpop.f32.mrb[30].mxu1  ;;  %v3480_v1 = vlaneseq }
 0x407   :  { %7435 = vmatprep.subr.bf16.mxu1 %v8628_v40  ;;  %v2677_v6 = vpack.c.bf16 %v2644_v5, %v9211_v2  ;;  %v7386_v7 = vpop.f32.mrb[31].mxu1 }
 0x408   :  { %v3481_v2 = vshrl.u32 %v3480_v1, 7 }
 0x409   :  { %7432 = vmatmul.mubr.msk.bf16.vlgmr.msra.gmra.mrb[44].mxu1 %vm1438_vm0, %v2674_v47  ;;  %v8504_v47 = vld [vmem:[%s10028_s1 + $0x4b0] sm:$0xff]  }
 0x40a   :  { %7436 = vmatpush3.bf16.msra.mxu1 %v8483_v4  ;;  %7443 = vmatprep.mubr.msk.bf16.mxu1 %vm8629_vm1, %v8628_v40 }
 0x40b   :  { %7437 = vmatprep.subr.bf16.mxu1 %v8628_v40 }
 0x40c   :  { %v9225_v9 = vpop.f32.mrb[32].mxu1 }
 0x40d   :  { %v7389_v10 = vpop.f32.mrb[33].mxu1 }
 0x40e   :  { %7438 = vmatpush3.bf16.msra.mxu1 %v8484_v8  ;;  %v9230_v12 = vpop.f32.mrb[34].mxu1 }
 0x40f   :  { %7439 = vmatprep.subr.bf16.mxu1 %v8628_v40  ;;  %v2678_v13 = vpack.c.bf16 %v9230_v12, %v9225_v9  ;;  %v7390_v14 = vpop.f32.mrb[35].mxu1 }
 0x412   :  { %7440 = vmatpush3.bf16.msra.mxu1 %v8485_v11 }
 0x413   :  { %7441 = vmatprep.subr.bf16.mxu1 %v8628_v40 }
 0x414   :  { %v9239_v16 = vpop.f32.mrb[36].mxu1 }
 0x415   :  { %v7393_v17 = vpop.f32.mrb[37].mxu1 }
 0x416   :  { %7442 = vmatpush3.bf16.msra.mxu1 %v8486_v15  ;;  %v9244_v19 = vpop.f32.mrb[38].mxu1  ;;  %v8512_v17 = vld [vmem:[%s10028_s1 + $0x52c] sm:$0xff]  }
 0x417   :  { %7447 = vmatprep.subr.bf16.mxu1 %v8628_v40  ;;  %v2679_v20 = vpack.c.bf16 %v9244_v19, %v9239_v16  ;;  %v7394_v21 = vpop.f32.mrb[39].mxu1  ;;  %v8514_v19 = vld [vmem:[%s10028_s1 + $0x53c] sm:$0xff]  }
 0x419   :  { %7444 = vmatmul.mubr.msk.bf16.vlgmr.msra.gmra.mrb[44].mxu1 %vm1438_vm0, %v2675_v56 }
 0x41a   :  { %7448 = vmatpush3.bf16.msra.mxu1 %v8487_v18  ;;  %7455 = vmatprep.mubr.msk.bf16.mxu1 %vm8629_vm1, %v8628_v40  ;;  %v8513_v18 = vld [vmem:[%s10028_s1 + $0x534] sm:$0xff]  }
 0x41b   :  { %7449 = vmatprep.subr.bf16.mxu1 %v8628_v40 }
 0x41c   :  { %v9256_v23 = vpop.f32.mrb[40].mxu1 }
 0x41d   :  { %v7397_v24 = vpop.f32.mrb[41].mxu1 }
 0x41e   :  { %7450 = vmatpush3.bf16.msra.mxu1 %v8488_v22  ;;  %v9261_v26 = vpop.f32.mrb[42].mxu1 }
 0x41f   :  { %7451 = vmatprep.subr.bf16.mxu1 %v8628_v40  ;;  %v2680_v27 = vpack.c.bf16 %v9261_v26, %v9256_v23  ;;  %v7398_v28 = vpop.f32.mrb[43].mxu1  ;;  %v6417_v26 = vld [vmem:[%s10029_s2 + $0x1] ss:$0 sm:$0xff] }
 0x422   :  { %7452 = vmatpush3.bf16.msra.mxu1 %v8489_v25 }
 0x423   :  { %7453 = vmatprep.subr.bf16.mxu1 %v8628_v40 }
 0x426   :  { %7454 = vmatpush3.bf16.msra.mxu1 %v8490_v29  ;;  %v6418_v29 = vld [vmem:[%s10029_s2 + $0x2] ss:$0 sm:$0xff] }
 0x427   :  { %7459 = vmatprep.subr.bf16.mxu1 %v8628_v40 }
 0x429   :  { %7456 = vmatmul.mubr.msk.bf16.vlgmr.msra.gmra.mrb[44].mxu1 %vm1438_vm0, %v2676_v63 }
 0x42a   :  { %7460 = vmatpush3.bf16.msra.mxu1 %v8491_v30  ;;  %7467 = vmatprep.mubr.msk.bf16.mxu1 %vm8629_vm1, %v8628_v40 }
 0x42b   :  { %7461 = vmatprep.subr.bf16.mxu1 %v8628_v40 }
 0x42e   :  { %7462 = vmatpush3.bf16.msra.mxu1 %v8492_v31 }
 0x42f   :  { %7463 = vmatprep.subr.bf16.mxu1 %v8628_v40 }
 0x432   :  { %7464 = vmatpush3.bf16.msra.mxu1 %v8493_v32 }
 0x433   :  { %7465 = vmatprep.subr.bf16.mxu1 %v8628_v40 }
 0x436   :  { %7466 = vmatpush3.bf16.msra.mxu1 %v8494_v33 }
 0x437   :  { %7471 = vmatprep.subr.bf16.mxu1 %v8628_v40 }
 0x439   :  { %7468 = vmatmul.mubr.msk.bf16.vlgmr.msra.gmra.mrb[44].mxu1 %vm1438_vm0, %v2677_v6 }
 0x43a   :  { %7472 = vmatpush3.bf16.msra.mxu1 %v8495_v34  ;;  %7479 = vmatprep.mubr.msk.bf16.mxu1 %vm8629_vm1, %v8628_v40 }
 0x43b   :  { %7473 = vmatprep.subr.bf16.mxu1 %v8628_v40 }
 0x43e   :  { %7474 = vmatpush3.bf16.msra.mxu1 %v8496_v35 }
 0x43f   :  { %7475 = vmatprep.subr.bf16.mxu1 %v8628_v40 }
 0x442   :  { %7476 = vmatpush3.bf16.msra.mxu1 %v8497_v36 }
 0x443   :  { %7477 = vmatprep.subr.bf16.mxu1 %v8628_v40 }
 0x446   :  { %7478 = vmatpush3.bf16.msra.mxu1 %v8498_v37 }
 0x447   :  { %7483 = vmatprep.subr.bf16.mxu1 %v8628_v40 }
 0x449   :  { %7480 = vmatmul.mubr.msk.bf16.vlgmr.msra.gmra.mrb[44].mxu1 %vm1438_vm0, %v2678_v13 }
 0x44a   :  { %7484 = vmatpush3.bf16.msra.mxu1 %v8499_v39  ;;  %7491 = vmatprep.mubr.msk.bf16.mxu1 %vm8629_vm1, %v8628_v40 }
 0x44b   :  { %7485 = vmatprep.subr.bf16.mxu1 %v8628_v40 }
 0x44e   :  { %7486 = vmatpush3.bf16.msra.mxu1 %v8500_v42  ;;  %v8507_v42 = vld [vmem:[%s10028_s1 + $0x4e8] sm:$0xff]  }
 0x44f   :  { %7487 = vmatprep.subr.bf16.mxu1 %v8628_v40 }
 0x452   :  { %7488 = vmatpush3.bf16.msra.mxu1 %v8501_v43  ;;  %v8508_v43 = vld [vmem:[%s10028_s1 + $0x4f0] sm:$0xff]  }
 0x453   :  { %7489 = vmatprep.subr.bf16.mxu1 %v8628_v40 }
 0x456   :  { %7490 = vmatpush3.bf16.msra.mxu1 %v8502_v45  ;;  %v8509_v45 = vld [vmem:[%s10028_s1 + $0x4f8] sm:$0xff]  }
 0x457   :  { %7495 = vmatprep.subr.bf16.mxu1 %v8628_v40 }
 0x459   :  { %7492 = vmatmul.mubr.msk.bf16.vlgmr.msra.gmra.mrb[44].mxu1 %vm1438_vm0, %v2679_v20 }
 0x45a   :  { %7496 = vmatpush3.bf16.msra.mxu1 %v8503_v46  ;;  %7503 = vmatprep.mubr.msk.bf16.mxu1 %vm8629_vm1, %v8628_v40  ;;  %v8510_v46 = vld [vmem:[%s10028_s1 + $0x500] sm:$0xff]  }
 0x45b   :  { %7497 = vmatprep.subr.bf16.mxu1 %v8628_v40 }
 0x45e   :  { %7498 = vmatpush3.bf16.msra.mxu1 %v8504_v47  ;;  %v8511_v47 = vld [vmem:[%s10028_s1 + $0x508] ss:$0 sps:$4 sm:$0xff]  }
 0x45f   :  { %7499 = vmatprep.subr.bf16.mxu1 %v8628_v40 }
 0x462   :  { %7500 = vmatpush3.bf16.msra.mxu1 %v8505_v48  ;;  %v8515_v48 = vld [vmem:[%s10028_s1 + $0x544] sm:$0xff]  }
 0x463   :  { %7501 = vmatprep.subr.bf16.mxu1 %v8628_v40 }
 0x466   :  { %7502 = vmatpush3.bf16.msra.mxu1 %v8506_v50 }
 0x467   :  { %7567 = vmatprep.subr.bf16.mxu1 %v8628_v40 }
 0x469   :  { %7504 = vmatmul.mubr.msk.bf16.vlgmr.msra.gmra.mrb[44].mxu1 %vm1438_vm0, %v2680_v27 }
 0x46a   :  { %7575 = vmatprep.mubr.msk.bf16.mxu1 %vm8629_vm1, %v8628_v40  ;;  %7568 = vmatpush3.bf16.msra.mxu1 %v8512_v17 }
 0x46b   :  { %7569 = vmatprep.subr.bf16.mxu1 %v8628_v40 }
 0x46e   :  { %7570 = vmatpush3.bf16.msra.mxu1 %v8513_v18 }
 0x46f   :  { %7571 = vmatprep.subr.bf16.mxu1 %v8628_v40 }
 0x472   :  { %7572 = vmatpush3.bf16.msra.mxu1 %v8514_v19 }
 0x473   :  { %7573 = vmatprep.subr.bf16.mxu1 %v8628_v40 }
 0x476   :  { %7574 = vmatpush3.bf16.msra.mxu1 %v8515_v48  ;;  %v8545_v48 = vld [vmem:[%s10028_s1 + $0x614] sm:$0xff]  }
 0x477   :  { %7579 = vmatprep.subr.bf16.mxu1 %v8628_v40 }
 0x53c   :  { %v3370_v51 = vpop.f32.mrb[44].mxu1 }
 0x53d   :  { %v7505_v52 = vpop.f32.mrb[45].mxu1  ;;  %v3397_v55 = vsel %vm1438_vm0, %v3370_v51, 0.0 }
 0x53e   :  { %v3373_v54 = vpop.f32.mrb[46].mxu1 }
 0x53f   :  { %v3398_v56 = vsel %vm1438_vm0, %v3373_v54, 0.0  ;;  %v7506_v57 = vpop.f32.mrb[47].mxu1 }
 0x540   :  { %v3399_v58 = vadd.f32 %v3398_v56, %v3397_v55  ;;  %v8516_v56 = vld [vmem:[%s10028_s1 + $0x50c] sm:$0xff]  }
 0x542   :  { %v3400_v59 = vrot.slane %v3399_v58, 4 }
 0x544   :  { %v3401_v60 = vadd.f32 %v3400_v59, %v3399_v58  ;;  %v9433_v58 = vld [vmem:[%s10028_s1 + $0x62c] sm:$0xff]   ;;  %v8517_v59 = vld [vmem:[%s10028_s1 + $0x514] sm:$0xff]  }
 0x546   :  { %v3402_v61 = vrot.slane %v3401_v60, 2 }
 0x548   :  { %v3403_v62 = vadd.f32 %v3402_v61, %v3401_v60 }
 0x54a   :  { %v3404_v63 = vrot.slane %v3403_v62, 1 }
 0x54c   :  { %v3405_v0 = vadd.f32 %v3404_v63, %v3403_v62  ;;  %v9445_v62 = vld [vmem:[%s10028_s1 + $0x634] sm:$0xff] }
 0x54e   :  { %7524 = vmatmul.mubr.msk.f32.vlgmr.msra.gmra.mrb[72].mxu0 %vm1438_vm0, %v3405_v0 }
 0x54f   :  { %8003 = vmatpush3.bf16.msra.mxu0 %v9149_v38  ;;  %7542 = vmatprep.mubr.msk.f32.mxu0 %vm8629_vm1, %v8628_v40  ;;  %v9369_v38 = vsub.s32 0, %v3481_v2  ;;  %v8518_v2 = vld [vmem:[%s10028_s1 + $0x51c] sm:$0xff]  }
 0x550   :  { %8004 = vmatprep.subr.bf16.mxu0 %v8630_v41 }
 0x553   :  { %8006 = vmatpush3.bf16.msra.mxu0 %v9163_v44 }
 0x554   :  { %8007 = vmatprep.subr.bf16.mxu0 %v8630_v41 }
 0x557   :  { %8009 = vmatpush3.bf16.msra.mxu0 %v9174_v49 }
 0x558   :  { %8010 = vmatprep.subr.bf16.mxu0 %v8630_v41 }
 0x55b   :  { %8012 = vmatpush3.bf16.msra.mxu0 %v9185_v53 }
 0x55c   :  { %7545 = vmatprep.subr.bf16.mxu0 %v8628_v40 }
 0x621   :  { %v3475_v3 = vpop.f32.mrb[72].mxu0 }
 0x622   :  { %v3479_v4 = vmul.f32 0.015625, %v3475_v3  ;;  %v7525_v5 = vpop.f32.mrb[73].mxu0  ;;  %v9456_v3 = vld [vmem:[%s10028_s1 + $0x63c] sm:$0xff] }
 0x624   :  { %v3483_v6 = vrot.slane %v3479_v4, %v9369_v38  ;;  %v8519_v4 = vld [vmem:[%s10028_s1 + $0x524] sm:$0xff]  }
 0x626   :  { %v3484_v44 = vsub.f32 %v3370_v51, %v3483_v6  ;;  %v3485_v7 = vsub.f32 %v3373_v54, %v3483_v6 }
 0x628   :  { %v3486_v8 = vmul.f32 %v3484_v44, %v3484_v44  ;;  %v3487_v9 = vmul.f32 %v3485_v7, %v3485_v7 }
 0x62a   :  { %v3488_v49 = vsel %vm1438_vm0, %v3486_v8, 0.0  ;;  %v3489_v10 = vsel %vm1438_vm0, %v3487_v9, 0.0  ;;  %v8520_v9 = vld [vmem:[%s10028_s1 + $0x54c] sm:$0xff]  }
 0x62b   :  { %v3490_v53 = vadd.f32 %v3489_v10, %v3488_v49  ;;  %v8521_v49 = vld [vmem:[%s10028_s1 + $0x554] sm:$0xff]  }
 0x62d   :  { %v3491_v11 = vrot.slane %v3490_v53, 4 }
 0x62f   :  { %v3492_v12 = vadd.f32 %v3491_v11, %v3490_v53 }
 0x631   :  { %v3493_v13 = vrot.slane %v3492_v12, 2 }
 0x633   :  { %v3494_v14 = vadd.f32 %v3493_v13, %v3492_v12 }
 0x635   :  { %v3495_v15 = vrot.slane %v3494_v14, 1 }
 0x637   :  { %v3496_v16 = vadd.f32 %v3495_v15, %v3494_v14  ;;  %v8522_v14 = vld [vmem:[%s10028_s1 + $0x55c] sm:$0xff]   ;;  %v8523_v15 = vld [vmem:[%s10028_s1 + $0x564] sm:$0xff]  }
 0x639   :  { %7543 = vmatmul.mubr.msk.f32.vlgmr.msra.gmra.mrb[74].mxu0 %vm1438_vm0, %v3496_v16 }
 0x63a   :  { %7547 = vmatprep.mubr.msk.bf16.mxu0 %vm8629_vm1, %v8628_v40 }
 0x70c   :  { %v3566_v20 = vpop.f32.mrb[74].mxu0 }
 0x70d   :  { %v3570_v21 = vmul.f32 0.015625, %v3566_v20  ;;  %v7544_v22 = vpop.f32.mrb[75].mxu0  ;;  %v8524_v20 = vld [vmem:[%s10028_s1 + $0x56c] sm:$0xff]  }
 0x70e   :  { %v8526_v22 = vld [vmem:[%s10028_s1 + $0x57c] sm:$0xff]  }
 0x70f   :  { %v3571_v23 = vadd.f32 1e-05, %v3570_v21  ;;  %v8525_v21 = vld [vmem:[%s10028_s1 + $0x574] sm:$0xff]  }
 0x711   :  { %8595 = vrsqrt.f32 %v3571_v23  ;;  %v8527_v23 = vld [vmem:[%s10028_s1 + $0x584] sm:$0xff]  }
 0x71b   :  { %v8596_v24 = vpop.eup %8595 }
 0x71c   :  { %v3576_v25 = vrot.slane %v8596_v24, %v9369_v38  ;;  %v8528_v24 = vld [vmem:[%s10028_s1 + $0x58c] sm:$0xff]  }
 0x71e   :  { %v3577_v27 = vmul.f32 %v3576_v25, %v3484_v44  ;;  %v3578_v28 = vmul.f32 %v3576_v25, %v3485_v7 }
 0x720   :  { %v3583_v30 = vmul.f32 %v6417_v26, %v3577_v27  ;;  %v3584_v31 = vmul.f32 %v6417_v26, %v3578_v28  ;;  %v8529_v26 = vld [vmem:[%s10028_s1 + $0x594] sm:$0xff]   ;;  %v8530_v27 = vld [vmem:[%s10028_s1 + $0x59c] sm:$0xff]   ;;  %v8531_v28 = vld [vmem:[%s10028_s1 + $0x5a4] sm:$0xff]  }
 0x722   :  { %v3589_v32 = vadd.f32 %v6418_v29, %v3583_v30  ;;  %v3590_v33 = vadd.f32 %v6418_v29, %v3584_v31  ;;  %v8532_v29 = vld [vmem:[%s10028_s1 + $0x5ac] sm:$0xff]   ;;  %v8533_v30 = vld [vmem:[%s10028_s1 + $0x5b4] sm:$0xff]   ;;  %v8534_v31 = vld [vmem:[%s10028_s1 + $0x5bc] sm:$0xff]  }
 0x724   :  { %vm3591_vm10 = vcmp.ge.f32.partialorder %v3589_v32, 0.0  ;;  %vm3592_vm11 = vcmp.ge.f32.partialorder %v3590_v33, 0.0  ;;  %v3593_v34 = vmul.f32 0.2, %v3589_v32  ;;  %v3594_v35 = vmul.f32 0.2, %v3590_v33 }
 0x726   :  { %v3595_v36 = vsel %vm3591_vm10, %v3589_v32, %v3593_v34  ;;  %v3596_v37 = vsel %vm3592_vm11, %v3590_v33, %v3594_v35  ;;  %v8535_v32 = vld [vmem:[%s10028_s1 + $0x5c4] sm:$0xff]   ;;  %v8536_v33 = vld [vmem:[%s10028_s1 + $0x5cc] sm:$0xff]   ;;  %v8537_v35 = vld [vmem:[%s10028_s1 + $0x5d4] sm:$0xff]  }
 0x727   :  { %v3597_v39 = vpack.c.bf16 %v3596_v37, %v3595_v36  ;;  %v8538_v36 = vld [vmem:[%s10028_s1 + $0x5dc] sm:$0xff]   ;;  %v8539_v37 = vld [vmem:[%s10028_s1 + $0x5e4] sm:$0xff]  }
 0x729   :  { %7546 = vmatpush3.bf16.msra.mxu0 %v3597_v39  ;;  %v8540_v39 = vld [vmem:[%s10028_s1 + $0x5ec] sm:$0xff]  }
 0x72a   :  { %8013 = vmatprep.subr.bf16.mxu0 %v8630_v41 }
 0x72c   :  { %7548 = vmatmul.mubr.msk.bf16.vlgmr.msra.gmra.mrb[76].mxu0 %vm3630_vm12, %v8507_v42  ;;  %v8541_v42 = vld [vmem:[%s10028_s1 + $0x5f4] sm:$0xff]  }
 0x72d   :  { %7551 = vmatprep.mubr.msk.bf16.mxu0 %vm8629_vm1, %v8628_v40  ;;  %8015 = vmatpush3.bf16.msra.mxu0 %v9433_v58 }
 0x72e   :  { %8016 = vmatprep.subr.bf16.mxu0 %v8630_v41 }
 0x731   :  { %8018 = vmatpush3.bf16.msra.mxu0 %v9445_v62 }
 0x732   :  { %8019 = vmatprep.subr.bf16.mxu0 %v8630_v41 }
 0x734   :  { %7552 = vmatmul.mubr.msk.bf16.gmra.mrb[80].mxu0 %vm3630_vm12, %v8508_v43  ;;  %v8542_v43 = vld [vmem:[%s10028_s1 + $0x5fc] sm:$0xff]  }
 0x735   :  { %7555 = vmatprep.mubr.msk.bf16.mxu0 %vm8629_vm1, %v8628_v40  ;;  %8021 = vmatpush3.bf16.msra.mxu0 %v9456_v3 }
 0x736   :  { %8022 = vmatprep.subr.bf16.mxu0 %v8630_v41 }
 0x73c   :  { %7556 = vmatmul.mubr.msk.bf16.gmra.mrb[84].mxu0 %vm3630_vm12, %v8509_v45  ;;  %v8543_v45 = vld [vmem:[%s10028_s1 + $0x604] sm:$0xff]  }
 0x73d   :  { %7559 = vmatprep.mubr.msk.bf16.mxu0 %vm8629_vm1, %v8628_v40 }
 0x744   :  { %7560 = vmatmul.mubr.msk.bf16.gmra.mrb[88].mxu0 %vm3630_vm12, %v8510_v46  ;;  %v8544_v46 = vld [vmem:[%s10028_s1 + $0x60c] sm:$0xff]  }
 0x745   :  { %7563 = vmatprep.mubr.msk.bf16.mxu0 %vm8629_vm1, %v8628_v40 }
 0x74c   :  { %7564 = vmatmul.mubr.msk.bf16.gmra.mrb[92].mxu0 %vm3630_vm12, %v8511_v47 }
 0x74d   :  { %7691 = vmatprep.mubr.msk.f32.mxu0 %vm8629_vm1, %v8628_v40 }
 0x7ff   :  { %v3680_v50 = vpop.f32.mrb[76].mxu0 }
 0x800   :  { %v7549_v51 = vpop.f32.mrb[77].mxu0 }
 0x801   :  { %v3683_v52 = vpop.f32.mrb[78].mxu0  ;;  %v8547_v51 = vld [vmem:[%s10028_s1 + $0x624] sm:$0xff]  }
 0x802   :  { %v3718_v54 = vpack.c.bf16 %v3683_v52, %v3680_v50  ;;  %v7550_v55 = vpop.f32.mrb[79].mxu0  ;;  %v8546_v50 = vld [vmem:[%s10028_s1 + $0x61c] sm:$0xff]  }
 0x804   :  { %v3740_v57 = vrot.slane %v3718_v54, 4 }
 0x806   :  { %7576 = vmatmul.mubr.msk.bf16.vlgmr.msra.gmra.mrb[48].mxu1 %vm1438_vm0, %v3740_v57 }
 0x807   :  { %7580 = vmatpush3.bf16.msra.mxu1 %v8516_v56  ;;  %7587 = vmatprep.mubr.msk.bf16.mxu1 %vm8629_vm1, %v8628_v40  ;;  %v3688_v60 = vpop.f32.mrb[80].mxu0 }
 0x808   :  { %7581 = vmatprep.subr.bf16.mxu1 %v8628_v40  ;;  %v7553_v61 = vpop.f32.mrb[81].mxu0 }
 0x809   :  { %v3691_v63 = vpop.f32.mrb[82].mxu0 }
 0x80a   :  { %v3719_v0 = vpack.c.bf16 %v3691_v63, %v3688_v60  ;;  %v7554_v1 = vpop.f32.mrb[83].mxu0 }
 0x80b   :  { %7582 = vmatpush3.bf16.msra.mxu1 %v8517_v59 }
 0x80c   :  { %7583 = vmatprep.subr.bf16.mxu1 %v8628_v40  ;;  %v3960_v25 = vrot.slane %v3719_v0, 4 }
 0x80f   :  { %7584 = vmatpush3.bf16.msra.mxu1 %v8518_v2  ;;  %v3696_v5 = vpop.f32.mrb[84].mxu0 }
 0x810   :  { %7585 = vmatprep.subr.bf16.mxu1 %v8628_v40  ;;  %v7557_v6 = vpop.f32.mrb[85].mxu0 }
 0x811   :  { %v3699_v44 = vpop.f32.mrb[86].mxu0 }
 0x812   :  { %v9465_v7 = vpack.c.bf16 %v3699_v44, %v3696_v5  ;;  %v7558_v8 = vpop.f32.mrb[87].mxu0 }
 0x813   :  { %7586 = vmatpush3.bf16.msra.mxu1 %v8519_v4 }
 0x814   :  { %7591 = vmatprep.subr.bf16.mxu1 %v8628_v40  ;;  %v4114_v34 = vrot.slane %v9465_v7, 4 }
 0x816   :  { %7588 = vmatmul.mubr.msk.bf16.vlgmr.msra.gmra.mrb[48].mxu1 %vm1438_vm0, %v3718_v54  ;;  %v8603_v54 = vld [vmem:[%s10028_s1 + $0x644] sm:$0xff] }
 0x817   :  { %7592 = vmatpush3.bf16.msra.mxu1 %v8520_v9  ;;  %7599 = vmatprep.mubr.msk.bf16.mxu1 %vm8629_vm1, %v8628_v40  ;;  %v3704_v10 = vpop.f32.mrb[88].mxu0 }
 0x818   :  { %7593 = vmatprep.subr.bf16.mxu1 %v8628_v40  ;;  %v7561_v53 = vpop.f32.mrb[89].mxu0  ;;  %8024 = vmatpush3.bf16.msra.mxu0 %v8603_v54 }
 0x819   :  { %v3707_v11 = vpop.f32.mrb[90].mxu0  ;;  %8025 = vmatprep.subr.bf16.mxu0 %v8630_v41 }
 0x81a   :  { %v9478_v12 = vpack.c.bf16 %v3707_v11, %v3704_v10  ;;  %v7562_v13 = vpop.f32.mrb[91].mxu0 }
 0x81b   :  { %7594 = vmatpush3.bf16.msra.mxu1 %v8521_v49 }
 0x81c   :  { %7595 = vmatprep.subr.bf16.mxu1 %v8628_v40  ;;  %v4268_v47 = vrot.slane %v9478_v12, 4 }
 0x81f   :  { %7596 = vmatpush3.bf16.msra.mxu1 %v8522_v14  ;;  %v9487_v16 = vpop.f32.mrb[92].mxu0 }
 0x820   :  { %7597 = vmatprep.subr.bf16.mxu1 %v8628_v40  ;;  %v7565_v17 = vpop.f32.mrb[93].mxu0  ;;  %v3722_v52 = vpack.c.bf16 %v9487_v16, %v9487_v16 }
 0x821   :  { %v3715_v18 = vpop.f32.mrb[94].mxu0 }
 0x822   :  { %v7566_v19 = vpop.f32.mrb[95].mxu0  ;;  %v6476_v18 = vld [vmem:[%s10029_s2 + $0x3] ss:$0 sm:$0xff] }
 0x823   :  { %7598 = vmatpush3.bf16.msra.mxu1 %v8523_v15 }
 0x824   :  { %7603 = vmatprep.subr.bf16.mxu1 %v8628_v40 }
 0x826   :  { %7600 = vmatmul.mubr.msk.bf16.vlgmr.msra.gmra.mrb[48].mxu1 %vm1438_vm0, %v3719_v0 }
 0x827   :  { %7604 = vmatpush3.bf16.msra.mxu1 %v8524_v20  ;;  %7611 = vmatprep.mubr.msk.bf16.mxu1 %vm8629_vm1, %v8628_v40  ;;  %v6477_v20 = vld [vmem:[%s10029_s2 + $0x4] ss:$0 sm:$0xff] }
 0x828   :  { %7605 = vmatprep.subr.bf16.mxu1 %v8628_v40 }
 0x82b   :  { %7606 = vmatpush3.bf16.msra.mxu1 %v8525_v21 }
 0x82c   :  { %7607 = vmatprep.subr.bf16.mxu1 %v8628_v40 }
 0x82f   :  { %7608 = vmatpush3.bf16.msra.mxu1 %v8526_v22 }
 0x830   :  { %7609 = vmatprep.subr.bf16.mxu1 %v8628_v40 }
 0x833   :  { %7610 = vmatpush3.bf16.msra.mxu1 %v8527_v23 }
 0x834   :  { %7615 = vmatprep.subr.bf16.mxu1 %v8628_v40 }
 0x836   :  { %7612 = vmatmul.mubr.msk.bf16.vlgmr.msra.gmra.mrb[48].mxu1 %vm1438_vm0, %v3960_v25 }
 0x837   :  { %7616 = vmatpush3.bf16.msra.mxu1 %v8528_v24  ;;  %7623 = vmatprep.mubr.msk.bf16.mxu1 %vm8629_vm1, %v8628_v40 }
 0x838   :  { %7617 = vmatprep.subr.bf16.mxu1 %v8628_v40 }
 0x83b   :  { %7618 = vmatpush3.bf16.msra.mxu1 %v8529_v26 }
 0x83c   :  { %7619 = vmatprep.subr.bf16.mxu1 %v8628_v40 }
 0x83f   :  { %7620 = vmatpush3.bf16.msra.mxu1 %v8530_v27  ;;  %v8549_v27 = vld [vmem:[%s10028_s1 + $0x64c] sm:$0xff]  }
 0x840   :  { %7621 = vmatprep.subr.bf16.mxu1 %v8628_v40 }
 0x843   :  { %7622 = vmatpush3.bf16.msra.mxu1 %v8531_v28  ;;  %v8554_v28 = vld [vmem:[%s10028_s1 + $0x690] sm:$0xff]  }
 0x844   :  { %7627 = vmatprep.subr.bf16.mxu1 %v8628_v40 }
 0x846   :  { %7624 = vmatmul.mubr.msk.bf16.vlgmr.msra.gmra.mrb[48].mxu1 %vm1438_vm0, %v9465_v7 }
 0x847   :  { %7628 = vmatpush3.bf16.msra.mxu1 %v8532_v29  ;;  %7635 = vmatprep.mubr.msk.bf16.mxu1 %vm8629_vm1, %v8628_v40  ;;  %v8555_v29 = vld [vmem:[%s10028_s1 + $0x698] sm:$0xff]  }
 0x848   :  { %7629 = vmatprep.subr.bf16.mxu1 %v8628_v40 }
 0x84b   :  { %7630 = vmatpush3.bf16.msra.mxu1 %v8533_v30  ;;  %v8550_v30 = vld [vmem:[%s10028_s1 + $0x654] sm:$0xff]  }
 0x84c   :  { %7631 = vmatprep.subr.bf16.mxu1 %v8628_v40 }
 0x84f   :  { %7632 = vmatpush3.bf16.msra.mxu1 %v8534_v31  ;;  %v8556_v31 = vld [vmem:[%s10028_s1 + $0x6a0] sm:$0xff]  }
 0x850   :  { %7633 = vmatprep.subr.bf16.mxu1 %v8628_v40 }
 0x853   :  { %7634 = vmatpush3.bf16.msra.mxu1 %v8535_v32  ;;  %v8557_v32 = vld [vmem:[%s10028_s1 + $0x6a8] sm:$0xff]  }
 0x854   :  { %7639 = vmatprep.subr.bf16.mxu1 %v8628_v40 }
 0x856   :  { %7636 = vmatmul.mubr.msk.bf16.vlgmr.msra.gmra.mrb[48].mxu1 %vm1438_vm0, %v4114_v34  ;;  %v8552_v34 = vld [vmem:[%s10028_s1 + $0x664] sm:$0xff]  }
 0x857   :  { %7640 = vmatpush3.bf16.msra.mxu1 %v8536_v33  ;;  %7647 = vmatprep.mubr.msk.bf16.mxu1 %vm8629_vm1, %v8628_v40  ;;  %v8551_v33 = vld [vmem:[%s10028_s1 + $0x65c] sm:$0xff]  }
 0x858   :  { %7641 = vmatprep.subr.bf16.mxu1 %v8628_v40 }
 0x85b   :  { %7642 = vmatpush3.bf16.msra.mxu1 %v8537_v35  ;;  %v8553_v35 = vld [vmem:[%s10028_s1 + $0x66c] ss:$0 sps:$4 sm:$0xff]  }
 0x85c   :  { %7643 = vmatprep.subr.bf16.mxu1 %v8628_v40 }
 0x85f   :  { %7644 = vmatpush3.bf16.msra.mxu1 %v8538_v36 }
 0x860   :  { %7645 = vmatprep.subr.bf16.mxu1 %v8628_v40 }
 0x863   :  { %7646 = vmatpush3.bf16.msra.mxu1 %v8539_v37 }
 0x864   :  { %7651 = vmatprep.subr.bf16.mxu1 %v8628_v40 }
 0x866   :  { %7648 = vmatmul.mubr.msk.bf16.vlgmr.msra.gmra.mrb[48].mxu1 %vm1438_vm0, %v9478_v12 }
 0x867   :  { %7652 = vmatpush3.bf16.msra.mxu1 %v8540_v39  ;;  %7659 = vmatprep.mubr.msk.bf16.mxu1 %vm8629_vm1, %v8628_v40 }
 0x868   :  { %7653 = vmatprep.subr.bf16.mxu1 %v8628_v40 }
 0x86b   :  { %7654 = vmatpush3.bf16.msra.mxu1 %v8541_v42 }
 0x86c   :  { %7655 = vmatprep.subr.bf16.mxu1 %v8628_v40 }
 0x86f   :  { %7656 = vmatpush3.bf16.msra.mxu1 %v8542_v43 }
 0x870   :  { %7657 = vmatprep.subr.bf16.mxu1 %v8628_v40 }
 0x873   :  { %7658 = vmatpush3.bf16.msra.mxu1 %v8543_v45  ;;  %v8558_v45 = vld [vmem:[%s10028_s1 + $0x670] sm:$0xff]  }
 0x874   :  { %7663 = vmatprep.subr.bf16.mxu1 %v8628_v40 }
 0x876   :  { %7660 = vmatmul.mubr.msk.bf16.vlgmr.msra.gmra.mrb[48].mxu1 %vm1438_vm0, %v4268_v47  ;;  %v9696_v47 = vld [vmem:[%s10028_s1 + $0x790] sm:$0xff]  }
 0x877   :  { %7664 = vmatpush3.bf16.msra.mxu1 %v8544_v46  ;;  %7671 = vmatprep.mubr.msk.bf16.mxu1 %vm8629_vm1, %v8628_v40 }
 0x878   :  { %7665 = vmatprep.subr.bf16.mxu1 %v8628_v40 }
 0x87b   :  { %7666 = vmatpush3.bf16.msra.mxu1 %v8545_v48  ;;  %v8559_v48 = vld [vmem:[%s10028_s1 + $0x678] sm:$0xff]  }
 0x87c   :  { %7667 = vmatprep.subr.bf16.mxu1 %v8628_v40 }
 0x87f   :  { %7668 = vmatpush3.bf16.msra.mxu1 %v8546_v50 }
 0x880   :  { %7669 = vmatprep.subr.bf16.mxu1 %v8628_v40 }
 0x883   :  { %7670 = vmatpush3.bf16.msra.mxu1 %v8547_v51 }
 0x884   :  { %8037 = vmatprep.subr.bf16.mxu1 %v8630_v41 }
 0x886   :  { %7672 = vmatmul.mubr.msk.bf16.vlgmr.msra.gmra.mrb[48].mxu1 %vm1438_vm0, %v3722_v52 }
 0x887   :  { %7875 = vmatprep.mubr.msk.f32.mxu1 %vm8629_vm1, %v8628_v40  ;;  %8039 = vmatpush3.bf16.msra.mxu1 %v9696_v47 }
 0x888   :  { %8040 = vmatprep.subr.bf16.mxu1 %v8630_v41 }
 0x959   :  { %v4406_v55 = vpop.f32.mrb[48].mxu1 }
 0x95a   :  { %v4431_v56 = vsel %vm1438_vm0, %v4406_v55, 0.0  ;;  %v7673_v57 = vpop.f32.mrb[49].mxu1 }
 0x95b   :  { %v4432_v59 = vrot.slane %v4431_v56, 4  ;;  %v4409_v60 = vpop.f32.mrb[50].mxu1  ;;  %v8560_v57 = vld [vmem:[%s10028_s1 + $0x680] sm:$0xff]  }
 0x95c   :  { %v7674_v61 = vpop.f32.mrb[51].mxu1  ;;  %v8561_v60 = vld [vmem:[%s10028_s1 + $0x688] sm:$0xff]  }
 0x95d   :  { %v4433_v63 = vadd.f32 %v4432_v59, %v4431_v56  ;;  %v9722_v59 = vld [vmem:[%s10028_s1 + $0x7a0] sm:$0xff]  }
 0x95f   :  { %v4434_v0 = vrot.slane %v4433_v63, 2 }
 0x961   :  { %v4435_v1 = vadd.f32 %v4434_v0, %v4433_v63 }
 0x963   :  { %v4436_v2 = vrot.slane %v4435_v1, 1 }
 0x965   :  { %v4437_v4 = vadd.f32 %v4436_v2, %v4435_v1  ;;  %v9733_v1 = vld [vmem:[%s10028_s1 + $0x7a8] sm:$0xff]  }
 0x967   :  { %7692 = vmatmul.mubr.msk.f32.vlgmr.msra.gmra.mrb[96].mxu0 %vm1438_vm0, %v4437_v4 }
 0x968   :  { %8027 = vmatpush3.bf16.msra.mxu0 %v9433_v58  ;;  %7710 = vmatprep.mubr.msk.f32.mxu0 %vm8629_vm1, %v8628_v40 }
 0x969   :  { %8028 = vmatprep.subr.bf16.mxu0 %v8630_v41 }
 0x96c   :  { %8030 = vmatpush3.bf16.msra.mxu0 %v9445_v62 }
 0x96d   :  { %8031 = vmatprep.subr.bf16.mxu0 %v8630_v41 }
 0x970   :  { %8033 = vmatpush3.bf16.msra.mxu0 %v9456_v3 }
 0x971   :  { %8034 = vmatprep.subr.bf16.mxu0 %v8630_v41 }
 0x974   :  { %8036 = vmatpush3.bf16.msra.mxu0 %v8603_v54  ;;  %v9709_v54 = vld [vmem:[%s10028_s1 + $0x798] sm:$0xff]  }
 0x975   :  { %7713 = vmatprep.subr.bf16.mxu0 %v8628_v40  ;;  %8042 = vmatpush3.bf16.msra.mxu1 %v9709_v54 }
 0x976   :  { %8043 = vmatprep.subr.bf16.mxu1 %v8630_v41 }
 0x979   :  { %8045 = vmatpush3.bf16.msra.mxu1 %v9722_v59 }
 0x97a   :  { %8046 = vmatprep.subr.bf16.mxu1 %v8630_v41 }
 0x97d   :  { %8048 = vmatpush3.bf16.msra.mxu1 %v9733_v1 }
 0x97e   :  { %8049 = vmatprep.subr.bf16.mxu1 %v8630_v41 }
 0xa3a   :  { %v4507_v5 = vpop.f32.mrb[96].mxu0 }
 0xa3b   :  { %v4511_v6 = vmul.f32 0.0625, %v4507_v5  ;;  %v7693_v44 = vpop.f32.mrb[97].mxu0  ;;  %v8562_v5 = vld [vmem:[%s10028_s1 + $0x6b0] sm:$0xff]  }
 0xa3c   :  { %v8563_v44 = vld [vmem:[%s10028_s1 + $0x6b8] sm:$0xff]  }
 0xa3d   :  { %v4515_v58 = vrot.slane %v4511_v6, %v9369_v38  ;;  %v9746_v6 = vld [vmem:[%s10028_s1 + $0x7b0] sm:$0xff]  }
 0xa3e   :  { %8051 = vmatpush3.bf16.msra.mxu1 %v9746_v6 }
 0xa3f   :  { %v4516_v7 = vsub.f32 %v4406_v55, %v4515_v58  ;;  %8052 = vmatprep.subr.bf16.mxu1 %v8630_v41 }
 0xa41   :  { %v4517_v8 = vmul.f32 %v4516_v7, %v4516_v7 }
 0xa43   :  { %v4518_v9 = vsel %vm1438_vm0, %v4517_v8, 0.0 }
 0xa44   :  { %v4519_v49 = vrot.slane %v4518_v9, 4 }
 0xa46   :  { %v4520_v62 = vadd.f32 %v4519_v49, %v4518_v9 }
 0xa48   :  { %v4521_v10 = vrot.slane %v4520_v62, 2 }
 0xa4a   :  { %v4522_v53 = vadd.f32 %v4521_v10, %v4520_v62  ;;  %v8564_v62 = vld [vmem:[%s10028_s1 + $0x6c0] sm:$0xff]   ;;  %v8565_v10 = vld [vmem:[%s10028_s1 + $0x6c8] sm:$0xff]  }
 0xa4c   :  { %v4523_v11 = vrot.slane %v4522_v53, 1 }
 0xa4e   :  { %v4524_v3 = vadd.f32 %v4523_v11, %v4522_v53 }
 0xa50   :  { %7711 = vmatmul.mubr.msk.f32.vlgmr.msra.gmra.mrb[98].mxu0 %vm1438_vm0, %v4524_v3 }
 0xa51   :  { %7715 = vmatprep.mubr.msk.bf16.mxu0 %vm8629_vm1, %v8628_v40 }
 0xb23   :  { %v4594_v12 = vpop.f32.mrb[98].mxu0 }
 0xb24   :  { %v4598_v13 = vmul.f32 0.0625, %v4594_v12  ;;  %v7712_v14 = vpop.f32.mrb[99].mxu0 }
 0xb25   :  { %v8567_v14 = vld [vmem:[%s10028_s1 + $0x6d8] sm:$0xff]  }
 0xb26   :  { %v4599_v15 = vadd.f32 1e-05, %v4598_v13  ;;  %v8566_v13 = vld [vmem:[%s10028_s1 + $0x6d0] sm:$0xff]  }
 0xb28   :  { %8597 = vrsqrt.f32 %v4599_v15  ;;  %v8568_v15 = vld [vmem:[%s10028_s1 + $0x6e0] sm:$0xff]  }
 0xb32   :  { %v8598_v16 = vpop.eup %8597 }
 0xb33   :  { %v4604_v17 = vrot.slane %v8598_v16, %v9369_v38  ;;  %v8569_v16 = vld [vmem:[%s10028_s1 + $0x6e8] sm:$0xff]  }
 0xb35   :  { %v4605_v19 = vmul.f32 %v4604_v17, %v4516_v7  ;;  %v8570_v17 = vld [vmem:[%s10028_s1 + $0x6f0] sm:$0xff]  }
 0xb37   :  { %v4610_v21 = vmul.f32 %v6476_v18, %v4605_v19  ;;  %v8571_v19 = vld [vmem:[%s10028_s1 + $0x6f8] sm:$0xff]  }
 0xb39   :  { %v4615_v22 = vadd.f32 %v6477_v20, %v4610_v21  ;;  %v8572_v20 = vld [vmem:[%s10028_s1 + $0x700] sm:$0xff]   ;;  %v8573_v21 = vld [vmem:[%s10028_s1 + $0x708] sm:$0xff]  }
 0xb3b   :  { %vm4616_vm13 = vcmp.ge.f32.partialorder %v4615_v22, 0.0  ;;  %v4617_v23 = vmul.f32 0.2, %v4615_v22 }
 0xb3d   :  { %v4618_v24 = vsel %vm4616_vm13, %v4615_v22, %v4617_v23  ;;  %v8574_v22 = vld [vmem:[%s10028_s1 + $0x710] sm:$0xff]   ;;  %v8575_v23 = vld [vmem:[%s10028_s1 + $0x718] sm:$0xff]  }
 0xb3e   :  { %v4619_v25 = vpack.c.bf16 %v4618_v24, %v4618_v24  ;;  %v8576_v24 = vld [vmem:[%s10028_s1 + $0x720] sm:$0xff]  }
 0xb40   :  { %v4670_v26 = vsel %vm4668_vm14, %v4619_v25, 0  ;;  %v8577_v25 = vld [vmem:[%s10028_s1 + $0x728] sm:$0xff]  }
 0xb41   :  { %7714 = vmatpush3.bf16.msra.mxu0 %v4670_v26  ;;  %v8578_v26 = vld [vmem:[%s10028_s1 + $0x730] sm:$0xff]  }
 0xb42   :  { %7735 = vmatprep.subr.bf16.mxu0 %v8628_v40 }
 0xb44   :  { %7716 = vmatmul.mubr.msk.bf16.vlgmr.msra.gmra.mrb[100].mxu0 %vm4652_vm15, %v8549_v27 }
 0xb45   :  { %7719 = vmatprep.mubr.msk.bf16.mxu0 %vm8629_vm1, %v8628_v40  ;;  %7736 = vmatpush3.bf16.msra.mxu0 %v8554_v28  ;;  %v8579_v28 = vld [vmem:[%s10028_s1 + $0x738] sm:$0xff]  }
 0xb46   :  { %7737 = vmatprep.subr.bf16.mxu0 %v8628_v40 }
 0xb49   :  { %7738 = vmatpush3.bf16.msra.mxu0 %v8555_v29  ;;  %v8580_v29 = vld [vmem:[%s10028_s1 + $0x740] sm:$0xff]  }
 0xb4a   :  { %7739 = vmatprep.subr.bf16.mxu0 %v8628_v40 }
 0xb4c   :  { %7720 = vmatmul.mubr.msk.bf16.gmra.mrb[104].mxu0 %vm4652_vm15, %v8550_v30  ;;  %v8581_v30 = vld [vmem:[%s10028_s1 + $0x748] sm:$0xff]  }
 0xb4d   :  { %7723 = vmatprep.mubr.msk.bf16.mxu0 %vm8629_vm1, %v8628_v40  ;;  %7740 = vmatpush3.bf16.msra.mxu0 %v8556_v31  ;;  %v8582_v31 = vld [vmem:[%s10028_s1 + $0x750] sm:$0xff]  }
 0xb4e   :  { %7741 = vmatprep.subr.bf16.mxu0 %v8628_v40 }
 0xb51   :  { %7742 = vmatpush3.bf16.msra.mxu0 %v8557_v32  ;;  %v8583_v32 = vld [vmem:[%s10028_s1 + $0x758] sm:$0xff]  }
 0xb52   :  { %7747 = vmatprep.subr.bf16.mxu0 %v8628_v40 }
 0xb54   :  { %7724 = vmatmul.mubr.msk.bf16.gmra.mrb[108].mxu0 %vm4652_vm15, %v8551_v33  ;;  %v8584_v33 = vld [vmem:[%s10028_s1 + $0x760] sm:$0xff]  }
 0xb55   :  { %7727 = vmatprep.mubr.msk.bf16.mxu0 %vm8629_vm1, %v8628_v40 }
 0xb5c   :  { %7728 = vmatmul.mubr.msk.bf16.gmra.mrb[112].mxu0 %vm4652_vm15, %v8552_v34  ;;  %v8585_v34 = vld [vmem:[%s10028_s1 + $0x768] sm:$0xff]  }
 0xb5d   :  { %7731 = vmatprep.mubr.msk.bf16.mxu0 %vm8629_vm1, %v8628_v40 }
 0xb64   :  { %7732 = vmatmul.mubr.msk.bf16.gmra.mrb[116].mxu0 %vm4652_vm15, %v8553_v35  ;;  %v8586_v35 = vld [vmem:[%s10028_s1 + $0x770] sm:$0xff]  }
 0xb65   :  { %7743 = vmatprep.mubr.msk.bf16.mxu0 %vm8629_vm1, %v8628_v40 }
 0xc17   :  { %v4706_v36 = vpop.f32.mrb[100].mxu0 }
 0xc18   :  { %v7717_v37 = vpop.f32.mrb[101].mxu0 }
 0xc19   :  { %v4709_v39 = vpop.f32.mrb[102].mxu0  ;;  %v8587_v37 = vld [vmem:[%s10028_s1 + $0x778] sm:$0xff]  }
 0xc1a   :  { %v4744_v42 = vpack.c.bf16 %v4709_v39, %v4706_v36  ;;  %v7718_v43 = vpop.f32.mrb[103].mxu0  ;;  %v8588_v39 = vld [vmem:[%s10028_s1 + $0x780] sm:$0xff]  }
 0xc1c   :  { %v4766_v46 = vrot.slane %v4744_v42, 4 }
 0xc1e   :  { %7744 = vmatmul.mubr.msk.bf16.vlgmr.msra.gmra.mrb[120].mxu0 %vm1438_vm0, %v4766_v46  ;;  %v6619_v46 = vld [vmem:[%s10028_s1 + $0x7c0] sm:$0xff]  }
 0xc1f   :  { %7748 = vmatpush3.bf16.msra.mxu0 %v8558_v45  ;;  %7755 = vmatprep.mubr.msk.bf16.mxu0 %vm8629_vm1, %v8628_v40  ;;  %v4714_v50 = vpop.f32.mrb[104].mxu0  ;;  %v6618_v45 = vld [vmem:[%s10028_s1 + $0x7b8] sm:$0xff]  }
 0xc20   :  { %7749 = vmatprep.subr.bf16.mxu0 %v8628_v40  ;;  %v7721_v51 = vpop.f32.mrb[105].mxu0  ;;  %8054 = vmatpush3.bf16.msra.mxu1 %v6618_v45 }
 0xc21   :  { %v4717_v52 = vpop.f32.mrb[106].mxu0  ;;  %8055 = vmatprep.subr.bf16.mxu1 %v8630_v41 }
 0xc22   :  { %v9711_v55 = vpack.c.bf16 %v4717_v52, %v4714_v50  ;;  %v7722_v56 = vpop.f32.mrb[107].mxu0 }
 0xc23   :  { %7750 = vmatpush3.bf16.msra.mxu0 %v8559_v48  ;;  %v6620_v48 = vld [vmem:[%s10028_s1 + $0x7c8] sm:$0xff]  }
 0xc24   :  { %7751 = vmatprep.subr.bf16.mxu0 %v8628_v40  ;;  %v4986_v18 = vrot.slane %v9711_v55, 4  ;;  %8057 = vmatpush3.bf16.msra.mxu1 %v6619_v46 }
 0xc25   :  { %8058 = vmatprep.subr.bf16.mxu1 %v8630_v41 }
 0xc27   :  { %7752 = vmatpush3.bf16.msra.mxu0 %v8560_v57  ;;  %v4722_v61 = vpop.f32.mrb[108].mxu0 }
 0xc28   :  { %7753 = vmatprep.subr.bf16.mxu0 %v8628_v40  ;;  %v7725_v63 = vpop.f32.mrb[109].mxu0  ;;  %8060 = vmatpush3.bf16.msra.mxu1 %v6620_v48 }
 0xc29   :  { %v4725_v0 = vpop.f32.mrb[110].mxu0  ;;  %8061 = vmatprep.subr.bf16.mxu1 %v8630_v41 }
 0xc2a   :  { %v9735_v2 = vpack.c.bf16 %v4725_v0, %v4722_v61  ;;  %v7726_v4 = vpop.f32.mrb[111].mxu0 }
 0xc2b   :  { %7754 = vmatpush3.bf16.msra.mxu0 %v8561_v60 }
 0xc2c   :  { %7759 = vmatprep.subr.bf16.mxu0 %v8628_v40  ;;  %v5140_v27 = vrot.slane %v9735_v2, 4 }
 0xc2e   :  { %7756 = vmatmul.mubr.msk.bf16.vlgmr.msra.gmra.mrb[120].mxu0 %vm1438_vm0, %v4744_v42  ;;  %v8589_v42 = vld [vmem:[%s10028_s1 + $0x788] sm:$0xff]  }
 0xc2f   :  { %7760 = vmatpush3.bf16.msra.mxu0 %v8562_v5  ;;  %7767 = vmatprep.mubr.msk.bf16.mxu0 %vm8629_vm1, %v8628_v40  ;;  %v4730_v58 = vpop.f32.mrb[112].mxu0 }
 0xc30   :  { %7761 = vmatprep.subr.bf16.mxu0 %v8628_v40  ;;  %v7729_v7 = vpop.f32.mrb[113].mxu0 }
 0xc31   :  { %v4733_v8 = vpop.f32.mrb[114].mxu0 }
 0xc32   :  { %v9757_v9 = vpack.c.bf16 %v4733_v8, %v4730_v58  ;;  %v7730_v49 = vpop.f32.mrb[115].mxu0 }
 0xc33   :  { %7762 = vmatpush3.bf16.msra.mxu0 %v8563_v44 }
 0xc34   :  { %7763 = vmatprep.subr.bf16.mxu0 %v8628_v40  ;;  %v5294_v36 = vrot.slane %v9757_v9, 4 }
 0xc37   :  { %7764 = vmatpush3.bf16.msra.mxu0 %v8564_v62  ;;  %v9766_v53 = vpop.f32.mrb[116].mxu0 }
 0xc38   :  { %7765 = vmatprep.subr.bf16.mxu0 %v8628_v40  ;;  %v7733_v11 = vpop.f32.mrb[117].mxu0  ;;  %v4748_v43 = vpack.c.bf16 %v9766_v53, %v9766_v53 }
 0xc39   :  { %v4741_v3 = vpop.f32.mrb[118].mxu0  ;;  %v6533_v11 = vld [vmem:[%s10029_s2 + $0x5] ss:$0 sm:$0xff] }
 0xc3a   :  { %v7734_v12 = vpop.f32.mrb[119].mxu0 }
 0xc3b   :  { %7766 = vmatpush3.bf16.msra.mxu0 %v8565_v10  ;;  %v6534_v12 = vld [vmem:[%s10029_s2 + $0x6] ss:$0 sm:$0xff] }
 0xc3c   :  { %7771 = vmatprep.subr.bf16.mxu0 %v8628_v40 }
 0xc3e   :  { %7768 = vmatmul.mubr.msk.bf16.vlgmr.msra.gmra.mrb[120].mxu0 %vm1438_vm0, %v9711_v55 }
 0xc3f   :  { %7772 = vmatpush3.bf16.msra.mxu0 %v8566_v13  ;;  %7779 = vmatprep.mubr.msk.bf16.mxu0 %vm8629_vm1, %v8628_v40 }
 0xc40   :  { %7773 = vmatprep.subr.bf16.mxu0 %v8628_v40 }
 0xc43   :  { %7774 = vmatpush3.bf16.msra.mxu0 %v8567_v14 }
 0xc44   :  { %7775 = vmatprep.subr.bf16.mxu0 %v8628_v40 }
 0xc47   :  { %7776 = vmatpush3.bf16.msra.mxu0 %v8568_v15 }
 0xc48   :  { %7777 = vmatprep.subr.bf16.mxu0 %v8628_v40 }
 0xc4b   :  { %7778 = vmatpush3.bf16.msra.mxu0 %v8569_v16 }
 0xc4c   :  { %7783 = vmatprep.subr.bf16.mxu0 %v8628_v40 }
 0xc4e   :  { %7780 = vmatmul.mubr.msk.bf16.vlgmr.msra.gmra.mrb[120].mxu0 %vm1438_vm0, %v4986_v18 }
 0xc4f   :  { %7784 = vmatpush3.bf16.msra.mxu0 %v8570_v17  ;;  %7791 = vmatprep.mubr.msk.bf16.mxu0 %vm8629_vm1, %v8628_v40 }
 0xc50   :  { %7785 = vmatprep.subr.bf16.mxu0 %v8628_v40 }
 0xc53   :  { %7786 = vmatpush3.bf16.msra.mxu0 %v8571_v19  ;;  %v8591_v19 = vld [vmem:[%s10028_s1 + $0x7d8] sm:$0xff]  }
 0xc54   :  { %7787 = vmatprep.subr.bf16.mxu0 %v8628_v40 }
 0xc57   :  { %7788 = vmatpush3.bf16.msra.mxu0 %v8572_v20  ;;  %v8592_v20 = vld [vmem:[%s10028_s1 + $0x7e0] sm:$0xff]  }
 0xc58   :  { %7789 = vmatprep.subr.bf16.mxu0 %v8628_v40 }
 0xc5b   :  { %7790 = vmatpush3.bf16.msra.mxu0 %v8573_v21  ;;  %v8593_v21 = vld [vmem:[%s10028_s1 + $0x7e8] sm:$0xff]  }
 0xc5c   :  { %7795 = vmatprep.subr.bf16.mxu0 %v8628_v40 }
 0xc5e   :  { %7792 = vmatmul.mubr.msk.bf16.vlgmr.msra.gmra.mrb[120].mxu0 %vm1438_vm0, %v9735_v2 }
 0xc5f   :  { %7796 = vmatpush3.bf16.msra.mxu0 %v8574_v22  ;;  %7803 = vmatprep.mubr.msk.bf16.mxu0 %vm8629_vm1, %v8628_v40  ;;  %v8594_v22 = vld [vmem:[%s10028_s1 + $0x7f0] ss:$0 sps:$4 sm:$0xff]  }
 0xc60   :  { %7797 = vmatprep.subr.bf16.mxu0 %v8628_v40 }
 0xc63   :  { %7798 = vmatpush3.bf16.msra.mxu0 %v8575_v23  ;;  %v5782_v23 = vld [vmem:[%s10028_s1 + $0x7f8] sm:$0x1] }
 0xc64   :  { %7799 = vmatprep.subr.bf16.mxu0 %v8628_v40 }
 0xc67   :  { %7800 = vmatpush3.bf16.msra.mxu0 %v8576_v24  ;;  %v5995_v24 = vld [vmem:[%s10028_s1 + $0x808] sm:$0x1] }
 0xc68   :  { %7801 = vmatprep.subr.bf16.mxu0 %v8628_v40 }
 0xc6b   :  { %7802 = vmatpush3.bf16.msra.mxu0 %v8577_v25 }
 0xc6c   :  { %7807 = vmatprep.subr.bf16.mxu0 %v8628_v40 }
 0xc6e   :  { %7804 = vmatmul.mubr.msk.bf16.vlgmr.msra.gmra.mrb[120].mxu0 %vm1438_vm0, %v5140_v27 }
 0xc6f   :  { %7808 = vmatpush3.bf16.msra.mxu0 %v8578_v26  ;;  %7815 = vmatprep.mubr.msk.bf16.mxu0 %vm8629_vm1, %v8628_v40 }
 0xc70   :  { %7809 = vmatprep.subr.bf16.mxu0 %v8628_v40 }
 0xc73   :  { %7810 = vmatpush3.bf16.msra.mxu0 %v8579_v28 }
 0xc74   :  { %7811 = vmatprep.subr.bf16.mxu0 %v8628_v40 }
 0xc77   :  { %7812 = vmatpush3.bf16.msra.mxu0 %v8580_v29 }
 0xc78   :  { %7813 = vmatprep.subr.bf16.mxu0 %v8628_v40 }
 0xc7b   :  { %7814 = vmatpush3.bf16.msra.mxu0 %v8581_v30 }
 0xc7c   :  { %7819 = vmatprep.subr.bf16.mxu0 %v8628_v40 }
 0xc7e   :  { %7816 = vmatmul.mubr.msk.bf16.vlgmr.msra.gmra.mrb[120].mxu0 %vm1438_vm0, %v9757_v9 }
 0xc7f   :  { %7820 = vmatpush3.bf16.msra.mxu0 %v8582_v31  ;;  %7827 = vmatprep.mubr.msk.bf16.mxu0 %vm8629_vm1, %v8628_v40  ;;  %v5781_v31 = vld [vmem:[%s10028_s1 + $0x7f4] sm:$0x1] }
 0xc80   :  { %7821 = vmatprep.subr.bf16.mxu0 %v8628_v40 }
 0xc83   :  { %7822 = vmatpush3.bf16.msra.mxu0 %v8583_v32 }
 0xc84   :  { %7823 = vmatprep.subr.bf16.mxu0 %v8628_v40 }
 0xc87   :  { %7824 = vmatpush3.bf16.msra.mxu0 %v8584_v33 }
 0xc88   :  { %7825 = vmatprep.subr.bf16.mxu0 %v8628_v40 }
 0xc8b   :  { %7826 = vmatpush3.bf16.msra.mxu0 %v8585_v34 }
 0xc8c   :  { %7831 = vmatprep.subr.bf16.mxu0 %v8628_v40 }
 0xc8e   :  { %7828 = vmatmul.mubr.msk.bf16.vlgmr.msra.gmra.mrb[120].mxu0 %vm1438_vm0, %v5294_v36 }
 0xc8f   :  { %7832 = vmatpush3.bf16.msra.mxu0 %v8586_v35  ;;  %7839 = vmatprep.mubr.msk.bf16.mxu0 %vm8629_vm1, %v8628_v40 }
 0xc90   :  { %7833 = vmatprep.subr.bf16.mxu0 %v8628_v40 }
 0xc93   :  { %7834 = vmatpush3.bf16.msra.mxu0 %v8587_v37  ;;  %v5866_v37 = vld [vmem:[%s10028_s1 + $0x7fc] sm:$0x1] }
 0xc94   :  { %7835 = vmatprep.subr.bf16.mxu0 %v8628_v40 }
 0xc97   :  { %7836 = vmatpush3.bf16.msra.mxu0 %v8588_v39 }
 0xc98   :  { %7837 = vmatprep.subr.bf16.mxu0 %v8628_v40 }
 0xc9b   :  { %7838 = vmatpush3.bf16.msra.mxu0 %v8589_v42 }
 0xc9c   :  { %7935 = vmatprep.subr.bf16.mxu0 %v8628_v40 }
 0xc9e   :  { %7840 = vmatmul.mubr.msk.bf16.vlgmr.msra.gmra.mrb[120].mxu0 %vm1438_vm0, %v4748_v43 }
 0xc9f   :  { %7937 = vmatprep.mubr.msk.bf16.mxu0 %vm8629_vm1, %v8628_v40 }
 0xca4   :  { %7936 = vmatpush3.bf16.xpose.msra.mxu0 %v5782_v23 }
 0xca5   :  { %7941 = vmatprep.subr.bf16.mxu0 %v8628_v40 }
 0xd71   :  { %v5432_v50 = vpop.f32.mrb[120].mxu0 }
 0xd72   :  { %v5473_v51 = vrot.slane %v5432_v50, 4  ;;  %v7841_v52 = vpop.f32.mrb[121].mxu0 }
 0xd73   :  { %v5435_v55 = vpop.f32.mrb[122].mxu0 }
 0xd74   :  { %v5474_v56 = vadd.f32 %v5473_v51, %v5432_v50  ;;  %v7842_v57 = vpop.f32.mrb[123].mxu0  ;;  %v6082_v51 = vld [vmem:[%s10028_s1 + $0x810] sm:$0x1] }
 0xd76   :  { %v5475_v60 = vrot.slane %v5474_v56, 2 }
 0xd78   :  { %v5476_v61 = vadd.f32 %v5475_v60, %v5474_v56 }
 0xd7a   :  { %v5477_v63 = vrot.slane %v5476_v61, 1 }
 0xd7c   :  { %v5478_v0 = vadd.f32 %v5477_v63, %v5476_v61  ;;  %v5953_v63 = vld [vmem:[%s10028_s1 + $0x804] sm:$0x1] }
 0xd7e   :  { %7876 = vmatmul.mubr.f32.vlgmr.msra.gmra.mrb[52].mxu1 %v5478_v0 }
 0xd7f   :  { %8063 = vmatpush3.bf16.msra.mxu1 %v9696_v47  ;;  %7910 = vmatprep.mubr.msk.f32.mxu1 %vm8629_vm1, %v8628_v40 }
 0xd80   :  { %8064 = vmatprep.subr.bf16.mxu1 %v8630_v41 }
 0xd83   :  { %8066 = vmatpush3.bf16.msra.mxu1 %v9709_v54 }
 0xd84   :  { %8067 = vmatprep.subr.bf16.mxu1 %v8630_v41 }
 0xd87   :  { %8069 = vmatpush3.bf16.msra.mxu1 %v9722_v59 }
 0xd88   :  { %8070 = vmatprep.subr.bf16.mxu1 %v8630_v41 }
 0xd8b   :  { %8072 = vmatpush3.bf16.msra.mxu1 %v9733_v1 }
 0xd8c   :  { %8073 = vmatprep.subr.bf16.mxu1 %v8630_v41 }
 0xd8f   :  { %8075 = vmatpush3.bf16.msra.mxu1 %v9746_v6 }
 0xd90   :  { %8076 = vmatprep.subr.bf16.mxu1 %v8630_v41 }
 0xd93   :  { %8078 = vmatpush3.bf16.msra.mxu1 %v6618_v45 }
 0xd94   :  { %8079 = vmatprep.subr.bf16.mxu1 %v8630_v41 }
 0xd97   :  { %8081 = vmatpush3.bf16.msra.mxu1 %v6619_v46 }
 0xd98   :  { %8082 = vmatprep.subr.bf16.mxu1 %v8630_v41 }
 0xd9b   :  { %8084 = vmatpush3.bf16.msra.mxu1 %v6620_v48  ;;  %v5908_v48 = vld [vmem:[%s10028_s1 + $0x800] sm:$0x1] }
 0xd9c   :  { %7913 = vmatprep.subr.bf16.mxu1 %v8628_v40 }
 0xe51   :  { %v5545_v47 = vpop.f32.mrb[52].mxu1 }
 0xe52   :  { %v5549_v54 = vmul.f32 0.0625, %v5545_v47  ;;  %v7877_v59 = vpop.f32.mrb[53].mxu1 }
 0xe54   :  { %v5553_v1 = vrot.slane %v5549_v54, %v9369_v38 }
 0xe56   :  { %v5554_v2 = vsub.f32 %v5432_v50, %v5553_v1 }
 0xe58   :  { %v5555_v4 = vmul.f32 %v5554_v2, %v5554_v2 }
 0xe5a   :  { %v5556_v5 = vrot.slane %v5555_v4, 4 }
 0xe5c   :  { %v5557_v6 = vadd.f32 %v5556_v5, %v5555_v4  ;;  %v6127_v4 = vld [vmem:[%s10028_s1 + $0x814] sm:$0x1] }
 0xe5e   :  { %v5558_v44 = vrot.slane %v5557_v6, 2 }
 0xe60   :  { %v5559_v58 = vadd.f32 %v5558_v44, %v5557_v6 }
 0xe62   :  { %v5560_v7 = vrot.slane %v5559_v58, 1 }
 0xe64   :  { %v5561_v8 = vadd.f32 %v5560_v7, %v5559_v58 }
 0xe66   :  { %7911 = vmatmul.mubr.f32.vlgmr.msra.gmra.mrb[54].mxu1 %v5561_v8 }
 0xe67   :  { %7915 = vmatprep.mubr.msk.bf16.mxu1 %vm8629_vm1, %v8628_v40 }
 0xf39   :  { %v5628_v41 = vpop.f32.mrb[54].mxu1 }
 0xf3a   :  { %v5632_v9 = vmul.f32 0.0625, %v5628_v41  ;;  %v7912_v49 = vpop.f32.mrb[55].mxu1 }
 0xf3c   :  { %v5633_v62 = vadd.f32 1e-05, %v5632_v9 }
 0xf3e   :  { %8599 = vrsqrt.f32 %v5633_v62 }
 0xf48   :  { %v8600_v10 = vpop.eup %8599 }
 0xf49   :  { %v5638_v53 = vrot.slane %v8600_v10, %v9369_v38  ;;  %v8590_v38 = vld [vmem:[%s10028_s1 + $0x7d0] sm:$0xff]  }
 0xf4b   :  { %v5639_v3 = vmul.f32 %v5638_v53, %v5554_v2  ;;  %v6040_v2 = vld [vmem:[%s10028_s1 + $0x80c] sm:$0x1] }
 0xf4d   :  { %v5644_v13 = vmul.f32 %v6533_v11, %v5639_v3 }
 0xf4f   :  { %v5649_v14 = vadd.f32 %v6534_v12, %v5644_v13 }
 0xf51   :  { %vm5650_vm0 = vcmp.ge.f32.partialorder %v5649_v14, 0.0  ;;  %v5651_v15 = vmul.f32 0.2, %v5649_v14 }
 0xf53   :  { %v5652_v16 = vsel %vm5650_vm0, %v5649_v14, %v5651_v15 }
 0xf54   :  { %v5653_v17 = vpack.c.bf16 %v5652_v16, %v5652_v16 }
 0xf56   :  { %v5702_v18 = vsel %vm4668_vm14, %v5653_v17, 0 }
 0xf57   :  { %7914 = vmatpush3.bf16.msra.mxu1 %v5702_v18 }
 0xf58   :  { %7965 = vmatprep.subr.bf16.mxu1 %v8628_v40 }
 0xf5a   :  { %7916 = vmatmul.mubr.msk.bf16.vlgmr.msra.gmra.mrb[56].mxu1 %vm4652_vm15, %v8590_v38 }
 0xf5b   :  { %7919 = vmatprep.mubr.msk.bf16.mxu1 %vm8629_vm1, %v8628_v40 }
 0xf60   :  { %7966 = vmatpush3.bf16.xpose.msra.mxu1 %v5995_v24 }
 0xf61   :  { %7977 = vmatprep.subr.bf16.mxu1 %v8628_v40 }
 0xf62   :  { %7920 = vmatmul.mubr.msk.bf16.gmra.mrb[60].mxu1 %vm4652_vm15, %v8591_v19 }
 0xf63   :  { %7923 = vmatprep.mubr.msk.bf16.mxu1 %vm8629_vm1, %v8628_v40 }
 0xf6a   :  { %7924 = vmatmul.mubr.msk.bf16.gmra.mrb[64].mxu1 %vm4652_vm15, %v8592_v20 }
 0xf6b   :  { %7927 = vmatprep.mubr.msk.bf16.mxu1 %vm8629_vm1, %v8628_v40 }
 0xf72   :  { %7928 = vmatmul.mubr.msk.bf16.gmra.mrb[68].mxu1 %vm4652_vm15, %v8593_v21 }
 0xf73   :  { %7931 = vmatprep.mubr.msk.bf16.mxu1 %vm8629_vm1, %v8628_v40 }
 0xf7a   :  { %7932 = vmatmul.mubr.msk.bf16.gmra.mrb[72].mxu1 %vm4652_vm15, %v8594_v22 }
 0xf7b   :  { %7967 = vmatprep.mubr.msk.bf16.mxu1 %vm8629_vm1, %v8628_v40 }
0x102d   :  { %v5738_v25 = vpop.f32.mrb[56].mxu1 }
0x102e   :  { %v7917_v26 = vpop.f32.mrb[57].mxu1 }
0x102f   :  { %v5741_v27 = vpop.f32.mrb[58].mxu1 }
0x1030   :  { %v5776_v28 = vpack.c.bf16 %v5741_v27, %v5738_v25  ;;  %v7918_v29 = vpop.f32.mrb[59].mxu1 }
0x1032   :  { %v5784_v30 = vrot.slane %v5776_v28, 4 }
0x1034   :  { %7938 = vmatmul.mubr.bf16.vlgmr.msra.gmra.mrb[124].mxu0 %v5784_v30 }
0x1035   :  { %7942 = vmatpush3.bf16.xpose.msra.mxu0 %v5781_v31  ;;  %7943 = vmatprep.mubr.msk.bf16.mxu0 %vm8629_vm1, %v8628_v40  ;;  %v5746_v32 = vpop.f32.mrb[60].mxu1 }
0x1036   :  { %7947 = vmatprep.subr.bf16.mxu0 %v8628_v40  ;;  %v7921_v33 = vpop.f32.mrb[61].mxu1 }
0x1037   :  { %v5749_v34 = vpop.f32.mrb[62].mxu1 }
0x1038   :  { %v5777_v35 = vpack.c.bf16 %v5749_v34, %v5746_v32  ;;  %v7922_v36 = vpop.f32.mrb[63].mxu1 }
0x103a   :  { %v5910_v61 = vrot.slane %v5777_v35, 4 }
0x103c   :  { %7944 = vmatmul.mubr.bf16.vlgmr.msra.gmra.mrb[128].mxu0 %v5776_v28 }
0x103d   :  { %7948 = vmatpush3.bf16.xpose.msra.mxu0 %v5866_v37  ;;  %7949 = vmatprep.mubr.msk.bf16.mxu0 %vm8629_vm1, %v8628_v40  ;;  %v5754_v39 = vpop.f32.mrb[64].mxu1  ;;  %v6545_v37 = vld [vmem:[%s10029_s2 + $0x7] ss:$0 sm:$0xff] }
0x103e   :  { %7953 = vmatprep.subr.bf16.mxu0 %v8628_v40  ;;  %v7925_v42 = vpop.f32.mrb[65].mxu1 }
0x103f   :  { %v5757_v43 = vpop.f32.mrb[66].mxu1 }
0x1040   :  { %v5778_v45 = vpack.c.bf16 %v5757_v43, %v5754_v39  ;;  %v7926_v46 = vpop.f32.mrb[67].mxu1 }
0x1042   :  { %v5997_v50 = vrot.slane %v5778_v45, 4 }
0x1044   :  { %7950 = vmatmul.mubr.bf16.vlgmr.msra.gmra.mrb[132].mxu0 %v5777_v35  ;;  %7968 = vmatmul.mubr.bf16.vlgmr.msra.gmra.mrb[76].mxu1 %v5997_v50 }
0x1045   :  { %7954 = vmatpush3.bf16.xpose.msra.mxu0 %v5908_v48  ;;  %7955 = vmatprep.mubr.msk.bf16.mxu0 %vm8629_vm1, %v8628_v40  ;;  %v5762_v52 = vpop.f32.mrb[68].mxu1 }
0x1046   :  { %7959 = vmatprep.subr.bf16.mxu0 %v8628_v40  ;;  %7978 = vmatpush3.bf16.xpose.msra.mxu1 %v6082_v51  ;;  %v7929_v55 = vpop.f32.mrb[69].mxu1 }
0x1047   :  { %v5765_v56 = vpop.f32.mrb[70].mxu1  ;;  %7979 = vmatprep.mubr.msk.bf16.mxu1 %vm8629_vm1, %v8628_v40 }
0x1048   :  { %v5779_v57 = vpack.c.bf16 %v5765_v56, %v5762_v52  ;;  %v7930_v60 = vpop.f32.mrb[71].mxu1 }
0x104a   :  { %v6084_v0 = vrot.slane %v5779_v57, 4 }
0x104c   :  { %7956 = vmatmul.mubr.bf16.vlgmr.msra.gmra.mrb[136].mxu0 %v5910_v61 }
0x104d   :  { %7960 = vmatpush3.bf16.xpose.msra.mxu0 %v5953_v63  ;;  %7961 = vmatprep.mubr.msk.bf16.mxu0 %vm8629_vm1, %v8628_v40  ;;  %v5770_v47 = vpop.f32.mrb[72].mxu1 }
0x104e   :  { %7971 = vmatprep.subr.bf16.mxu0 %v8628_v40  ;;  %7980 = vmatmul.mubr.bf16.vlgmr.msra.gmra.mrb[80].mxu1 %v6084_v0  ;;  %v7933_v54 = vpop.f32.mrb[73].mxu1  ;;  %v5780_v5 = vpack.c.bf16 %v5770_v47, %v5770_v47 }
0x104f   :  { %v5773_v59 = vpop.f32.mrb[74].mxu1 }
0x1050   :  { %v7934_v1 = vpop.f32.mrb[75].mxu1 }
0x1054   :  { %7962 = vmatmul.mubr.bf16.vlgmr.msra.gmra.mrb[140].mxu0 %v5778_v45 }
0x1055   :  { %7972 = vmatpush3.bf16.xpose.msra.mxu0 %v6040_v2  ;;  %7973 = vmatprep.mubr.msk.bf16.mxu0 %vm8629_vm1, %v8628_v40 }
0x1056   :  { %7983 = vmatprep.subr.bf16.mxu0 %v8628_v40 }
0x105c   :  { %7974 = vmatmul.mubr.bf16.vlgmr.msra.gmra.mrb[144].mxu0 %v5779_v57 }
0x105d   :  { %7984 = vmatpush3.bf16.xpose.msra.mxu0 %v6127_v4  ;;  %7985 = vmatprep.mubr.msk.bf16.mxu0 %vm8629_vm1, %v8628_v40  ;;  %vm6175_vm1 = vcmask 15360  }
0x1064   :  { %7986 = vmatmul.mubr.bf16.vlgmr.msra.gmra.mrb[148].mxu0 %v5780_v5 }
0x1107   :  { %v5820_v6 = vpop.f32.mrb[124].mxu0 }
0x1108   :  { %v7939_v44 = vpop.f32.mrb[125].mxu0 }
0x1109   :  { %v5823_v58 = vpop.f32.mrb[126].mxu0 }
0x110a   :  { %v7940_v7 = vpop.f32.mrb[127].mxu0 }
0x110f   :  { %v5860_v8 = vpop.f32.mrb[128].mxu0 }
0x1110   :  { %v5861_v41 = vadd.f32 %v5860_v8, %v5820_v6  ;;  %v7945_v9 = vpop.f32.mrb[129].mxu0 }
0x1111   :  { %v5863_v49 = vpop.f32.mrb[130].mxu0 }
0x1112   :  { %v7946_v62 = vpop.f32.mrb[131].mxu0 }
0x1117   :  { %v5901_v10 = vpop.f32.mrb[132].mxu0  ;;  %v6033_v53 = vpop.f32.mrb[76].mxu1 }
0x1118   :  { %v5907_v11 = vadd.f32 %v5901_v10, %v5861_v41  ;;  %v7951_v3 = vpop.f32.mrb[133].mxu0  ;;  %v7969_v12 = vpop.f32.mrb[77].mxu1 }
0x1119   :  { %v5904_v13 = vpop.f32.mrb[134].mxu0  ;;  %v6036_v14 = vpop.f32.mrb[78].mxu1 }
0x111a   :  { %v7952_v15 = vpop.f32.mrb[135].mxu0  ;;  %v7970_v40 = vpop.f32.mrb[79].mxu1 }
0x111f   :  { %v5946_v16 = vpop.f32.mrb[136].mxu0 }
0x1120   :  { %v5952_v17 = vadd.f32 %v5946_v16, %v5907_v11  ;;  %v7957_v18 = vpop.f32.mrb[137].mxu0 }
0x1121   :  { %v5949_v38 = vpop.f32.mrb[138].mxu0  ;;  %v6120_v19 = vpop.f32.mrb[80].mxu1 }
0x1122   :  { %v7958_v20 = vpop.f32.mrb[139].mxu0  ;;  %v7981_v21 = vpop.f32.mrb[81].mxu1 }
0x1123   :  { %v6123_v22 = vpop.f32.mrb[82].mxu1 }
0x1124   :  { %v7982_v23 = vpop.f32.mrb[83].mxu1 }
0x1127   :  { %v5988_v24 = vpop.f32.mrb[140].mxu0 }
0x1128   :  { %v5994_v25 = vadd.f32 %v5988_v24, %v5952_v17  ;;  %v7963_v26 = vpop.f32.mrb[141].mxu0 }
0x1129   :  { %v5991_v27 = vpop.f32.mrb[142].mxu0 }
0x112a   :  { %v7964_v28 = vpop.f32.mrb[143].mxu0  ;;  %v6039_v29 = vadd.f32 %v6033_v53, %v5994_v25 }
0x112f   :  { %v6075_v30 = vpop.f32.mrb[144].mxu0 }
0x1130   :  { %v6081_v31 = vadd.f32 %v6075_v30, %v6039_v29  ;;  %v7975_v32 = vpop.f32.mrb[145].mxu0 }
0x1131   :  { %v6078_v33 = vpop.f32.mrb[146].mxu0 }
0x1132   :  { %v7976_v34 = vpop.f32.mrb[147].mxu0  ;;  %v6126_v35 = vadd.f32 %v6120_v19, %v6081_v31 }
0x1137   :  { %v6162_v36 = vpop.f32.mrb[148].mxu0 }
0x1138   :  { %v6168_v39 = vadd.f32 %v6162_v36, %v6126_v35  ;;  %v7987_v42 = vpop.f32.mrb[149].mxu0 }
0x1139   :  { %v6165_v43 = vpop.f32.mrb[150].mxu0 }
0x113a   :  { %v6174_v45 = vadd.f32 %v6545_v37, %v6168_v39  ;;  %v7988_v46 = vpop.f32.mrb[151].mxu0 }
0x113c   :  { %6176 = vst.msk [vmem:[#allocation2] sm:$0xff] %vm6175_vm1, %v6174_v45 }
0x113d   :  { %8615 = shalt.err (!%p8612_p4)
}
0x113e   :  { %s8616_s2 = scalar_lea.hbm %s10030_s3, 128 }
0x113f   :  { %p8617_p5 = scmp.ne.s32.totalorder %s10030_s3, %s8616_s2  ;;  %p8620_p6 = scmp.lt.u32.totalorder %s8616_s2, %s10030_s3 }
0x1141   :  { %p8622_p7 = pnand %p8620_p6, %p8617_p5 }
0x1143   :  { %8625 = shalt.err (!%p8622_p7)
}
0x1144   :  { %6186 = dma.vmem_to_hbm [thread:$0]  %s6184_s4, 128, %s10030_s3, [#allocation3]  }
0x1145   :  { %8626 = dma.done.wait [#allocation3], 128  }
0x1146   :  { %8627 = vsyncadd [#allocation3], 4294967168 }
0x1147   :  { %6190 = vsyncpa [#allocation3], 1 }

</bundles_post_ra>
